<compile_context>
chip_gen: v5e
topology: v5e:2x2
jax: 0.10.0
libtpu: 0.0.40
codegen_flags: <defaults>
</compile_context>

<pallas_src>
import math
from itertools import combinations

import jax
import jax.numpy as jnp
from jax.experimental import pallas as pl
from jax.experimental.pallas import tpu as pltpu


# ----------------------------- JAX glue ------------------------------------ #

def _positional_encoding(x, pe_scale_factor=0.1):
    """x: [N, L, D] -> x + pe[:L] * scale  (dropout is identity at inference)."""
    _, L, d = x.shape
    position = jnp.arange(L, dtype=jnp.float32)[:, None]
    div_term = jnp.exp(
        jnp.arange(0, d, 2, dtype=jnp.float32) * -(math.log(10000.0) / d))
    ang = position * div_term                       # [L, d//2]
    pe = jnp.zeros((L, d), jnp.float32)
    pe = pe.at[:, 0::2].set(jnp.sin(ang) * pe_scale_factor)
    pe = pe.at[:, 1::2].set(jnp.cos(ang) * pe_scale_factor)
    return x + pe[None]


# --------------------------- fused Pallas kernel ----------------------------- #

def _fused_class_attention(xq, xs, w_cat, prm, *, way, n_q, T, d_out, d_pad, way_pad):
    """Fused projection + LayerNorm(K) + per-class cross-attention + distance.

    xq    : [n_q*T, din]       query tuple features (bf16)
    xs    : [way, shot*T, din] support tuple features grouped by class (bf16)
    w_cat : [din, 2*d_pad]     packed zero-padded [Wk | Wv] (bf16)
    prm   : [8, 2*d_pad]       row0=[bk|bv], row1=[g|beta] (support keys),
                               row2=[g|beta]*1/sqrt(d_out) (query keys)  (f32)
    returns: [n_q, way_pad]    lane-dense logits (negated mean sq. Frobenius distance)
    """
    QT, din = xq.shape
    ST = xs.shape[1]
    inv_T = 1.0 / T
    inv_d = 1.0 / d_out

    def kernel(xq_ref, xs_ref, w_ref, prm_ref, out_ref, qk_sc, qv_sc):
        c = pl.program_id(0)
        w = w_ref[...]                                   # [din, 2*d_pad] bf16
        prm_all = prm_ref[...]                           # [8, 2*d_pad]   f32
        b = prm_all[0:1, :]                              # [1, 2*d_pad]
        g_s, beta_s = prm_all[1:2, :d_pad], prm_all[1:2, d_pad:]
        g_q, beta_q = prm_all[2:3, :d_pad], prm_all[2:3, d_pad:]

        lane = jax.lax.broadcasted_iota(jnp.int32, (1, d_pad), 1)
        fmask = (lane < d_out).astype(jnp.float32)

        def layernorm(k, g, beta):
            # Padded lanes of k are exactly zero (zero weight/bias columns), so the
            # mean needs no mask; the variance masks only the centered padded lanes.
            mean = jnp.sum(k, axis=-1, keepdims=True) * inv_d
            cen = k - mean
            var = jnp.sum(cen * cen * fmask, axis=-1, keepdims=True) * inv_d
            return cen * jax.lax.rsqrt(var + 1e-5) * g + beta

        @pl.when(c == 0)
        def _():
            # Query projection + LayerNorm + folded 1/sqrt(d_out): computed once,
            # reused by every class iteration straight from VMEM scratch.
            kv_q = jnp.dot(xq_ref[...], w, preferred_element_type=jnp.float32) + b
            qk_sc[...] = layernorm(kv_q[:, :d_pad], g_q, beta_q).astype(jnp.bfloat16)
            qv_sc[...] = kv_q[:, d_pad:]
            out_ref[...] = jnp.zeros_like(out_ref)

        # this class's support projection + LayerNorm on the key half
        kv_s = jnp.dot(xs_ref[...], w, preferred_element_type=jnp.float32) + b
        ck_n = layernorm(kv_s[:, :d_pad], g_s, beta_s)
        cv = kv_s[:, d_pad:]

        # scores[q*T+t, k*T+s] = <LN(qk)/sqrt(d_out), LN(ck)>
        # TODO(synk): at production shapes inspect (pl.lower_as_mlir) whether this
        # dot_general inserts an XLU transpose of ck_n on the critical path.
        scores = jax.lax.dot_general(
            qk_sc[...], ck_n.astype(jnp.bfloat16),
            (((1,), (1,)), ((), ())),
            preferred_element_type=jnp.float32)          # [QT, ST]

        # joint softmax over (support example, support tuple) per query tuple
        m = jnp.max(scores, axis=-1, keepdims=True)
        e = jnp.exp(scores - m)
        p = e * pl.reciprocal(jnp.sum(e, axis=-1, keepdims=True), approx=True)

        proto = jnp.dot(p.astype(jnp.bfloat16), cv.astype(jnp.bfloat16),
                        preferred_element_type=jnp.float32)   # [QT, d_pad]
        diff = qv_sc[...] - proto
        sq = diff * diff
        if T % 8 == 0:
            # sublane split at a multiple-of-8 boundary: free relayout
            per_q = jnp.sum(jnp.sum(sq.reshape(n_q, T, d_pad), axis=1),
                            axis=-1, keepdims=True)           # [n_q, 1]
        else:
            # avoid a sublane-splitting reshape: lane-reduce, then grouping matmul
            per_row = jnp.sum(sq, axis=-1, keepdims=True)      # [QT, 1]
            G = (jax.lax.broadcasted_iota(jnp.int32, (n_q, QT), 1) // T
                 == jax.lax.broadcasted_iota(jnp.int32, (n_q, QT), 0)
                 ).astype(jnp.float32)                         # [n_q, QT]
            per_q = jnp.dot(G, per_row, preferred_element_type=jnp.float32)

        # scatter this class's column into the resident lane-dense logits block
        onehot = (jax.lax.broadcasted_iota(jnp.int32, (1, way_pad), 1) == c
                  ).astype(jnp.float32)
        out_ref[...] += (-(per_q * inv_T)) * onehot

    # TODO(synk): at production sizes (din3~6144, d_pad~1152) switch the constant
    # xq / w_cat / prm blocks to pipeline_mode=pl.Buffered(1) (never re-fetched) or
    # add a din3-reduction grid axis, and tile QT — needed for v7x's 64 MiB VMEM and
    # v5e's 16 MiB scoped default.  A leading n_q-tile "parallel" axis then restores
    # v7x megacore sharding (class axis stays inner/"arbitrary").
    return pl.pallas_call(
        kernel,
        out_shape=jax.ShapeDtypeStruct((n_q, way_pad), jnp.float32),
        grid=(way,),
        in_specs=[
            pl.BlockSpec((QT, din), lambda c: (0, 0)),          # resident across grid
            pl.BlockSpec((None, ST, din), lambda c: (c, 0, 0)),  # this class's support
            pl.BlockSpec((din, 2 * d_pad), lambda c: (0, 0)),
            pl.BlockSpec((8, 2 * d_pad), lambda c: (0, 0)),
        ],
        out_specs=pl.BlockSpec((n_q, way_pad), lambda c: (0, 0)),  # resident accumulator
        scratch_shapes=[
            pltpu.VMEM((QT, d_pad), jnp.bfloat16),   # normalized+scaled query keys
            pltpu.VMEM((QT, d_pad), jnp.float32),    # query values
        ],
        compiler_params=pltpu.CompilerParams(
            dimension_semantics=("arbitrary",),      # sequential: scratch hoist is valid
            vmem_limit_bytes=64 * 1024 * 1024),
    )(xq, xs, w_cat, prm)


# ------------------------------ wrapper ------------------------------------- #

def temporal_cross_transformer(support_set, support_labels, queries, params, *,
                               seq_len, way, shot, temporal_set_size,
                               trans_linear_out_dim):
    n_q = queries.shape[0]
    d_in = support_set.shape[-1]
    d_out = trans_linear_out_dim
    din3 = d_in * temporal_set_size
    d_pad = ((d_out + 127) // 128) * 128      # pad feature dim to full 128 lanes
    way_pad = ((way + 127) // 128) * 128      # lane-dense logits block
    scale = 1.0 / math.sqrt(d_out)

    # positional encoding
    support_set = _positional_encoding(support_set)
    queries = _positional_encoding(queries)

    # temporal tuple gathering: [N, seq, d] -> [N, T, ts*d]
    tuples = jnp.asarray(
        list(combinations(range(seq_len), temporal_set_size)), dtype=jnp.int32)
    T = tuples.shape[0]

    def gather_tuples(x):
        n = x.shape[0]
        return x[:, tuples, :].reshape(n, T, din3)

    s_t = gather_tuples(support_set)                     # [n_s, T, din3]
    q_t = gather_tuples(queries)                         # [n_q, T, din3]

    # group support by class (sorted labels, matching torch.unique order)
    # TODO(synk): assumes an equal number of shots per class (standard episode);
    # torch's data-dependent per-class index_select has no static-shape equivalent.
    order = jnp.argsort(support_labels)
    xs = s_t[order].reshape(way, shot * T, din3).astype(jnp.bfloat16)
    xq = q_t.reshape(n_q * T, din3).astype(jnp.bfloat16)

    # pack & zero-pad projection weights to 128 lanes per head: [Wk | Wv]
    wk = jnp.zeros((din3, d_pad), jnp.float32).at[:, :d_out].set(params["wk"])
    wv = jnp.zeros((din3, d_pad), jnp.float32).at[:, :d_out].set(params["wv"])
    w_cat = jnp.concatenate([wk, wv], axis=1).astype(jnp.bfloat16)   # [din3, 2*d_pad]

    # single small-param block: row0=[bk|bv], row1=[gamma|beta] (support keys),
    # row2=[gamma|beta] * 1/sqrt(d_out)  (query keys, score scale folded in)
    prm = jnp.zeros((8, 2 * d_pad), jnp.float32)
    prm = prm.at[0, :d_out].set(params["bk"][0])
    prm = prm.at[0, d_pad:d_pad + d_out].set(params["bv"][0])
    prm = prm.at[1, :d_out].set(params["ln_k_g"][0])
    prm = prm.at[1, d_pad:d_pad + d_out].set(params["ln_k_b"][0])
    prm = prm.at[2, :d_out].set(params["ln_k_g"][0] * scale)
    prm = prm.at[2, d_pad:d_pad + d_out].set(params["ln_k_b"][0] * scale)

    logits_pad = _fused_class_attention(
        xq, xs, w_cat, prm,
        way=way, n_q=n_q, T=T, d_out=d_out, d_pad=d_pad, way_pad=way_pad)
    return {"logits": logits_pad[:, :way]}                 # [n_q, way]


# ------------------------------ demo ---------------------------------------- #

if __name__ == "__main__":
    # small args consistent with the module
    seq_len = 8
    d_in = 16                 # trans_linear_in_dim
    d_out = 32                # trans_linear_out_dim
    way = 2
    shot = 2
    queries_per_class = 2
    temporal_set_size = 3     # -> tuples_len = C(8,3) = 56

    n_support = way * shot
    n_queries = way * queries_per_class

    key = jax.random.PRNGKey(0)
    k0, k1, k2, k3, k4, k5 = jax.random.split(key, 6)

    support_set = jax.random.normal(k0, (n_support, seq_len, d_in), jnp.float32)
    queries = jax.random.normal(k1, (n_queries, seq_len, d_in), jnp.float32)
    support_labels = jnp.repeat(jnp.arange(way, dtype=jnp.int32), shot)

    din3 = d_in * temporal_set_size
    bound = 1.0 / math.sqrt(din3)
    params = {
        "wk": jax.random.uniform(k2, (din3, d_out), jnp.float32, -bound, bound),
        "bk": jax.random.uniform(k3, (1, d_out), jnp.float32, -bound, bound),
        "wv": jax.random.uniform(k4, (din3, d_out), jnp.float32, -bound, bound),
        "bv": jax.random.uniform(k5, (1, d_out), jnp.float32, -bound, bound),
        "ln_k_g": jnp.ones((1, d_out), jnp.float32),   # LayerNorm default weight
        "ln_k_b": jnp.zeros((1, d_out), jnp.float32),  # LayerNorm default bias
    }

    out = temporal_cross_transformer(
        support_set, support_labels, queries, params,
        seq_len=seq_len, way=way, shot=shot,
        temporal_set_size=temporal_set_size, trans_linear_out_dim=d_out)

    logits = jax.block_until_ready(out["logits"])
    assert logits.shape == (n_queries, way), logits.shape
    assert bool(jnp.all(jnp.isfinite(logits)))
    print("KERNEL_OK")
</pallas_src>

<mosaic_0001>
module attributes {stable_mosaic.version = 11 : i64} {
  func.func @kernel(%arg0: i32, %arg1: memref<224x48xbf16, #tpu.memory_space<vmem>>, %arg2: memref<1x112x48xbf16, #tpu.memory_space<vmem>>, %arg3: memref<48x256xbf16, #tpu.memory_space<vmem>>, %arg4: memref<8x256xf32, #tpu.memory_space<vmem>>, %arg5: memref<4x128xf32, #tpu.memory_space<vmem>>, %arg6: memref<224x128xbf16, #tpu.memory_space<vmem>>, %arg7: memref<224x128xf32, #tpu.memory_space<vmem>>) attributes {dimension_semantics = [#tpu.dimension_semantics<arbitrary>], iteration_bounds = array<i64: 2>, scalar_prefetch = 0 : i64, scratch_operands = 2 : i64, tpu.core_type = #tpu.core_type<tc>, window_params = [{pipeline_mode = #tpu.pipeline_mode<synchronous>, transform_indices = @transform_0, window_bounds = array<i64: 224, 48>}, {transform_indices = @transform_1, window_bounds = array<i64: 1, 112, 48>}, {pipeline_mode = #tpu.pipeline_mode<synchronous>, transform_indices = @transform_2, window_bounds = array<i64: 48, 256>}, {pipeline_mode = #tpu.pipeline_mode<synchronous>, transform_indices = @transform_3, window_bounds = array<i64: 8, 256>}, {pipeline_mode = #tpu.pipeline_mode<synchronous>, transform_indices = @transform_4, window_bounds = array<i64: 4, 128>}]} {
    %c0 = arith.constant 0 : index
    %c0_0 = arith.constant 0 : index
    %0 = vector.load %arg3[%c0, %c0_0] : memref<48x256xbf16, #tpu.memory_space<vmem>>, vector<48x256xbf16>
    %c0_1 = arith.constant 0 : index
    %c0_2 = arith.constant 0 : index
    %1 = vector.load %arg4[%c0_1, %c0_2] : memref<8x256xf32, #tpu.memory_space<vmem>>, vector<8x256xf32>
    %2 = vector.extract_strided_slice %1 {offsets = [0, 0], sizes = [1, 256], strides = [1, 1]} : vector<8x256xf32> to vector<1x256xf32>
    %3 = vector.extract_strided_slice %1 {offsets = [1, 0], sizes = [1, 128], strides = [1, 1]} : vector<8x256xf32> to vector<1x128xf32>
    %4 = vector.extract_strided_slice %1 {offsets = [1, 128], sizes = [1, 128], strides = [1, 1]} : vector<8x256xf32> to vector<1x128xf32>
    %5 = vector.extract_strided_slice %1 {offsets = [2, 0], sizes = [1, 128], strides = [1, 1]} : vector<8x256xf32> to vector<1x128xf32>
    %6 = vector.extract_strided_slice %1 {offsets = [2, 128], sizes = [1, 128], strides = [1, 1]} : vector<8x256xf32> to vector<1x128xf32>
    %7 = tpu.iota {dimensions = array<i32: 1>} : vector<1x128xi32>
    %c32_i32 = arith.constant 32 : i32
    %8 = vector.broadcast %c32_i32 : i32 to vector<1x128xi32>
    %9 = arith.cmpi slt, %7, %8 : vector<1x128xi32>
    %10 = arith.extui %9 : vector<1x128xi1> to vector<1x128xi32>
    %11 = arith.sitofp %10 : vector<1x128xi32> to vector<1x128xf32>
    %c0_i32 = arith.constant 0 : i32
    %12 = arith.cmpi eq, %arg0, %c0_i32 : i32
    %13 = arith.extui %12 : i1 to i32
    %c0_i32_3 = arith.constant 0 : i32
    %14 = arith.cmpi ne, %13, %c0_i32_3 : i32
    scf.if %14 {
      %c0_28 = arith.constant 0 : index
      %c0_29 = arith.constant 0 : index
      %82 = vector.load %arg1[%c0_28, %c0_29] : memref<224x48xbf16, #tpu.memory_space<vmem>>, vector<224x48xbf16>
      %cst_30 = arith.constant dense<0.000000e+00> : vector<224x256xf32>
      %83 = tpu.matmul %82, %0, %cst_30 {dimension_numbers = #tpu.dot_dimension_numbers<[1], [0], [0], [1], [0, 0, 1, 1], [], []>} : vector<224x48xbf16>, vector<48x256xbf16>, vector<224x256xf32> -> vector<224x256xf32>
      %84 = vector.broadcast %2 : vector<1x256xf32> to vector<224x256xf32>
      %85 = arith.addf %83, %84 : vector<224x256xf32>
      %86 = vector.extract_strided_slice %85 {offsets = [0, 0], sizes = [224, 128], strides = [1, 1]} : vector<224x256xf32> to vector<224x128xf32>
      %cst_31 = arith.constant dense<0.000000e+00> : vector<224xf32>
      %87 = vector.multi_reduction <add>, %86, %cst_31 [1] : vector<224x128xf32> to vector<224xf32>
      %88 = vector.shape_cast %87 : vector<224xf32> to vector<224x1xf32>
      %cst_32 = arith.constant 3.125000e-02 : f32
      %89 = vector.broadcast %cst_32 : f32 to vector<224x1xf32>
      %90 = arith.mulf %88, %89 : vector<224x1xf32>
      %91 = vector.broadcast %90 : vector<224x1xf32> to vector<224x128xf32>
      %92 = arith.subf %86, %91 : vector<224x128xf32>
      %93 = arith.mulf %92, %92 : vector<224x128xf32>
      %94 = vector.broadcast %11 : vector<1x128xf32> to vector<224x128xf32>
      %95 = arith.mulf %93, %94 : vector<224x128xf32>
      %cst_33 = arith.constant dense<0.000000e+00> : vector<224xf32>
      %96 = vector.multi_reduction <add>, %95, %cst_33 [1] : vector<224x128xf32> to vector<224xf32>
      %97 = vector.shape_cast %96 : vector<224xf32> to vector<224x1xf32>
      %cst_34 = arith.constant 3.125000e-02 : f32
      %98 = vector.broadcast %cst_34 : f32 to vector<224x1xf32>
      %99 = arith.mulf %97, %98 : vector<224x1xf32>
      %cst_35 = arith.constant 9.99999974E-6 : f32
      %100 = vector.broadcast %cst_35 : f32 to vector<224x1xf32>
      %101 = arith.addf %99, %100 : vector<224x1xf32>
      %102 = math.rsqrt %101 : vector<224x1xf32>
      %103 = vector.broadcast %102 : vector<224x1xf32> to vector<224x128xf32>
      %104 = arith.mulf %92, %103 : vector<224x128xf32>
      %105 = vector.broadcast %5 : vector<1x128xf32> to vector<224x128xf32>
      %106 = arith.mulf %104, %105 : vector<224x128xf32>
      %107 = vector.broadcast %6 : vector<1x128xf32> to vector<224x128xf32>
      %108 = arith.addf %106, %107 : vector<224x128xf32>
      %109 = arith.truncf %108 : vector<224x128xf32> to vector<224x128xbf16>
      %c0_36 = arith.constant 0 : index
      %c0_37 = arith.constant 0 : index
      %110 = vector.load %arg6[%c0_36, %c0_37] : memref<224x128xbf16, #tpu.memory_space<vmem>>, vector<224x128xbf16>
      tpu.vector_store %arg6[%c0_36, %c0_37], %109 {strides = array<i32>} : memref<224x128xbf16, #tpu.memory_space<vmem>>, vector<224x128xbf16>,
      %111 = vector.extract_strided_slice %85 {offsets = [0, 128], sizes = [224, 128], strides = [1, 1]} : vector<224x256xf32> to vector<224x128xf32>
      %c0_38 = arith.constant 0 : index
      %c0_39 = arith.constant 0 : index
      %112 = vector.load %arg7[%c0_38, %c0_39] : memref<224x128xf32, #tpu.memory_space<vmem>>, vector<224x128xf32>
      tpu.vector_store %arg7[%c0_38, %c0_39], %111 {strides = array<i32>} : memref<224x128xf32, #tpu.memory_space<vmem>>, vector<224x128xf32>,
      %cst_40 = arith.constant 0.000000e+00 : f32
      %113 = vector.broadcast %cst_40 : f32 to vector<4x128xf32>
      %c0_41 = arith.constant 0 : index
      %c0_42 = arith.constant 0 : index
      %114 = vector.load %arg5[%c0_41, %c0_42] : memref<4x128xf32, #tpu.memory_space<vmem>>, vector<4x128xf32>
      tpu.vector_store %arg5[%c0_41, %c0_42], %113 {strides = array<i32>} : memref<4x128xf32, #tpu.memory_space<vmem>>, vector<4x128xf32>,
    } else {
    }
    %c0_4 = arith.constant 0 : index
    %c0_5 = arith.constant 0 : index
    %c0_6 = arith.constant 0 : index
    %15 = vector.load %arg2[%c0_4, %c0_5, %c0_6] : memref<1x112x48xbf16, #tpu.memory_space<vmem>>, vector<1x112x48xbf16>
    %16 = vector.shape_cast %15 : vector<1x112x48xbf16> to vector<112x48xbf16>
    %cst = arith.constant dense<0.000000e+00> : vector<112x256xf32>
    %17 = tpu.matmul %16, %0, %cst {dimension_numbers = #tpu.dot_dimension_numbers<[1], [0], [0], [1], [0, 0, 1, 1], [], []>} : vector<112x48xbf16>, vector<48x256xbf16>, vector<112x256xf32> -> vector<112x256xf32>
    %18 = vector.broadcast %2 : vector<1x256xf32> to vector<112x256xf32>
    %19 = arith.addf %17, %18 : vector<112x256xf32>
    %20 = vector.extract_strided_slice %19 {offsets = [0, 0], sizes = [112, 128], strides = [1, 1]} : vector<112x256xf32> to vector<112x128xf32>
    %cst_7 = arith.constant dense<0.000000e+00> : vector<112xf32>
    %21 = vector.multi_reduction <add>, %20, %cst_7 [1] : vector<112x128xf32> to vector<112xf32>
    %22 = vector.shape_cast %21 : vector<112xf32> to vector<112x1xf32>
    %cst_8 = arith.constant 3.125000e-02 : f32
    %23 = vector.broadcast %cst_8 : f32 to vector<112x1xf32>
    %24 = arith.mulf %22, %23 : vector<112x1xf32>
    %25 = vector.broadcast %24 : vector<112x1xf32> to vector<112x128xf32>
    %26 = arith.subf %20, %25 : vector<112x128xf32>
    %27 = arith.mulf %26, %26 : vector<112x128xf32>
    %28 = vector.broadcast %11 : vector<1x128xf32> to vector<112x128xf32>
    %29 = arith.mulf %27, %28 : vector<112x128xf32>
    %cst_9 = arith.constant dense<0.000000e+00> : vector<112xf32>
    %30 = vector.multi_reduction <add>, %29, %cst_9 [1] : vector<112x128xf32> to vector<112xf32>
    %31 = vector.shape_cast %30 : vector<112xf32> to vector<112x1xf32>
    %cst_10 = arith.constant 3.125000e-02 : f32
    %32 = vector.broadcast %cst_10 : f32 to vector<112x1xf32>
    %33 = arith.mulf %31, %32 : vector<112x1xf32>
    %cst_11 = arith.constant 9.99999974E-6 : f32
    %34 = vector.broadcast %cst_11 : f32 to vector<112x1xf32>
    %35 = arith.addf %33, %34 : vector<112x1xf32>
    %36 = math.rsqrt %35 : vector<112x1xf32>
    %37 = vector.broadcast %36 : vector<112x1xf32> to vector<112x128xf32>
    %38 = arith.mulf %26, %37 : vector<112x128xf32>
    %39 = vector.broadcast %3 : vector<1x128xf32> to vector<112x128xf32>
    %40 = arith.mulf %38, %39 : vector<112x128xf32>
    %41 = vector.broadcast %4 : vector<1x128xf32> to vector<112x128xf32>
    %42 = arith.addf %40, %41 : vector<112x128xf32>
    %43 = vector.extract_strided_slice %19 {offsets = [0, 128], sizes = [112, 128], strides = [1, 1]} : vector<112x256xf32> to vector<112x128xf32>
    %c0_12 = arith.constant 0 : index
    %c0_13 = arith.constant 0 : index
    %44 = vector.load %arg6[%c0_12, %c0_13] : memref<224x128xbf16, #tpu.memory_space<vmem>>, vector<224x128xbf16>
    %45 = arith.truncf %42 : vector<112x128xf32> to vector<112x128xbf16>
    %cst_14 = arith.constant dense<0.000000e+00> : vector<224x112xf32>
    %46 = tpu.matmul %44, %45, %cst_14 {dimension_numbers = #tpu.dot_dimension_numbers<[1], [1], [0], [0], [0, 0, 1, 0], [], []>} : vector<224x128xbf16>, vector<112x128xbf16>, vector<224x112xf32> -> vector<224x112xf32>
    %cst_15 = arith.constant dense<0xFF800000> : vector<224xf32>
    %47 = vector.multi_reduction <maximumf>, %46, %cst_15 [1] : vector<224x112xf32> to vector<224xf32>
    %48 = vector.shape_cast %47 : vector<224xf32> to vector<224x1xf32>
    %49 = vector.broadcast %48 : vector<224x1xf32> to vector<224x112xf32>
    %50 = arith.subf %46, %49 : vector<224x112xf32>
    %51 = math.exp %50 : vector<224x112xf32>
    %cst_16 = arith.constant dense<0.000000e+00> : vector<224xf32>
    %52 = vector.multi_reduction <add>, %51, %cst_16 [1] : vector<224x112xf32> to vector<224xf32>
    %53 = vector.shape_cast %52 : vector<224xf32> to vector<224x1xf32>
    %54 = tpu.reciprocal %53 {approx = true} : vector<224x1xf32> -> vector<224x1xf32>
    %55 = vector.broadcast %54 : vector<224x1xf32> to vector<224x112xf32>
    %56 = arith.mulf %51, %55 : vector<224x112xf32>
    %57 = arith.truncf %56 : vector<224x112xf32> to vector<224x112xbf16>
    %58 = arith.truncf %43 : vector<112x128xf32> to vector<112x128xbf16>
    %cst_17 = arith.constant dense<0.000000e+00> : vector<224x128xf32>
    %59 = tpu.matmul %57, %58, %cst_17 {dimension_numbers = #tpu.dot_dimension_numbers<[1], [0], [0], [1], [0, 0, 1, 1], [], []>} : vector<224x112xbf16>, vector<112x128xbf16>, vector<224x128xf32> -> vector<224x128xf32>
    %c0_18 = arith.constant 0 : index
    %c0_19 = arith.constant 0 : index
    %60 = vector.load %arg7[%c0_18, %c0_19] : memref<224x128xf32, #tpu.memory_space<vmem>>, vector<224x128xf32>
    %61 = arith.subf %60, %59 : vector<224x128xf32>
    %62 = arith.mulf %61, %61 : vector<224x128xf32>
    %63 = vector.shape_cast %62 : vector<224x128xf32> to vector<4x56x128xf32>
    %cst_20 = arith.constant dense<0.000000e+00> : vector<4x128xf32>
    %64 = vector.multi_reduction <add>, %63, %cst_20 [1] : vector<4x56x128xf32> to vector<4x128xf32>
    %cst_21 = arith.constant dense<0.000000e+00> : vector<4xf32>
    %65 = vector.multi_reduction <add>, %64, %cst_21 [1] : vector<4x128xf32> to vector<4xf32>
    %66 = vector.shape_cast %65 : vector<4xf32> to vector<4x1xf32>
    %67 = tpu.iota {dimensions = array<i32: 1>} : vector<1x128xi32>
    %68 = vector.broadcast %arg0 : i32 to vector<1x128xi32>
    %69 = arith.cmpi eq, %67, %68 : vector<1x128xi32>
    %70 = arith.extui %69 : vector<1x128xi1> to vector<1x128xi32>
    %71 = arith.sitofp %70 : vector<1x128xi32> to vector<1x128xf32>
    %c0_22 = arith.constant 0 : index
    %c0_23 = arith.constant 0 : index
    %72 = vector.load %arg5[%c0_22, %c0_23] : memref<4x128xf32, #tpu.memory_space<vmem>>, vector<4x128xf32>
    %cst_24 = arith.constant 0.0178571437 : f32
    %73 = vector.broadcast %cst_24 : f32 to vector<4x1xf32>
    %74 = arith.mulf %66, %73 : vector<4x1xf32>
    %cst_25 = arith.constant 0.000000e+00 : f32
    %75 = vector.broadcast %cst_25 : f32 to vector<4x1xf32>
    %76 = arith.subf %75, %74 : vector<4x1xf32>
    %77 = vector.broadcast %76 : vector<4x1xf32> to vector<4x128xf32>
    %78 = vector.broadcast %71 : vector<1x128xf32> to vector<4x128xf32>
    %79 = arith.mulf %77, %78 : vector<4x128xf32>
    %80 = arith.addf %72, %79 : vector<4x128xf32>
    %c0_26 = arith.constant 0 : index
    %c0_27 = arith.constant 0 : index
    %81 = vector.load %arg5[%c0_26, %c0_27] : memref<4x128xf32, #tpu.memory_space<vmem>>, vector<4x128xf32>
    tpu.vector_store %arg5[%c0_26, %c0_27], %80 {strides = array<i32>} : memref<4x128xf32, #tpu.memory_space<vmem>>, vector<4x128xf32>,
    return
  }
  func.func @transform_0(%arg0: i32) -> (i32, i32) {
    %c0_i32 = arith.constant 0 : i32
    %c0_i32_0 = arith.constant 0 : i32
    %c0_i32_1 = arith.constant 0 : i32
    return %c0_i32, %c0_i32_0 : i32, i32
  }
  func.func @transform_1(%arg0: i32) -> (i32, i32, i32) {
    %c0_i32 = arith.constant 0 : i32
    %c0_i32_0 = arith.constant 0 : i32
    %c0_i32_1 = arith.constant 0 : i32
    return %arg0, %c0_i32, %c0_i32_0 : i32, i32, i32
  }
  func.func @transform_2(%arg0: i32) -> (i32, i32) {
    %c0_i32 = arith.constant 0 : i32
    %c0_i32_0 = arith.constant 0 : i32
    %c0_i32_1 = arith.constant 0 : i32
    return %c0_i32, %c0_i32_0 : i32, i32
  }
  func.func @transform_3(%arg0: i32) -> (i32, i32) {
    %c0_i32 = arith.constant 0 : i32
    %c0_i32_0 = arith.constant 0 : i32
    %c0_i32_1 = arith.constant 0 : i32
    return %c0_i32, %c0_i32_0 : i32, i32
  }
  func.func @transform_4(%arg0: i32) -> (i32, i32) {
    %c0_i32 = arith.constant 0 : i32
    %c0_i32_0 = arith.constant 0 : i32
    %c0_i32_1 = arith.constant 0 : i32
    return %c0_i32, %c0_i32_0 : i32, i32
  }
}

</mosaic_0001>

<bundles_post_ra>
// kernel: tpu_custom_call.1
= control target key start
LH: loop header
LB: loop body
LE: loop exit
PB: predicated region body
PF: predicated region fallthrough
CT: control target
= control target key end

     0   :  { %9 = vsyncpa [#allocation5], 0  ;;  %s3321_s15 = smov 0   ;;  %s5097_s0 = inlined_call_operand.vmem [shape: bf16[224,48], index: 0, kind: input, shape index: {}]   ;;  %s5098_s1 = inlined_call_operand.vmem [shape: bf16[2,112,48], index: 1, kind: input, shape index: {}]   ;;  %s5099_s2 = inlined_call_operand.vmem [shape: bf16[48,256], index: 2, kind: input, shape index: {}]   ;;  %s5100_s3 = inlined_call_operand.vmem [shape: f32[8,256], index: 3, kind: input, shape index: {}]   ;;  %s5101_s4 = inlined_call_operand.hbm [shape: f32[4,128], index: 4, kind: output, shape index: {}]  }
   0x1 LB: > { %s3327_s16 = sadd.s32 4294967295, %s3291_s15   ;;  %p2636_p0 = scmp.ge.s32.totalorder %s3291_s15, 1  ;;  %s3291_s15 = sphi %s3321_s15, %s15_s15  }
   0x2   : > { %p158_p1 = scmp.lt.s32.totalorder %s3291_s15, 3 }
   0x4   : > { %p159_p2 = pnand %p2636_p0, %p158_p1 }
   0x6   : > { %162 = sbr.rel (%p159_p2) target bundleno = 2141 (0x85d), region = 36 }
   0xb   : > { %p179_p3 = scmp.lt.s32.totalorder %s3327_s16, 1  ;;  %v3335_v0 = vld [vmem:[%s5099_s2 + $0x4] sm:$0xf]  ;;  %v3340_v1 = vld [vmem:[%s5099_s2] sm:$0xf]  ;;  %v193_v3 = vlaneseq  ;;  %v3374_v9 = vld [vmem:[%s5100_s3 + $0x8] sm:$0xff] }
   0xc   : > { %5106 = vst [vmem:[#allocation7_spill] sm:$0xff] %v3335_v0  ;;  %v3345_v2 = vld [vmem:[%s5100_s3] sm:$0xff]  ;;  %v3358_v6 = vld [vmem:[%s5099_s2 + $0x8] sm:$0xf0]  ;;  %v3364_v7 = vld [vmem:[%s5099_s2 + $0x4] sm:$0xf0] }
   0xd   : > { %v3350_v4 = vld [vmem:[%s5099_s2 + $0x4] sm:$0xf]  ;;  %v2698_v5 = vld [vmem:[%s5099_s2] sm:$0xf]  ;;  %5107 = vst [vmem:[#allocation8_spill] sm:$0xff] %v3358_v6  ;;  %s180_s29 = scalar_select %p179_p3, %s3327_s16, 1 }
   0xe   : > { %v3369_v8 = vld [vmem:[%s5099_s2 + $0x8] sm:$0xf0]  ;;  %5108 = vst [vmem:[#allocation9_spill] sm:$0xff] %v3374_v9  ;;  %v2892_v10 = vld [vmem:[%s5099_s2 + $0x4] sm:$0xf0]  ;;  %v3397_v15 = vand.u32 127, %v193_v3 }
   0xf   : > { %v3382_v11 = vld [vmem:[%s5099_s2 + $0x14] sm:$0xf]  ;;  %v3387_v12 = vld [vmem:[%s5099_s2 + $0x10] sm:$0xf]  ;;  %s3039_s18 = smul.u32 56, %s180_s29  ;;  %v5102_v28 = vmov 0.0  }
  0x10   : > { %5109 = vst [vmem:[#allocation10_spill] sm:$0xff] %v3382_v11  ;;  %v3392_v13 = vld [vmem:[%s5099_s2 + $0x14] sm:$0xf]  ;;  %v2706_v14 = vld [vmem:[%s5099_s2 + $0x10] sm:$0xf]  ;;  %vm195_vm0 = vcmp.lt.s32.totalorder %v3397_v15, 32 }
  0x11   : > { %5110 = vst [vmem:[#allocation11_spill] sm:$0xff] %v3397_v15  ;;  %v3402_v16 = vld [vmem:[%s5099_s2 + $0x18] sm:$0xf0]  ;;  %v3407_v17 = vld [vmem:[%s5099_s2 + $0x14] sm:$0xf0]  ;;  %s3417_s5 = scalar_lea.vmem %s5098_s1, %s3039_s18  ;;  %v3460_v29 = vsel %vm195_vm0, 1.0, %v5102_v28 }
  0x12   : > { %5111 = vst [vmem:[#allocation12_spill] sm:$0xff] %v3402_v16  ;;  %v3412_v18 = vld [vmem:[%s5099_s2 + $0x18] sm:$0xf0]  ;;  %v2896_v19 = vld [vmem:[%s5099_s2 + $0x14] sm:$0xf0]  ;;  %p2639_p4 = scmp.ne.s32.totalorder %s3327_s16, 0 }
  0x13   : > { %v3425_v20 = vld [vmem:[%s5099_s2 + $0x24] sm:$0xf]  ;;  %v3430_v21 = vld [vmem:[%s5099_s2 + $0x20] sm:$0xf]  ;;  %v3443_v24 = vld [vmem:[%s5099_s2 + $0x28] sm:$0xf0] }
  0x14   : > { %5112 = vst [vmem:[#allocation13_spill] sm:$0xff] %v3425_v20  ;;  %v3435_v22 = vld [vmem:[%s5099_s2 + $0x24] sm:$0xf]  ;;  %v2714_v23 = vld [vmem:[%s5099_s2 + $0x20] sm:$0xf]  ;;  %201 = sbr.rel (%p2639_p4) target bundleno = 549 (0x225), region = 40 }
  0x15   : > { %5113 = vst [vmem:[#allocation14_spill] sm:$0xff] %v3443_v24  ;;  %v3448_v25 = vld [vmem:[%s5099_s2 + $0x24] sm:$0xf0]  ;;  %v3453_v26 = vld [vmem:[%s5099_s2 + $0x28] sm:$0xf0] }
  0x16   : > { %v2900_v27 = vld [vmem:[%s5099_s2 + $0x24] sm:$0xf0] }
  0x19   : > { %v2715_v30 = vor.u32 %v2900_v27, %v2714_v23  ;;  %v2707_v31 = vor.u32 %v2896_v19, %v2706_v14  ;;  %v2699_v32 = vor.u32 %v2892_v10, %v2698_v5  ;;  %v3466_v33 = vld [vmem:[%s5097_s0] sm:$0xff]  ;;  %v3471_v34 = vld [vmem:[%s5097_s0 + $0x38] sm:$0xff]  ;;  %vm332_vm1 = vcmask 392192   ;;  %v3480_v35 = vld [vmem:[%s5097_s0 + $0x8] sm:$0xff] }
  0x1a   : > { %v3485_v36 = vld [vmem:[%s5097_s0 + $0x40] sm:$0xff]  ;;  %v3494_v37 = vld [vmem:[%s5097_s0 + $0x10] sm:$0xff]  ;;  %v3499_v38 = vld [vmem:[%s5097_s0 + $0x48] sm:$0xff]  ;;  %v3562_v47 = vperm.slane %v3345_v2, 0 }
  0x1b   : > { %380 = vmatpush.bf16.msra.mxu0 %v2715_v30  ;;  %3019 = vmatpush.bf16.msra.mxu2 %v2715_v30  ;;  %v3508_v39 = vld [vmem:[%s5097_s0 + $0x18] sm:$0xff]  ;;  %v3513_v40 = vld [vmem:[%s5097_s0 + $0x50] sm:$0xff]  ;;  %v3522_v41 = vld [vmem:[%s5097_s0 + $0x20] sm:$0xff] }
  0x1c   : > { %v3527_v42 = vld [vmem:[%s5097_s0 + $0x58] sm:$0xff]  ;;  %v3536_v43 = vld [vmem:[%s5097_s0 + $0x28] sm:$0xff]  ;;  %v3541_v44 = vld [vmem:[%s5097_s0 + $0x60] sm:$0xff] }
  0x1d   : > { %v3550_v45 = vld [vmem:[%s5097_s0 + $0x30] sm:$0xff]  ;;  %v3555_v46 = vld [vmem:[%s5097_s0 + $0x68] sm:$0xff] }
  0x1f   : > { %381 = vmatpush.bf16.msra.mxu0 %v2707_v31  ;;  %3020 = vmatpush.bf16.msra.mxu2 %v2707_v31 }
  0x23   : > { %382 = vmatpush.bf16.msra.mxu0 %v2699_v32  ;;  %3021 = vmatpush.bf16.msra.mxu2 %v2699_v32 }
  0x26   : > { %2720 = vmatmul.msk.bf16.vlgmr.msra.gmra.mxu0 %vm332_vm1, %v3466_v33  ;;  %2727 = vmatmul.msk.bf16.vlgmr.msra.gmra.mxu2 %vm332_vm1, %v3471_v34 }
  0x36   : > { %2721 = vmatmul.msk.bf16.gmra.mxu0 %vm332_vm1, %v3480_v35  ;;  %2728 = vmatmul.msk.bf16.gmra.mxu2 %vm332_vm1, %v3485_v36 }
  0x46   : > { %2722 = vmatmul.msk.bf16.gmra.mxu0 %vm332_vm1, %v3494_v37  ;;  %2729 = vmatmul.msk.bf16.gmra.mxu2 %vm332_vm1, %v3499_v38 }
  0x56   : > { %2723 = vmatmul.msk.bf16.gmra.mxu0 %vm332_vm1, %v3508_v39  ;;  %2730 = vmatmul.msk.bf16.gmra.mxu2 %vm332_vm1, %v3513_v40 }
  0x66   : > { %2724 = vmatmul.msk.bf16.gmra.mxu0 %vm332_vm1, %v3522_v41  ;;  %2731 = vmatmul.msk.bf16.gmra.mxu2 %vm332_vm1, %v3527_v42 }
  0x76   : > { %2725 = vmatmul.msk.bf16.gmra.mxu0 %vm332_vm1, %v3536_v43  ;;  %2732 = vmatmul.msk.bf16.gmra.mxu2 %vm332_vm1, %v3541_v44 }
  0x86   : > { %2726 = vmatmul.msk.bf16.gmra.mxu0 %vm332_vm1, %v3550_v45  ;;  %2733 = vmatmul.msk.bf16.gmra.mxu2 %vm332_vm1, %v3555_v46 }
  0xa3   : > { %v384_v48 = vpop.f32.mrf.mxu0 }
  0xa4   : > { %v3565_v49 = vadd.f32 %v384_v48, %v3562_v47 }
  0xa6   : > { %533 = vadd.xlane.f32.xlu0 %v3565_v49 }
  0xa9   : > { %v419_v50 = vpop.f32.mrf.mxu2 }
  0xaa   : > { %v3569_v51 = vadd.f32 %v419_v50, %v3562_v47 }
  0xab   : > { %v386_v52 = vpop.f32.mrf.mxu0 }
  0xac   : > { %v3572_v53 = vadd.f32 %v386_v52, %v3562_v47  ;;  %561 = vadd.xlane.f32.xlu2 %v3569_v51 }
  0xae   : > { %535 = vadd.xlane.f32.xlu0 %v3572_v53 }
  0xb1   : > { %v421_v54 = vpop.f32.mrf.mxu2 }
  0xb2   : > { %v3577_v56 = vadd.f32 %v421_v54, %v3562_v47 }
  0xb3   : > { %v389_v55 = vpop.f32.mrf.mxu0 }
  0xb4   : > { %v3580_v57 = vadd.f32 %v389_v55, %v3562_v47 }
  0xb6   : > { %537 = vadd.xlane.f32.xlu1 %v3580_v57  ;;  %563 = vadd.xlane.f32.xlu0 %v3577_v56 }
  0xb9   : > { %v424_v58 = vpop.f32.mrf.mxu2 }
  0xba   : > { %v3585_v59 = vadd.f32 %v424_v58, %v3562_v47 }
  0xbb   : > { %v391_v60 = vpop.f32.mrf.mxu0 }
  0xbc   : > { %v3592_v3 = vadd.f32 %v391_v60, %v3562_v47 }
  0xbe   : > { %565 = vadd.xlane.f32.xlu1 %v3585_v59 }
  0xc1   : > { %v426_v61 = vpop.f32.mrf.mxu2 }
  0xc2   : > { %v3589_v62 = vadd.f32 %v426_v61, %v3562_v47 }
  0xc3   : > { %v394_v63 = vpop.f32.mrf.mxu0 }
  0xc4   : > { %567 = vadd.xlane.f32.xlu2 %v3589_v62  ;;  %v3597_v10 = vadd.f32 %v394_v63, %v3562_v47 }
  0xc6   : > { %539 = vadd.xlane.f32.xlu1 %v3592_v3 }
  0xc9   : > { %v429_v5 = vpop.f32.mrf.mxu2 }
  0xca   : > { %v3600_v14 = vadd.f32 %v429_v5, %v3562_v47 }
  0xcb   : > { %v396_v19 = vpop.f32.mrf.mxu0 }
  0xcc   : > { %541 = vadd.xlane.f32.xlu2 %v3597_v10  ;;  %569 = vadd.xlane.f32.xlu0 %v3600_v14  ;;  %v3605_v27 = vadd.f32 %v396_v19, %v3562_v47 }
  0xd1   : > { %v431_v23 = vpop.f32.mrf.mxu2 }
  0xd2   : > { %v3608_v30 = vadd.f32 %v431_v23, %v3562_v47 }
  0xd3   : > { %v399_v31 = vpop.f32.mrf.mxu0 }
  0xd4   : > { %v3611_v32 = vadd.f32 %v399_v31, %v3562_v47  ;;  %543 = vadd.xlane.f32.xlu2 %v3605_v27  ;;  %571 = vadd.xlane.f32.xlu1 %v3608_v30 }
  0xd6   : > { %545 = vadd.xlane.f32.xlu0 %v3611_v32 }
  0xd9   : > { %v434_v48 = vpop.f32.mrf.mxu2 }
  0xda   : > { %v3617_v50 = vadd.f32 %v434_v48, %v3562_v47 }
  0xdb   : > { %v401_v52 = vpop.f32.mrf.mxu0 }
  0xdc   : > { %v3620_v54 = vadd.f32 %v401_v52, %v3562_v47  ;;  %573 = vadd.xlane.f32.xlu2 %v3617_v50 }
  0xde   : > { %547 = vadd.xlane.f32.xlu1 %v3620_v54 }
  0xe1   : > { %v436_v55 = vpop.f32.mrf.mxu2 }
  0xe2   : > { %v3625_v58 = vadd.f32 %v436_v55, %v3562_v47 }
  0xe3   : > { %v404_v60 = vpop.f32.mrf.mxu0 }
  0xe4   : > { %v3628_v61 = vadd.f32 %v404_v60, %v3562_v47  ;;  %575 = vadd.xlane.f32.xlu0 %v3625_v58 }
  0xe6   : > { %549 = vadd.xlane.f32.xlu2 %v3628_v61 }
  0xe9   : > { %v439_v63 = vpop.f32.mrf.mxu2 }
  0xea   : > { %v3633_v5 = vadd.f32 %v439_v63, %v3562_v47 }
  0xeb   : > { %v406_v19 = vpop.f32.mrf.mxu0 }
  0xec   : > { %v3636_v23 = vadd.f32 %v406_v19, %v3562_v47  ;;  %577 = vadd.xlane.f32.xlu1 %v3633_v5 }
  0xee   : > { %551 = vadd.xlane.f32.xlu0 %v3636_v23 }
  0xf1   : > { %v441_v31 = vpop.f32.mrf.mxu2 }
  0xf2   : > { %v3641_v48 = vadd.f32 %v441_v31, %v3562_v47 }
  0xf3   : > { %v409_v52 = vpop.f32.mrf.mxu0 }
  0xf4   : > { %v3644_v55 = vadd.f32 %v409_v52, %v3562_v47  ;;  %579 = vadd.xlane.f32.xlu2 %v3641_v48  ;;  %v2719_v52 = vor.u32 %v3435_v22, %v3453_v26  ;;  %v2703_v22 = vor.u32 %v3350_v4, %v3369_v8 }
  0xf6   : > { %553 = vadd.xlane.f32.xlu1 %v3644_v55  ;;  %3022 = vmatpush.bf16.msra.mxu3 %v2719_v52 }
  0xf7   : > { %459 = vmatpush.bf16.msra.mxu1 %v2719_v52 }
  0xf9   : > { %v444_v60 = vpop.f32.mrf.mxu2 }
  0xfa   : > { %v3649_v63 = vadd.f32 %v444_v60, %v3562_v47 }
  0xfb   : > { %v411_v19 = vpop.f32.mrf.mxu0 }
  0xfc   : > { %v3652_v28 = vadd.f32 %v411_v19, %v3562_v47  ;;  %581 = vadd.xlane.f32.xlu0 %v3649_v63  ;;  %v2711_v19 = vor.u32 %v3392_v13, %v3412_v18 }
  0xfe   : > { %555 = vadd.xlane.f32.xlu2 %v3652_v28  ;;  %3023 = vmatpush.bf16.msra.mxu3 %v2711_v19 }
  0xff   : > { %460 = vmatpush.bf16.msra.mxu1 %v2711_v19 }
 0x101   : > { %v446_v31 = vpop.f32.mrf.mxu2 }
 0x102   : > { %v3659_v15 = vadd.f32 %v446_v31, %v3562_v47  ;;  %3024 = vmatpush.bf16.msra.mxu3 %v2703_v22 }
 0x103   : > { %v414_v0 = vpop.f32.mrf.mxu0  ;;  %461 = vmatpush.bf16.msra.mxu1 %v2703_v22 }
 0x104   : > { %v3662_v60 = vadd.f32 %v414_v0, %v3562_v47  ;;  %583 = vadd.xlane.f32.xlu1 %v3659_v15 }
 0x105   : > { %2741 = vmatmul.msk.bf16.vlgmr.msra.gmra.mxu3 %vm332_vm1, %v3471_v34 }
 0x106   : > { %557 = vadd.xlane.f32.xlu0 %v3662_v60  ;;  %2734 = vmatmul.msk.bf16.vlgmr.msra.gmra.mxu1 %vm332_vm1, %v3466_v33 }
 0x109   : > { %v449_v6 = vpop.f32.mrf.mxu2 }
 0x10a   : > { %v3671_v26 = vadd.f32 %v449_v6, %v3562_v47 }
 0x10b   : > { %v416_v31 = vpop.f32.mrf.mxu0 }
 0x10c   : > { %v3674_v0 = vadd.f32 %v416_v31, %v3562_v47  ;;  %585 = vadd.xlane.f32.xlu2 %v3671_v26 }
 0x10e   : > { %559 = vadd.xlane.f32.xlu1 %v3674_v0 }
 0x111   : > { %v451_v4 = vpop.f32.mrf.mxu2 }
 0x112   : > { %v3683_v6 = vadd.f32 %v451_v4, %v3562_v47 }
 0x114   : > { %587 = vadd.xlane.f32.xlu0 %v3683_v6 }
 0x115   : > { %2742 = vmatmul.msk.bf16.gmra.mxu3 %vm332_vm1, %v3485_v36 }
 0x116   : > { %2735 = vmatmul.msk.bf16.gmra.mxu1 %vm332_vm1, %v3480_v35 }
 0x119   : > { %v534_v8 = vpop.xlane.xlu0 %533 }
 0x11a   : > { %v589_v13 = vmul.f32 0.03125, %v534_v8 }
 0x11c   : > { %v3687_v18 = vsub.f32 %v3565_v49, %v589_v13 }
 0x11e   : > { %v645_v52 = vmul.f32 %v3687_v18, %v3687_v18 }
 0x11f   : > { %v562_v34 = vpop.xlane.xlu2 %561 }
 0x120   : > { %v603_v33 = vmul.f32 0.03125, %v562_v34  ;;  %v673_v47 = vmul.f32 %v3460_v29, %v645_v52 }
 0x121   : > { %v536_v19 = vpop.xlane.xlu0 %535 }
 0x122   : > { %v3697_v22 = vsub.f32 %v3569_v51, %v603_v33  ;;  %v590_v31 = vmul.f32 0.03125, %v536_v19  ;;  %701 = vadd.xlane.f32.xlu1 %v673_v47 }
 0x124   : > { %v3700_v49 = vsub.f32 %v3572_v53, %v590_v31  ;;  %v659_v4 = vmul.f32 %v3697_v22, %v3697_v22 }
 0x125   : > { %2743 = vmatmul.msk.bf16.gmra.mxu3 %vm332_vm1, %v3499_v38 }
 0x126   : > { %v687_v36 = vmul.f32 %v3460_v29, %v659_v4  ;;  %v646_v35 = vmul.f32 %v3700_v49, %v3700_v49  ;;  %2736 = vmatmul.msk.bf16.gmra.mxu1 %vm332_vm1, %v3494_v37 }
 0x128   : > { %729 = vadd.xlane.f32.xlu0 %v687_v36  ;;  %v674_v8 = vmul.f32 %v3460_v29, %v646_v35 }
 0x129   : > { %v538_v13 = vpop.xlane.xlu1 %537  ;;  %v564_v52 = vpop.xlane.xlu0 %563 }
 0x12a   : > { %v591_v51 = vmul.f32 0.03125, %v538_v13  ;;  %v604_v34 = vmul.f32 0.03125, %v564_v52  ;;  %703 = vadd.xlane.f32.xlu2 %v674_v8 }
 0x12c   : > { %v3709_v33 = vsub.f32 %v3580_v57, %v591_v51  ;;  %v3712_v53 = vsub.f32 %v3577_v56, %v604_v34 }
 0x12e   : > { %v647_v47 = vmul.f32 %v3709_v33, %v3709_v33  ;;  %v660_v19 = vmul.f32 %v3712_v53, %v3712_v53 }
 0x130   : > { %v675_v31 = vmul.f32 %v3460_v29, %v647_v47  ;;  %v688_v57 = vmul.f32 %v3460_v29, %v660_v19 }
 0x131   : > { %v566_v4 = vpop.xlane.xlu1 %565 }
 0x132   : > { %v605_v36 = vmul.f32 0.03125, %v566_v4  ;;  %705 = vadd.xlane.f32.xlu0 %v675_v31  ;;  %731 = vadd.xlane.f32.xlu1 %v688_v57 }
 0x134   : > { %v3725_v56 = vsub.f32 %v3585_v59, %v605_v36 }
 0x135   : > { %2744 = vmatmul.msk.bf16.gmra.mxu3 %vm332_vm1, %v3513_v40 }
 0x136   : > { %v661_v35 = vmul.f32 %v3725_v56, %v3725_v56  ;;  %2737 = vmatmul.msk.bf16.gmra.mxu1 %vm332_vm1, %v3508_v39 }
 0x137   : > { %v568_v8 = vpop.xlane.xlu2 %567 }
 0x138   : > { %v606_v13 = vmul.f32 0.03125, %v568_v8  ;;  %v689_v38 = vmul.f32 %v3460_v29, %v661_v35 }
 0x139   : > { %v540_v52 = vpop.xlane.xlu1 %539 }
 0x13a   : > { %v3731_v37 = vsub.f32 %v3589_v62, %v606_v13  ;;  %v592_v51 = vmul.f32 0.03125, %v540_v52  ;;  %733 = vadd.xlane.f32.xlu2 %v689_v38 }
 0x13c   : > { %v3734_v34 = vsub.f32 %v3592_v3, %v592_v51  ;;  %v662_v59 = vmul.f32 %v3731_v37, %v3731_v37 }
 0x13e   : > { %v690_v47 = vmul.f32 %v3460_v29, %v662_v59  ;;  %v648_v19 = vmul.f32 %v3734_v34, %v3734_v34 }
 0x13f   : > { %v542_v31 = vpop.xlane.xlu2 %541  ;;  %v570_v57 = vpop.xlane.xlu0 %569 }
 0x140   : > { %v593_v62 = vmul.f32 0.03125, %v542_v31  ;;  %v607_v4 = vmul.f32 0.03125, %v570_v57  ;;  %735 = vadd.xlane.f32.xlu0 %v690_v47  ;;  %v676_v3 = vmul.f32 %v3460_v29, %v648_v19 }
 0x142   : > { %v3747_v36 = vsub.f32 %v3597_v10, %v593_v62  ;;  %v3750_v35 = vsub.f32 %v3600_v14, %v607_v4  ;;  %707 = vadd.xlane.f32.xlu1 %v676_v3 }
 0x144   : > { %v649_v40 = vmul.f32 %v3747_v36, %v3747_v36  ;;  %v663_v8 = vmul.f32 %v3750_v35, %v3750_v35 }
 0x145   : > { %2745 = vmatmul.msk.bf16.gmra.mxu3 %vm332_vm1, %v3527_v42 }
 0x146   : > { %v677_v39 = vmul.f32 %v3460_v29, %v649_v40  ;;  %v691_v10 = vmul.f32 %v3460_v29, %v663_v8  ;;  %2738 = vmatmul.msk.bf16.gmra.mxu1 %vm332_vm1, %v3522_v41 }
 0x147   : > { %v544_v13 = vpop.xlane.xlu2 %543  ;;  %v572_v38 = vpop.xlane.xlu1 %571 }
 0x148   : > { %v594_v52 = vmul.f32 0.03125, %v544_v13  ;;  %v608_v51 = vmul.f32 0.03125, %v572_v38  ;;  %709 = vadd.xlane.f32.xlu2 %v677_v39 }
 0x149   : > { %v546_v59 = vpop.xlane.xlu0 %545 }
 0x14a   : > { %v3759_v14 = vsub.f32 %v3605_v27, %v594_v52  ;;  %v3762_v47 = vsub.f32 %v3608_v30, %v608_v51  ;;  %v595_v19 = vmul.f32 0.03125, %v546_v59  ;;  %737 = vadd.xlane.f32.xlu1 %v691_v10 }
 0x14c   : > { %v3765_v31 = vsub.f32 %v3611_v32, %v595_v19  ;;  %v650_v57 = vmul.f32 %v3759_v14, %v3759_v14  ;;  %v664_v62 = vmul.f32 %v3762_v47, %v3762_v47 }
 0x14e   : > { %v678_v4 = vmul.f32 %v3460_v29, %v650_v57  ;;  %v692_v3 = vmul.f32 %v3460_v29, %v664_v62  ;;  %v651_v27 = vmul.f32 %v3765_v31, %v3765_v31 }
 0x14f   : > { %v574_v30 = vpop.xlane.xlu2 %573 }
 0x150   : > { %v609_v32 = vmul.f32 0.03125, %v574_v30  ;;  %711 = vadd.xlane.f32.xlu0 %v678_v4  ;;  %739 = vadd.xlane.f32.xlu2 %v692_v3  ;;  %v679_v40 = vmul.f32 %v3460_v29, %v651_v27 }
 0x151   : > { %v548_v8 = vpop.xlane.xlu1 %547 }
 0x152   : > { %v3781_v39 = vsub.f32 %v3617_v50, %v609_v32  ;;  %v596_v13 = vmul.f32 0.03125, %v548_v8  ;;  %713 = vadd.xlane.f32.xlu1 %v679_v40 }
 0x154   : > { %v3784_v38 = vsub.f32 %v3620_v54, %v596_v13  ;;  %v665_v42 = vmul.f32 %v3781_v39, %v3781_v39 }
 0x155   : > { %2746 = vmatmul.msk.bf16.gmra.mxu3 %vm332_vm1, %v3541_v44 }
 0x156   : > { %v693_v52 = vmul.f32 %v3460_v29, %v665_v42  ;;  %v652_v41 = vmul.f32 %v3784_v38, %v3784_v38  ;;  %2739 = vmatmul.msk.bf16.gmra.mxu1 %vm332_vm1, %v3536_v43 }
 0x157   : > { %v576_v51 = vpop.xlane.xlu0 %575 }
 0x158   : > { %v610_v10 = vmul.f32 0.03125, %v576_v51  ;;  %741 = vadd.xlane.f32.xlu0 %v693_v52  ;;  %v680_v59 = vmul.f32 %v3460_v29, %v652_v41 }
 0x159   : > { %v550_v50 = vpop.xlane.xlu2 %549 }
 0x15a   : > { %v3793_v19 = vsub.f32 %v3625_v58, %v610_v10  ;;  %v597_v57 = vmul.f32 0.03125, %v550_v50  ;;  %715 = vadd.xlane.f32.xlu2 %v680_v59 }
 0x15c   : > { %v3796_v54 = vsub.f32 %v3628_v61, %v597_v57  ;;  %v666_v62 = vmul.f32 %v3793_v19, %v3793_v19 }
 0x15e   : > { %v694_v4 = vmul.f32 %v3460_v29, %v666_v62  ;;  %v653_v3 = vmul.f32 %v3796_v54, %v3796_v54 }
 0x15f   : > { %v578_v27 = vpop.xlane.xlu1 %577 }
 0x160   : > { %v611_v58 = vmul.f32 0.03125, %v578_v27  ;;  %743 = vadd.xlane.f32.xlu1 %v694_v4  ;;  %v681_v61 = vmul.f32 %v3460_v29, %v653_v3 }
 0x161   : > { %v552_v30 = vpop.xlane.xlu0 %551 }
 0x162   : > { %v3809_v32 = vsub.f32 %v3633_v5, %v611_v58  ;;  %v598_v40 = vmul.f32 0.03125, %v552_v30  ;;  %717 = vadd.xlane.f32.xlu0 %v681_v61 }
 0x164   : > { %v3812_v8 = vsub.f32 %v3636_v23, %v598_v40  ;;  %v667_v44 = vmul.f32 %v3809_v32, %v3809_v32 }
 0x165   : > { %2747 = vmatmul.msk.bf16.gmra.mxu3 %vm332_vm1, %v3555_v46 }
 0x166   : > { %v695_v13 = vmul.f32 %v3460_v29, %v667_v44  ;;  %v654_v43 = vmul.f32 %v3812_v8, %v3812_v8  ;;  %2740 = vmatmul.msk.bf16.gmra.mxu1 %vm332_vm1, %v3550_v45 }
 0x167   : > { %v580_v42 = vpop.xlane.xlu2 %579 }
 0x168   : > { %v612_v52 = vmul.f32 0.03125, %v580_v42  ;;  %745 = vadd.xlane.f32.xlu2 %v695_v13  ;;  %v682_v41 = vmul.f32 %v3460_v29, %v654_v43 }
 0x169   : > { %v554_v5 = vpop.xlane.xlu1 %553 }
 0x16a   : > { %v3821_v51 = vsub.f32 %v3641_v48, %v612_v52  ;;  %v599_v10 = vmul.f32 0.03125, %v554_v5  ;;  %719 = vadd.xlane.f32.xlu1 %v682_v41 }
 0x16c   : > { %v3824_v23 = vsub.f32 %v3644_v55, %v599_v10  ;;  %v668_v59 = vmul.f32 %v3821_v51, %v3821_v51 }
 0x16e   : > { %v696_v50 = vmul.f32 %v3460_v29, %v668_v59  ;;  %v655_v57 = vmul.f32 %v3824_v23, %v3824_v23 }
 0x16f   : > { %v582_v62 = vpop.xlane.xlu0 %581 }
 0x170   : > { %v613_v48 = vmul.f32 0.03125, %v582_v62  ;;  %747 = vadd.xlane.f32.xlu0 %v696_v50  ;;  %v683_v55 = vmul.f32 %v3460_v29, %v655_v57 }
 0x171   : > { %v556_v4 = vpop.xlane.xlu2 %555 }
 0x172   : > { %v3837_v3 = vsub.f32 %v3649_v63, %v613_v48  ;;  %v600_v27 = vmul.f32 0.03125, %v556_v4  ;;  %721 = vadd.xlane.f32.xlu2 %v683_v55 }
 0x174   : > { %v3840_v58 = vsub.f32 %v3652_v28, %v600_v27  ;;  %v669_v46 = vmul.f32 %v3837_v3, %v3837_v3 }
 0x176   : > { %v697_v61 = vmul.f32 %v3460_v29, %v669_v46  ;;  %v656_v45 = vmul.f32 %v3840_v58, %v3840_v58 }
 0x177   : > { %v584_v40 = vpop.xlane.xlu1 %583 }
 0x178   : > { %749 = vadd.xlane.f32.xlu1 %v697_v61  ;;  %v684_v30 = vmul.f32 %v3460_v29, %v656_v45  ;;  %v614_v59 = vmul.f32 0.03125, %v584_v40 }
 0x179   : > { %v558_v44 = vpop.xlane.xlu0 %557 }
 0x17a   : > { %v601_v63 = vmul.f32 0.03125, %v558_v44  ;;  %723 = vadd.xlane.f32.xlu0 %v684_v30  ;;  %v3866_v55 = vsub.f32 %v3659_v15, %v614_v59 }
 0x17c   : > { %v3849_v13 = vsub.f32 %v3662_v60, %v601_v63  ;;  %v670_v46 = vmul.f32 %v3866_v55, %v3866_v55 }
 0x17e   : > { %v657_v28 = vmul.f32 %v3849_v13, %v3849_v13  ;;  %v698_v15 = vmul.f32 %v3460_v29, %v670_v46 }
 0x17f   : > { %v586_v43 = vpop.xlane.xlu2 %585 }
 0x180   : > { %v615_v42 = vmul.f32 0.03125, %v586_v43  ;;  %v685_v52 = vmul.f32 %v3460_v29, %v657_v28 }
 0x181   : > { %v560_v41 = vpop.xlane.xlu1 %559 }
 0x182   : > { %v3855_v5 = vsub.f32 %v3671_v26, %v615_v42  ;;  %v602_v10 = vmul.f32 0.03125, %v560_v41  ;;  %725 = vadd.xlane.f32.xlu1 %v685_v52 }
 0x183   : > { %v463_v45 = vpop.f32.mrf.mxu1 }
 0x184   : > { %v3858_v50 = vsub.f32 %v3674_v0, %v602_v10  ;;  %v671_v60 = vmul.f32 %v3855_v5, %v3855_v5 }
 0x186   : > { %v699_v57 = vmul.f32 %v3460_v29, %v671_v60  ;;  %v658_v62 = vmul.f32 %v3858_v50, %v3858_v50 }
 0x187   : > { %v588_v48 = vpop.xlane.xlu0 %587 }
 0x188   : > { %v616_v26 = vmul.f32 0.03125, %v588_v48  ;;  %753 = vadd.xlane.f32.xlu0 %v699_v57  ;;  %v686_v4 = vmul.f32 %v3460_v29, %v658_v62  ;;  %v498_v30 = vpop.f32.mrf.mxu3 }
 0x18a   : > { %v3870_v27 = vsub.f32 %v3683_v6, %v616_v26  ;;  %727 = vadd.xlane.f32.xlu2 %v686_v4  ;;  %v3879_v6 = vperm.slane %v3374_v9, 0 }
 0x18b   : > { %v465_v28 = vpop.f32.mrf.mxu1 }
 0x18c   : > { %v672_v0 = vmul.f32 %v3870_v27, %v3870_v27  ;;  %v464_v52 = vadd.f32 %v463_v45, %v3879_v6  ;;  %v499_v41 = vadd.f32 %v498_v30, %v3879_v6  ;;  %v466_v10 = vadd.f32 %v465_v28, %v3879_v6 }
 0x18e   : > { %v700_v61 = vmul.f32 %v3460_v29, %v672_v0  ;;  %1235 = vst [vmem:[#allocation3 + $0x98] sm:$0xff] %v464_v52 }
 0x18f   : > { %1249 = vst [vmem:[#allocation3 + $0x20] sm:$0xff] %v499_v41 }
 0x190   : > { %755 = vadd.xlane.f32.xlu1 %v700_v61  ;;  %v500_v43 = vpop.f32.mrf.mxu3  ;;  %1236 = vst [vmem:[#allocation3 + $0xb0] sm:$0xff] %v466_v10 }
 0x191   : > { %v501_v60 = vadd.f32 %v500_v43, %v3879_v6 }
 0x192   : > { %751 = vadd.xlane.f32.xlu2 %v698_v15 }
 0x193   : > { %1250 = vst [vmem:[#allocation3 + $0x68] sm:$0xff] %v501_v60  ;;  %v468_v61 = vpop.f32.mrf.mxu1 }
 0x195   : > { %v702_v40 = vpop.xlane.xlu1 %701 }
 0x196   : > { %v757_v44 = vmul.f32 0.03125, %v702_v40 }
 0x198   : > { %v785_v63 = vadd.f32 1e-05, %v757_v44  ;;  %v503_v15 = vpop.f32.mrf.mxu3 }
 0x19a   : > { %3057 = vrsqrt.f32 %v785_v63  ;;  %vm819_vm3 = vweird.f32 %v785_v63 }
 0x19b   : > { %v730_v42 = vpop.xlane.xlu0 %729  ;;  %v470_v11 = vpop.f32.mrf.mxu1 }
 0x19c   : > { %v771_v59 = vmul.f32 0.03125, %v730_v42 }
 0x19d   : > { %v704_v57 = vpop.xlane.xlu2 %703 }
 0x19e   : > { %v3885_v62 = vadd.f32 1e-05, %v771_v59  ;;  %v758_v48 = vmul.f32 0.03125, %v704_v57 }
 0x1a0   : > { %v3058_v26 = vpop.eup %3057  ;;  %3059 = vrsqrt.f32 %v3885_v62  ;;  %v786_v4 = vadd.f32 1e-05, %v758_v48  ;;  %vm959_vm9 = vweird.f32 %v3885_v62 }
 0x1a1   : > { %v814_v0 = vmul.f32 %v3058_v26, %v785_v63  ;;  %vm820_vm2 = vweird.f32 %v3058_v26 }
 0x1a2   : > { %3061 = vrsqrt.f32 %v786_v4  ;;  %vm3899_vm4 = vmor %vm819_vm3, %vm820_vm2  ;;  %vm829_vm6 = vweird.f32 %v786_v4 }
 0x1a3   : > { %v815_v46 = vmul.f32 %v3058_v26, %v814_v0 }
 0x1a5   : > { %v816_v45 = vmul.f32 0.5, %v815_v46  ;;  %v732_v30 = vpop.xlane.xlu1 %731  ;;  %v706_v40 = vpop.xlane.xlu0 %705 }
 0x1a6   : > { %v3888_v44 = vpop.eup %3059  ;;  %v772_v28 = vmul.f32 0.03125, %v732_v30  ;;  %v759_v43 = vmul.f32 0.03125, %v706_v40  ;;  %v469_v30 = vadd.f32 %v468_v61, %v3879_v6  ;;  %v504_v40 = vadd.f32 %v503_v15, %v3879_v6 }
 0x1a7   : > { %v817_v42 = vsub.f32 1.5, %v816_v45  ;;  %v954_v52 = vmul.f32 %v3888_v44, %v3885_v62  ;;  %v3910_v15 = vperm.slane %v3345_v2, 2  ;;  %vm960_vm7 = vweird.f32 %v3888_v44 }
 0x1a8   : > { %v3062_v41 = vpop.eup %3061  ;;  %v3892_v10 = vadd.f32 1e-05, %v772_v28  ;;  %v3894_v59 = vadd.f32 1e-05, %v759_v43  ;;  %1237 = vst [vmem:[#allocation3 + $0x70] sm:$0xff] %v469_v30  ;;  %vm3929_vm10 = vmor %vm959_vm9, %vm960_vm7 }
 0x1a9   : > { %v818_v60 = vmul.f32 %v3058_v26, %v817_v42  ;;  %v955_v57 = vmul.f32 %v3888_v44, %v954_v52  ;;  %v824_v48 = vmul.f32 %v3062_v41, %v786_v4  ;;  %vm830_vm5 = vweird.f32 %v3062_v41  ;;  %1251 = vst [vmem:[#allocation3 + $0x28] sm:$0xff] %v504_v40 }
 0x1aa   : > { %3063 = vrsqrt.f32 %v3892_v10  ;;  %vm831_vm8 = vmor %vm829_vm6, %vm830_vm5  ;;  %vm969_vm12 = vweird.f32 %v3892_v10  ;;  %vm839_vm14 = vweird.f32 %v3894_v59 }
 0x1ab   : > { %v956_v0 = vmul.f32 0.5, %v955_v57  ;;  %v825_v46 = vmul.f32 %v3062_v41, %v824_v48  ;;  %3065 = vrsqrt.f32 %v3894_v59  ;;  %v822_v28 = vsel %vm3899_vm4, %v3058_v26, %v818_v60  ;;  %v505_v48 = vpop.f32.mrf.mxu3 }
 0x1ac   : > { %v471_v57 = vadd.f32 %v470_v11, %v3879_v6  ;;  %v506_v20 = vadd.f32 %v505_v48, %v3879_v6  ;;  %v1093_v26 = vmul.f32 %v822_v28, %v3687_v18  ;;  %v3925_v18 = vperm.slane %v3374_v9, 2 }
 0x1ad   : > { %v957_v43 = vsub.f32 1.5, %v956_v0  ;;  %v826_v42 = vmul.f32 0.5, %v825_v46  ;;  %v734_v52 = vpop.xlane.xlu2 %733 }
 0x1ae   : > { %v773_v63 = vmul.f32 0.03125, %v734_v52  ;;  %1238 = vst [vmem:[#allocation3 + $0x18] sm:$0xff] %v471_v57 }
 0x1af   : > { %v827_v16 = vsub.f32 1.5, %v826_v42  ;;  %v958_v11 = vmul.f32 %v3888_v44, %v957_v43  ;;  %1252 = vst [vmem:[#allocation3 + $0x90] sm:$0xff] %v506_v20 }
 0x1b0   : > { %v3064_v61 = vpop.eup %3063  ;;  %v3913_v60 = vadd.f32 1e-05, %v773_v63 }
 0x1b1   : > { %v3915_v0 = vpop.eup %3065  ;;  %v828_v46 = vmul.f32 %v3062_v41, %v827_v16  ;;  %v964_v45 = vmul.f32 %v3064_v61, %v3892_v10  ;;  %v1122_v16 = vmul.f32 %v3910_v15, %v1093_v26  ;;  %v962_v63 = vsel %vm3929_vm10, %v3888_v44, %v958_v11 }
 0x1b2   : > { %v834_v30 = vmul.f32 %v3915_v0, %v3894_v59  ;;  %3067 = vrsqrt.f32 %v3913_v60  ;;  %vm970_vm11 = vweird.f32 %v3064_v61  ;;  %vm840_vm15 = vweird.f32 %v3915_v0 }
 0x1b3   : > { %v832_v4 = vsel %vm831_vm8, %v3062_v41, %v828_v46  ;;  %v965_v40 = vmul.f32 %v3064_v61, %v964_v45  ;;  %v736_v28 = vpop.xlane.xlu0 %735  ;;  %v473_v41 = vpop.f32.mrf.mxu1  ;;  %vm971_vm13 = vmor %vm969_vm12, %vm970_vm11  ;;  %vm979_vm2 = vweird.f32 %v3913_v60 }
 0x1b4   : > { %v1094_v20 = vmul.f32 %v832_v4, %v3700_v49  ;;  %v835_v42 = vmul.f32 %v3915_v0, %v834_v30  ;;  %v774_v52 = vmul.f32 0.03125, %v736_v28  ;;  %v508_v26 = vpop.f32.mrf.mxu3  ;;  %v1151_v30 = vadd.f32 %v3925_v18, %v1122_v16  ;;  %vm3974_vm1 = vmor %vm839_vm14, %vm840_vm15 }
 0x1b5   : > { %v966_v57 = vmul.f32 0.5, %v965_v40  ;;  %v708_v62 = vpop.xlane.xlu1 %707  ;;  %v1107_v4 = vmul.f32 %v962_v63, %v3697_v22 }
 0x1b6   : > { %v1123_v48 = vmul.f32 %v3910_v15, %v1094_v20  ;;  %v3939_v46 = vadd.f32 1e-05, %v774_v52  ;;  %v836_v24 = vmul.f32 0.5, %v835_v42  ;;  %v760_v9 = vmul.f32 0.03125, %v708_v62 }
 0x1b7   : > { %v967_v45 = vsub.f32 1.5, %v966_v57  ;;  %v1136_v22 = vmul.f32 %v3910_v15, %v1107_v4 }
 0x1b8   : > { %v3068_v49 = vpop.eup %3067  ;;  %v1152_v28 = vadd.f32 %v3925_v18, %v1123_v48  ;;  %3069 = vrsqrt.f32 %v3939_v46  ;;  %v3947_v40 = vadd.f32 1e-05, %v760_v9  ;;  %v837_v42 = vsub.f32 1.5, %v836_v24 }
 0x1b9   : > { %v968_v44 = vmul.f32 %v3064_v61, %v967_v45  ;;  %v974_v11 = vmul.f32 %v3068_v49, %v3913_v60  ;;  %vm980_vm0 = vweird.f32 %v3068_v49  ;;  %vm989_vm5 = vweird.f32 %v3939_v46 }
 0x1ba   : > { %v2939_v43 = vpack.c.bf16 %v1152_v28, %v1151_v30  ;;  %3071 = vrsqrt.f32 %v3947_v40  ;;  %v474_v30 = vadd.f32 %v473_v41, %v3879_v6  ;;  %vm981_vm3 = vmor %vm979_vm2, %vm980_vm0  ;;  %vm849_vm8 = vweird.f32 %v3947_v40 }
 0x1bb   : > { %v972_v20 = vsel %vm971_vm13, %v3064_v61, %v968_v44  ;;  %v975_v52 = vmul.f32 %v3068_v49, %v974_v11  ;;  %v710_v16 = vpop.xlane.xlu2 %709  ;;  %v475_v62 = vpop.f32.mrf.mxu1  ;;  %v1165_v11 = vadd.f32 %v3925_v18, %v1136_v22  ;;  %v509_v22 = vadd.f32 %v508_v26, %v3879_v6 }
 0x1bc   : > { %2940 = vst [vmem:[#allocation2 + $0x30] sm:$0xff] %v2939_v43   ;;  %v1108_v63 = vmul.f32 %v972_v20, %v3712_v53  ;;  %v761_v57 = vmul.f32 0.03125, %v710_v16  ;;  %v510_v4 = vpop.f32.mrf.mxu3  ;;  %v838_v53 = vmul.f32 %v3915_v0, %v837_v42  ;;  %v476_v60 = vadd.f32 %v475_v62, %v3879_v6 }
 0x1bd   : > { %v976_v9 = vmul.f32 0.5, %v975_v52  ;;  %v738_v10 = vpop.xlane.xlu1 %737  ;;  %1239 = vst [vmem:[#allocation3 + $0xc8] sm:$0xff] %v474_v30 }
 0x1be   : > { %v3954_v48 = vpop.eup %3069  ;;  %v1137_v24 = vmul.f32 %v3910_v15, %v1108_v63  ;;  %v3957_v61 = vadd.f32 1e-05, %v761_v57  ;;  %v775_v45 = vmul.f32 0.03125, %v738_v10  ;;  %v842_v59 = vsel %vm3974_vm1, %v3915_v0, %v838_v53  ;;  %1253 = vst [vmem:[#allocation3 + $0x58] sm:$0xff] %v509_v22 }
 0x1bf   : > { %v977_v28 = vsub.f32 1.5, %v976_v9  ;;  %v984_v44 = vmul.f32 %v3954_v48, %v3939_v46  ;;  %vm990_vm4 = vweird.f32 %v3954_v48  ;;  %1240 = vst [vmem:[#allocation3 + $0xd0] sm:$0xff] %v476_v60  ;;  %v511_v0 = vadd.f32 %v510_v4, %v3879_v6 }
 0x1c0   : > { %v1166_v43 = vadd.f32 %v3925_v18, %v1137_v24  ;;  %3073 = vrsqrt.f32 %v3957_v61  ;;  %v3966_v20 = vadd.f32 1e-05, %v775_v45  ;;  %v3968_v52 = vpop.eup %3071  ;;  %v1095_v53 = vmul.f32 %v842_v59, %v3709_v33  ;;  %vm991_vm6 = vmor %vm989_vm5, %vm990_vm4 }
 0x1c1   : > { %v978_v42 = vmul.f32 %v3068_v49, %v977_v28  ;;  %v985_v16 = vmul.f32 %v3954_v48, %v984_v44  ;;  %v844_v57 = vmul.f32 %v3968_v52, %v3947_v40  ;;  %1254 = vst [vmem:[#allocation3 + $0x80] sm:$0xff] %v511_v0  ;;  %vm850_vm7 = vweird.f32 %v3968_v52 }
 0x1c2   : > { %v2974_v63 = vpack.c.bf16 %v1166_v43, %v1165_v11  ;;  %3075 = vrsqrt.f32 %v3966_v20  ;;  %vm851_vm9 = vmor %vm849_vm8, %vm850_vm7  ;;  %vm859_vm12 = vweird.f32 %v3957_v61  ;;  %vm999_vm14 = vweird.f32 %v3966_v20 }
 0x1c3   : > { %v982_v9 = vsel %vm981_vm3, %v3068_v49, %v978_v42  ;;  %v986_v10 = vmul.f32 0.5, %v985_v16  ;;  %v740_v24 = vpop.xlane.xlu2 %739  ;;  %v712_v45 = vpop.xlane.xlu0 %711  ;;  %v845_v30 = vmul.f32 %v3968_v52, %v844_v57 }
 0x1c4   : > { %3012 = vst [vmem:[#allocation2 + $0x48] sm:$0xff] %v2974_v63   ;;  %v1109_v26 = vmul.f32 %v982_v9, %v3725_v56  ;;  %v776_v28 = vmul.f32 0.03125, %v740_v24  ;;  %v762_v44 = vmul.f32 0.03125, %v712_v45  ;;  %v3999_v56 = vpop.f32.mrf.mxu1  ;;  %v4001_v16 = vpop.f32.mrf.mxu3  ;;  %v1124_v24 = vmul.f32 %v3910_v15, %v1095_v53 }
 0x1c5   : > { %v987_v11 = vsub.f32 1.5, %v986_v10  ;;  %v714_v43 = vpop.xlane.xlu1 %713  ;;  %v846_v41 = vmul.f32 0.5, %v845_v30 }
 0x1c6   : > { %v3992_v49 = vpop.eup %3073  ;;  %v3995_v62 = vadd.f32 1e-05, %v776_v28  ;;  %v3997_v42 = vadd.f32 1e-05, %v762_v44  ;;  %v763_v63 = vmul.f32 0.03125, %v714_v43  ;;  %v1138_v33 = vmul.f32 %v3910_v15, %v1109_v26 }
 0x1c7   : > { %v988_v22 = vmul.f32 %v3954_v48, %v987_v11  ;;  %v854_v4 = vmul.f32 %v3992_v49, %v3957_v61  ;;  %v847_v59 = vsub.f32 1.5, %v846_v41  ;;  %vm860_vm10 = vweird.f32 %v3992_v49 }
 0x1c8   : > { %v3076_v57 = vpop.eup %3075  ;;  %3077 = vrsqrt.f32 %v3995_v62  ;;  %v1167_v28 = vadd.f32 %v3925_v18, %v1138_v33  ;;  %vm4049_vm13 = vmor %vm859_vm12, %vm860_vm10  ;;  %vm1009_vm0 = vweird.f32 %v3995_v62  ;;  %vm869_vm1 = vweird.f32 %v3997_v42 }
 0x1c9   : > { %v992_v9 = vsel %vm991_vm6, %v3954_v48, %v988_v22  ;;  %v855_v46 = vmul.f32 %v3992_v49, %v854_v4  ;;  %v994_v10 = vmul.f32 %v3076_v57, %v3966_v20  ;;  %v848_v60 = vmul.f32 %v3968_v52, %v847_v59 }
 0x1ca   : > { %v1110_v45 = vmul.f32 %v992_v9, %v3731_v37  ;;  %3079 = vrsqrt.f32 %v3997_v42  ;;  %v4021_v48 = vadd.f32 1e-05, %v763_v63  ;;  %vm1000_vm11 = vweird.f32 %v3076_v57 }
 0x1cb   : > { %v856_v26 = vmul.f32 0.5, %v855_v46  ;;  %v995_v30 = vmul.f32 %v3076_v57, %v994_v10  ;;  %v742_v40 = vpop.xlane.xlu0 %741  ;;  %v852_v11 = vsel %vm851_vm9, %v3968_v52, %v848_v60  ;;  %v1153_v60 = vadd.f32 %v3925_v18, %v1124_v24  ;;  %vm1001_vm15 = vmor %vm999_vm14, %vm1000_vm11 }
 0x1cc   : > { %v1139_v44 = vmul.f32 %v3910_v15, %v1110_v45  ;;  %v777_v43 = vmul.f32 0.03125, %v742_v40  ;;  %v1096_v37 = vmul.f32 %v852_v11, %v3734_v34  ;;  %3081 = vrsqrt.f32 %v4021_v48  ;;  %v4033_v59 = vpop.f32.mrf.mxu1  ;;  %v4035_v9 = vpop.f32.mrf.mxu3 }
 0x1cd   : > { %v857_v0 = vsub.f32 1.5, %v856_v26  ;;  %v996_v53 = vmul.f32 0.5, %v995_v30  ;;  %v716_v41 = vpop.xlane.xlu2 %715  ;;  %vm879_vm3 = vweird.f32 %v4021_v48 }
 0x1ce   : > { %v4028_v22 = vpop.eup %3077  ;;  %v1168_v4 = vadd.f32 %v3925_v18, %v1139_v44  ;;  %v4031_v63 = vadd.f32 1e-05, %v777_v43  ;;  %v764_v33 = vmul.f32 0.03125, %v716_v41  ;;  %v1125_v52 = vmul.f32 %v3910_v15, %v1096_v37 }
 0x1cf   : > { %v858_v34 = vmul.f32 %v3992_v49, %v857_v0  ;;  %v997_v46 = vsub.f32 1.5, %v996_v53  ;;  %v1004_v10 = vmul.f32 %v4028_v22, %v3995_v62  ;;  %v479_v53 = vadd.f32 %v3999_v56, %v3879_v6 }
 0x1d0   : > { %v4041_v45 = vpop.eup %3079  ;;  %v2979_v26 = vpack.c.bf16 %v1168_v4, %v1167_v28  ;;  %3083 = vrsqrt.f32 %v4031_v63  ;;  %v1154_v30 = vadd.f32 %v3925_v18, %v1125_v52  ;;  %v4062_v28 = vadd.f32 1e-05, %v764_v33 }
 0x1d1   : > { %v998_v44 = vmul.f32 %v3076_v57, %v997_v46  ;;  %v1005_v11 = vmul.f32 %v4028_v22, %v1004_v10  ;;  %v862_v61 = vsel %vm4049_vm13, %v3992_v49, %v858_v34  ;;  %v864_v24 = vmul.f32 %v4041_v45, %v3997_v42  ;;  %1241 = vst [vmem:[#allocation3 + $0xb8] sm:$0xff] %v479_v53 }
 0x1d2   : > { %3013 = vst [vmem:[#allocation2 + $0x40] sm:$0xff] %v2979_v26   ;;  %v4064_v43 = vpop.eup %3081  ;;  %v2944_v37 = vpack.c.bf16 %v1154_v30, %v1153_v60  ;;  %vm1010_vm2 = vweird.f32 %v4028_v22  ;;  %3085 = vrsqrt.f32 %v4062_v28  ;;  %vm870_vm4 = vweird.f32 %v4041_v45 }
 0x1d3   : > { %v1002_v20 = vsel %vm1001_vm15, %v3076_v57, %v998_v44  ;;  %v1006_v0 = vmul.f32 0.5, %v1005_v11  ;;  %v865_v49 = vmul.f32 %v4041_v45, %v864_v24  ;;  %v874_v4 = vmul.f32 %v4064_v43, %v4021_v48  ;;  %v744_v52 = vpop.xlane.xlu1 %743  ;;  %vm1011_vm6 = vmor %vm1009_vm0, %vm1010_vm2 }
 0x1d4   : > { %v1111_v41 = vmul.f32 %v1002_v20, %v3750_v35  ;;  %3006 = vst [vmem:[#allocation2] sm:$0xff] %v2944_v37   ;;  %v1097_v35 = vmul.f32 %v862_v61, %v3747_v36  ;;  %v4081_v10 = vpop.f32.mrf.mxu1  ;;  %v4083_v60 = vpop.f32.mrf.mxu3  ;;  %vm880_vm5 = vweird.f32 %v4064_v43  ;;  %v778_v40 = vmul.f32 0.03125, %v744_v52  ;;  %vm871_vm7 = vmor %vm869_vm1, %vm870_vm4 }
 0x1d5   : > { %v1007_v33 = vsub.f32 1.5, %v1006_v0  ;;  %v718_v57 = vpop.xlane.xlu0 %717  ;;  %v866_v34 = vmul.f32 0.5, %v865_v49  ;;  %v875_v46 = vmul.f32 %v4064_v43, %v874_v4  ;;  %v514_v0 = vadd.f32 %v4001_v16, %v3879_v6  ;;  %vm4124_vm8 = vmor %vm879_vm3, %vm880_vm5 }
 0x1d6   : > { %v4076_v56 = vpop.eup %3083  ;;  %v1140_v36 = vmul.f32 %v3910_v15, %v1111_v41  ;;  %v765_v61 = vmul.f32 0.03125, %v718_v57  ;;  %v4096_v20 = vadd.f32 1e-05, %v778_v40  ;;  %v1126_v52 = vmul.f32 %v3910_v15, %v1097_v35 }
 0x1d7   : > { %v1008_v26 = vmul.f32 %v4028_v22, %v1007_v33  ;;  %v1014_v30 = vmul.f32 %v4076_v56, %v4031_v63  ;;  %v867_v44 = vsub.f32 1.5, %v866_v34  ;;  %v876_v11 = vmul.f32 0.5, %v875_v46  ;;  %1255 = vst [vmem:[#allocation3 + $0xa8] sm:$0xff] %v514_v0 }
 0x1d8   : > { %v4102_v4 = vadd.f32 1e-05, %v765_v61  ;;  %v4104_v62 = vpop.eup %3085  ;;  %3087 = vrsqrt.f32 %v4096_v20  ;;  %vm1019_vm9 = vweird.f32 %v4031_v63  ;;  %vm1020_vm10 = vweird.f32 %v4076_v56 }
 0x1d9   : > { %v1012_v24 = vsel %vm1011_vm6, %v4028_v22, %v1008_v26  ;;  %v1015_v37 = vmul.f32 %v4076_v56, %v1014_v30  ;;  %v868_v41 = vmul.f32 %v4041_v45, %v867_v44  ;;  %v877_v49 = vsub.f32 1.5, %v876_v11  ;;  %vm4152_vm11 = vmor %vm1019_vm9, %vm1020_vm10 }
 0x1da   : > { %v1112_v53 = vmul.f32 %v1012_v24, %v3762_v47  ;;  %v481_v47 = vadd.f32 %v4033_v59, %v3879_v6  ;;  %v884_v35 = vmul.f32 %v4104_v62, %v4062_v28  ;;  %3089 = vrsqrt.f32 %v4102_v4 }
 0x1db   : > { %v1016_v22 = vmul.f32 0.5, %v1015_v37  ;;  %v872_v33 = vsel %vm871_vm7, %v4041_v45, %v868_v41  ;;  %v878_v57 = vmul.f32 %v4064_v43, %v877_v49  ;;  %v746_v34 = vpop.xlane.xlu2 %745  ;;  %v1169_v26 = vadd.f32 %v3925_v18, %v1140_v36 }
 0x1dc   : > { %v1141_v16 = vmul.f32 %v3910_v15, %v1112_v53  ;;  %v1098_v42 = vmul.f32 %v872_v33, %v3759_v14  ;;  %1242 = vst [vmem:[#allocation3 + $0x78] sm:$0xff] %v481_v47  ;;  %v885_v48 = vmul.f32 %v4104_v62, %v884_v35  ;;  %v485_v40 = vpop.f32.mrf.mxu1  ;;  %v4136_v44 = vpop.f32.mrf.mxu3  ;;  %v779_v24 = vmul.f32 0.03125, %v746_v34 }
 0x1dd   : > { %v1017_v59 = vsub.f32 1.5, %v1016_v22  ;;  %v720_v45 = vpop.xlane.xlu1 %719  ;;  %v882_v14 = vsel %vm4124_vm8, %v4064_v43, %v878_v57  ;;  %v1155_v36 = vadd.f32 %v3925_v18, %v1126_v52  ;;  %v516_v53 = vadd.f32 %v4035_v9, %v3879_v6 }
 0x1de   : > { %v1170_v30 = vadd.f32 %v3925_v18, %v1141_v16  ;;  %v1127_v11 = vmul.f32 %v3910_v15, %v1098_v42  ;;  %v886_v0 = vmul.f32 0.5, %v885_v48  ;;  %v4144_v43 = vpop.eup %3087  ;;  %v1099_v49 = vmul.f32 %v882_v14, %v3765_v31 }
 0x1df   : > { %v1018_v61 = vmul.f32 %v4076_v56, %v1017_v59  ;;  %v4148_v22 = vadd.f32 1e-05, %v779_v24  ;;  %v766_v47 = vmul.f32 0.03125, %v720_v45  ;;  %vm890_vm12 = vweird.f32 %v4104_v62  ;;  %1256 = vst [vmem:[#allocation3 + $0x8] sm:$0xff] %v516_v53 }
 0x1e0   : > { %v2984_v37 = vpack.c.bf16 %v1170_v30, %v1169_v26  ;;  %v1156_v41 = vadd.f32 %v3925_v18, %v1127_v11  ;;  %v887_v52 = vsub.f32 1.5, %v886_v0  ;;  %v1024_v9 = vmul.f32 %v4144_v43, %v4096_v20  ;;  %v4159_v33 = vpop.eup %3089 }
 0x1e1   : > { %v1022_v31 = vsel %vm4152_vm11, %v4076_v56, %v1018_v61  ;;  %3091 = vrsqrt.f32 %v4148_v22  ;;  %vm889_vm13 = vweird.f32 %v4062_v28  ;;  %v894_v42 = vmul.f32 %v4159_v33, %v4102_v4 }
 0x1e2   : > { %3014 = vst [vmem:[#allocation2 + $0x20] sm:$0xff] %v2984_v37   ;;  %v2949_v57 = vpack.c.bf16 %v1156_v41, %v1155_v36  ;;  %v888_v35 = vmul.f32 %v4104_v62, %v887_v52  ;;  %v1025_v34 = vmul.f32 %v4144_v43, %v1024_v9  ;;  %v1128_v46 = vmul.f32 %v3910_v15, %v1099_v49  ;;  %vm891_vm14 = vmor %vm889_vm13, %vm890_vm12 }
 0x1e3   : > { %v748_v63 = vpop.xlane.xlu0 %747  ;;  %v4171_v59 = vadd.f32 1e-05, %v766_v47  ;;  %v484_v26 = vadd.f32 %v4081_v10, %v3879_v6  ;;  %v1113_v30 = vmul.f32 %v1022_v31, %v3781_v39  ;;  %v895_v48 = vmul.f32 %v4159_v33, %v894_v42 }
 0x1e4   : > { %3007 = vst [vmem:[#allocation2 + $0x58] sm:$0xff] %v2949_v57   ;;  %v780_v56 = vmul.f32 0.03125, %v748_v63  ;;  %v892_v28 = vsel %vm891_vm14, %v4104_v62, %v888_v35  ;;  %v1026_v14 = vmul.f32 0.5, %v1025_v34  ;;  %v4178_v11 = vpop.f32.mrf.mxu1  ;;  %v4180_v61 = vpop.f32.mrf.mxu3  ;;  %vm1030_vm15 = vweird.f32 %v4144_v43 }
 0x1e5   : > { %v722_v45 = vpop.xlane.xlu2 %721  ;;  %v1100_v24 = vmul.f32 %v892_v28, %v3784_v38  ;;  %3093 = vrsqrt.f32 %v4171_v59  ;;  %1243 = vst [vmem:[#allocation3 + $0x40] sm:$0xff] %v484_v26  ;;  %v896_v39 = vmul.f32 0.5, %v895_v48  ;;  %v519_v62 = vadd.f32 %v4083_v60, %v3879_v6 }
 0x1e6   : > { %v4185_v36 = vadd.f32 1e-05, %v780_v56  ;;  %v1027_v10 = vsub.f32 1.5, %v1026_v14  ;;  %v767_v37 = vmul.f32 0.03125, %v722_v45  ;;  %v486_v38 = vadd.f32 %v485_v40, %v3879_v6 }
 0x1e7   : > { %v4189_v0 = vpop.eup %3091  ;;  %v1129_v53 = vmul.f32 %v3910_v15, %v1100_v24  ;;  %vm1029_vm0 = vweird.f32 %v4096_v20  ;;  %v897_v49 = vsub.f32 1.5, %v896_v39  ;;  %1257 = vst [vmem:[#allocation3 + $0x10] sm:$0xff] %v519_v62  ;;  %v1157_v16 = vadd.f32 %v3925_v18, %v1128_v46 }
 0x1e8   : > { %3095 = vrsqrt.f32 %v4185_v36  ;;  %v1028_v41 = vmul.f32 %v4144_v43, %v1027_v10  ;;  %v1034_v47 = vmul.f32 %v4189_v0, %v4148_v22  ;;  %vm1031_vm1 = vmor %vm1029_vm0, %vm1030_vm15  ;;  %v4202_v52 = vadd.f32 1e-05, %v767_v37  ;;  %1244 = vst [vmem:[#allocation3 + $0x50] sm:$0xff] %v486_v38 }
 0x1e9   : > { %v1158_v60 = vadd.f32 %v3925_v18, %v1129_v53  ;;  %v521_v40 = vadd.f32 %v4136_v44, %v3879_v6  ;;  %v1142_v20 = vmul.f32 %v3910_v15, %v1113_v30  ;;  %vm900_vm2 = vweird.f32 %v4159_v33 }
 0x1ea   : > { %v1032_v9 = vsel %vm1031_vm1, %v4144_v43, %v1028_v41  ;;  %v1035_v57 = vmul.f32 %v4189_v0, %v1034_v47  ;;  %v898_v42 = vmul.f32 %v4159_v33, %v897_v49  ;;  %3097 = vrsqrt.f32 %v4202_v52 }
 0x1eb   : > { %v750_v31 = vpop.xlane.xlu1 %749  ;;  %v4210_v63 = vpop.eup %3093  ;;  %v2954_v35 = vpack.c.bf16 %v1158_v60, %v1157_v16  ;;  %v1114_v34 = vmul.f32 %v1032_v9, %v3793_v19  ;;  %1258 = vst [vmem:[#allocation3 + $0xd8] sm:$0xff] %v521_v40  ;;  %vm899_vm3 = vweird.f32 %v4102_v4  ;;  %vm1039_vm4 = vweird.f32 %v4148_v22 }
 0x1ec   : > { %v1036_v44 = vmul.f32 0.5, %v1035_v57  ;;  %v904_v43 = vmul.f32 %v4210_v63, %v4171_v59  ;;  %v490_v56 = vpop.f32.mrf.mxu1  ;;  %v525_v45 = vpop.f32.mrf.mxu3  ;;  %v781_v19 = vmul.f32 0.03125, %v750_v31  ;;  %vm4224_vm5 = vmor %vm899_vm3, %vm900_vm2  ;;  %vm1040_vm6 = vweird.f32 %v4189_v0 }
 0x1ed   : > { %v724_v46 = vpop.xlane.xlu0 %723  ;;  %3008 = vst [vmem:[#allocation2 + $0x18] sm:$0xff] %v2954_v35   ;;  %v1143_v30 = vmul.f32 %v3910_v15, %v1114_v34  ;;  %v1171_v10 = vadd.f32 %v3925_v18, %v1142_v20  ;;  %v902_v37 = vsel %vm4224_vm5, %v4159_v33, %v898_v42  ;;  %vm910_vm7 = vweird.f32 %v4210_v63  ;;  %vm4246_vm8 = vmor %vm1039_vm4, %vm1040_vm6 }
 0x1ee   : > { %v4218_v26 = vpop.eup %3095  ;;  %v768_v28 = vmul.f32 0.03125, %v724_v46  ;;  %v1037_v4 = vsub.f32 1.5, %v1036_v44  ;;  %v905_v48 = vmul.f32 %v4210_v63, %v904_v43  ;;  %v4250_v60 = vadd.f32 1e-05, %v781_v19 }
 0x1ef   : > { %v1044_v24 = vmul.f32 %v4218_v26, %v4185_v36  ;;  %v1172_v39 = vadd.f32 %v3925_v18, %v1143_v30  ;;  %v489_v33 = vadd.f32 %v4178_v11, %v3879_v6  ;;  %v524_v40 = vadd.f32 %v4180_v61, %v3879_v6 }
 0x1f0   : > { %v1038_v62 = vmul.f32 %v4189_v0, %v1037_v4  ;;  %v906_v53 = vmul.f32 0.5, %v905_v48  ;;  %v4240_v41 = vadd.f32 1e-05, %v768_v28  ;;  %v4242_v49 = vpop.eup %3097  ;;  %v1101_v31 = vmul.f32 %v902_v37, %v3796_v54 }
 0x1f1   : > { %v1045_v38 = vmul.f32 %v4218_v26, %v1044_v24  ;;  %v2989_v47 = vpack.c.bf16 %v1172_v39, %v1171_v10  ;;  %v914_v22 = vmul.f32 %v4242_v49, %v4202_v52  ;;  %vm909_vm9 = vweird.f32 %v4171_v59  ;;  %1245 = vst [vmem:[#allocation3 + $0x38] sm:$0xff] %v489_v33 }
 0x1f2   : > { %v1042_v20 = vsel %vm4246_vm8, %v4189_v0, %v1038_v62  ;;  %v907_v9 = vsub.f32 1.5, %v906_v53  ;;  %vm1050_vm10 = vweird.f32 %v4218_v26  ;;  %3099 = vrsqrt.f32 %v4240_v41  ;;  %vm911_vm11 = vmor %vm909_vm9, %vm910_vm7  ;;  %1259 = vst [vmem:[#allocation3] sm:$0xff] %v524_v40 }
 0x1f3   : > { %v1046_v57 = vmul.f32 0.5, %v1045_v38  ;;  %3015 = vst [vmem:[#allocation2 + $0x10] sm:$0xff] %v2989_v47   ;;  %v915_v0 = vmul.f32 %v4242_v49, %v914_v22  ;;  %v1115_v42 = vmul.f32 %v1042_v20, %v3809_v32  ;;  %vm1049_vm12 = vweird.f32 %v4185_v36 }
 0x1f4   : > { %v908_v61 = vmul.f32 %v4210_v63, %v907_v9  ;;  %v491_v54 = vadd.f32 %v490_v56, %v3879_v6  ;;  %v526_v59 = vadd.f32 %v525_v45, %v3879_v6  ;;  %3101 = vrsqrt.f32 %v4250_v60  ;;  %v493_v30 = vpop.f32.mrf.mxu1  ;;  %v528_v19 = vpop.f32.mrf.mxu3  ;;  %vm1051_vm13 = vmor %vm1049_vm12, %vm1050_vm10 }
 0x1f5   : > { %v726_v11 = vpop.xlane.xlu1 %725  ;;  %v1047_v35 = vsub.f32 1.5, %v1046_v57  ;;  %v916_v43 = vmul.f32 0.5, %v915_v0  ;;  %v1130_v32 = vmul.f32 %v3910_v15, %v1101_v31  ;;  %v1144_v14 = vmul.f32 %v3910_v15, %v1115_v42 }
 0x1f6   : > { %v769_v34 = vmul.f32 0.03125, %v726_v11  ;;  %v912_v46 = vsel %vm911_vm11, %v4210_v63, %v908_v61  ;;  %1246 = vst [vmem:[#allocation3 + $0x88] sm:$0xff] %v491_v54  ;;  %vm920_vm14 = vweird.f32 %v4242_v49  ;;  %vm919_vm15 = vweird.f32 %v4202_v52 }
 0x1f7   : > { %v1048_v44 = vmul.f32 %v4218_v26, %v1047_v35  ;;  %v1102_v28 = vmul.f32 %v912_v46, %v3812_v8  ;;  %v917_v63 = vsub.f32 1.5, %v916_v43  ;;  %1260 = vst [vmem:[#allocation3 + $0x60] sm:$0xff] %v526_v59  ;;  %v1173_v16 = vadd.f32 %v3925_v18, %v1144_v14  ;;  %vm4298_vm0 = vmor %vm919_vm15, %vm920_vm14 }
 0x1f8   : > { %v4280_v36 = vadd.f32 1e-05, %v769_v34  ;;  %v3100_v45 = vpop.eup %3099  ;;  %v494_v52 = vadd.f32 %v493_v30, %v3879_v6  ;;  %vm929_vm2 = vweird.f32 %v4240_v41  ;;  %v529_v30 = vadd.f32 %v528_v19, %v3879_v6 }
 0x1f9   : > { %v1052_v56 = vsel %vm1051_vm13, %v4218_v26, %v1048_v44  ;;  %v1131_v4 = vmul.f32 %v3910_v15, %v1102_v28  ;;  %v918_v24 = vmul.f32 %v4242_v49, %v917_v63  ;;  %v924_v10 = vmul.f32 %v3100_v45, %v4240_v41 }
 0x1fa   : > { %v1116_v48 = vmul.f32 %v1052_v56, %v3821_v51  ;;  %3103 = vrsqrt.f32 %v4280_v36  ;;  %v1159_v26 = vadd.f32 %v3925_v18, %v1130_v32  ;;  %v4293_v38 = vpop.eup %3101  ;;  %vm930_vm1 = vweird.f32 %v3100_v45  ;;  %1247 = vst [vmem:[#allocation3 + $0xa0] sm:$0xff] %v494_v52 }
 0x1fb   : > { %v754_v8 = vpop.xlane.xlu0 %753  ;;  %v1160_v39 = vadd.f32 %v3925_v18, %v1131_v4  ;;  %v925_v51 = vmul.f32 %v3100_v45, %v924_v10  ;;  %v922_v57 = vsel %vm4298_vm0, %v4242_v49, %v918_v24  ;;  %v1054_v35 = vmul.f32 %v4293_v38, %v4250_v60  ;;  %vm931_vm3 = vmor %vm929_vm2, %vm930_vm1  ;;  %1261 = vst [vmem:[#allocation3 + $0xc0] sm:$0xff] %v529_v30 }
 0x1fc   : > { %v1145_v37 = vmul.f32 %v3910_v15, %v1116_v48  ;;  %v783_v62 = vmul.f32 0.03125, %v754_v8  ;;  %v495_v49 = vpop.f32.mrf.mxu1  ;;  %v530_v42 = vpop.f32.mrf.mxu3  ;;  %v1103_v54 = vmul.f32 %v922_v57, %v3824_v23  ;;  %vm939_vm5 = vweird.f32 %v4280_v36 }
 0x1fd   : > { %v728_v53 = vpop.xlane.xlu2 %727  ;;  %v2959_v33 = vpack.c.bf16 %v1160_v39, %v1159_v26  ;;  %v926_v22 = vmul.f32 0.5, %v925_v51  ;;  %v1055_v32 = vmul.f32 %v4293_v38, %v1054_v35  ;;  %v496_v56 = vadd.f32 %v495_v49, %v3879_v6 }
 0x1fe   : > { %v770_v47 = vmul.f32 0.03125, %v728_v53  ;;  %v1174_v40 = vadd.f32 %v3925_v18, %v1145_v37  ;;  %v4302_v9 = vadd.f32 1e-05, %v783_v62  ;;  %v531_v23 = vadd.f32 %v530_v42, %v3879_v6 }
 0x1ff   : > { %3009 = vst [vmem:[#allocation2 + $0x50] sm:$0xff] %v2959_v33   ;;  %v927_v0 = vsub.f32 1.5, %v926_v22  ;;  %v1132_v8 = vmul.f32 %v3910_v15, %v1103_v54  ;;  %v1056_v6 = vmul.f32 0.5, %v1055_v32  ;;  %v3294_v37 = vmov 0.0  }
 0x200   : > { %v4307_v31 = vadd.f32 1e-05, %v770_v47  ;;  %v4310_v11 = vpop.eup %3103  ;;  %v2994_v61 = vpack.c.bf16 %v1174_v40, %v1173_v16  ;;  %3105 = vrsqrt.f32 %v4302_v9  ;;  %1248 = vst [vmem:[#allocation3 + $0x48] sm:$0xff] %v496_v56  ;;  %vm1060_vm9 = vweird.f32 %v4293_v38 }
 0x201   : > { %v934_v34 = vmul.f32 %v4310_v11, %v4280_v36  ;;  %v928_v46 = vmul.f32 %v3100_v45, %v927_v0  ;;  %1262 = vst [vmem:[#allocation3 + $0x30] sm:$0xff] %v531_v23  ;;  %vm940_vm4 = vweird.f32 %v4310_v11  ;;  %v1161_v51 = vadd.f32 %v3925_v18, %v1132_v8 }
 0x202   : > { %3016 = vst [vmem:[#allocation2 + $0x38] sm:$0xff] %v2994_v61   ;;  %3107 = vrsqrt.f32 %v4307_v31  ;;  %vm941_vm6 = vmor %vm939_vm5, %vm940_vm4  ;;  %v1057_v57 = vsub.f32 1.5, %v1056_v6  ;;  %vm1079_vm10 = vweird.f32 %v4302_v9  ;;  %vm949_vm12 = vweird.f32 %v4307_v31 }
 0x203   : > { %v756_v59 = vpop.xlane.xlu1 %755  ;;  %v935_v44 = vmul.f32 %v4310_v11, %v934_v34  ;;  %v932_v63 = vsel %vm931_vm3, %v3100_v45, %v928_v46  ;;  %1263 = vst [vmem:[#allocation4] sm:$0xf] %v3294_v37  ;;  %vm1059_vm14 = vweird.f32 %v4250_v60 }
 0x204   : > { %v784_v43 = vmul.f32 0.03125, %v756_v59  ;;  %v1104_v19 = vmul.f32 %v932_v63, %v3840_v58  ;;  %v1058_v54 = vmul.f32 %v4293_v38, %v1057_v57  ;;  %vm1061_vm15 = vmor %vm1059_vm14, %vm1060_vm9 }
 0x205   : > { %v752_v28 = vpop.xlane.xlu2 %751  ;;  %v936_v41 = vmul.f32 0.5, %v935_v44 }
 0x206   : > { %v4326_v14 = vadd.f32 1e-05, %v784_v43  ;;  %v782_v4 = vmul.f32 0.03125, %v752_v28  ;;  %v3106_v48 = vpop.eup %3105  ;;  %v1133_v45 = vmul.f32 %v3910_v15, %v1104_v19 }
 0x207   : > { %v937_v24 = vsub.f32 1.5, %v936_v41  ;;  %v1074_v10 = vmul.f32 %v3106_v48, %v4302_v9  ;;  %vm1080_vm7 = vweird.f32 %v3106_v48 }
 0x208   : > { %3109 = vrsqrt.f32 %v4326_v14  ;;  %v3108_v26 = vpop.eup %3107  ;;  %v4333_v39 = vadd.f32 1e-05, %v782_v4  ;;  %v1162_v47 = vadd.f32 %v3925_v18, %v1133_v45  ;;  %vm4348_vm11 = vmor %vm1079_vm10, %vm1080_vm7  ;;  %vm1089_vm1 = vweird.f32 %v4326_v14 }
 0x209   : > { %v938_v62 = vmul.f32 %v4310_v11, %v937_v24  ;;  %v1075_v58 = vmul.f32 %v3106_v48, %v1074_v10  ;;  %v944_v53 = vmul.f32 %v3108_v26, %v4307_v31  ;;  %vm950_vm8 = vweird.f32 %v3108_v26 }
 0x20a   : > { %3111 = vrsqrt.f32 %v4333_v39  ;;  %v2964_v40 = vpack.c.bf16 %v1162_v47, %v1161_v51  ;;  %vm951_vm13 = vmor %vm949_vm12, %vm950_vm8  ;;  %v1062_v31 = vsel %vm1061_vm15, %v4293_v38, %v1058_v54  ;;  %vm1069_vm4 = vweird.f32 %v4333_v39 }
 0x20b   : > { %v1076_v16 = vmul.f32 0.5, %v1075_v58  ;;  %v945_v33 = vmul.f32 %v3108_v26, %v944_v53  ;;  %v942_v22 = vsel %vm941_vm6, %v4310_v11, %v938_v62  ;;  %v1117_v4 = vmul.f32 %v1062_v31, %v3837_v3 }
 0x20c   : > { %3010 = vst [vmem:[#allocation2 + $0x68] sm:$0xff] %v2964_v40   ;;  %v1105_v36 = vmul.f32 %v942_v22, %v3849_v13 }
 0x20d   : > { %v1077_v52 = vsub.f32 1.5, %v1076_v16  ;;  %v946_v61 = vmul.f32 0.5, %v945_v33 }
 0x20e   : > { %v3110_v20 = vpop.eup %3109  ;;  %v1134_v30 = vmul.f32 %v3910_v15, %v1105_v36 }
 0x20f   : > { %v1084_v35 = vmul.f32 %v3110_v20, %v4326_v14  ;;  %v1078_v0 = vmul.f32 %v3106_v48, %v1077_v52  ;;  %v947_v34 = vsub.f32 1.5, %v946_v61  ;;  %vm1090_vm0 = vweird.f32 %v3110_v20 }
 0x210   : > { %v3112_v49 = vpop.eup %3111  ;;  %vm1091_vm2 = vmor %vm1089_vm1, %vm1090_vm0 }
 0x211   : > { %v1085_v42 = vmul.f32 %v3110_v20, %v1084_v35  ;;  %v948_v59 = vmul.f32 %v3108_v26, %v947_v34  ;;  %v1064_v46 = vmul.f32 %v3112_v49, %v4333_v39  ;;  %v1082_v44 = vsel %vm4348_vm11, %v3106_v48, %v1078_v0 }
 0x212   : > { %v1119_v56 = vmul.f32 %v1082_v44, %v3855_v5  ;;  %vm1070_vm3 = vweird.f32 %v3112_v49  ;;  %v1163_v48 = vadd.f32 %v3925_v18, %v1134_v30 }
 0x213   : > { %v1086_v43 = vmul.f32 0.5, %v1085_v42  ;;  %v952_v13 = vsel %vm951_vm13, %v3108_v26, %v948_v59  ;;  %v1065_v9 = vmul.f32 %v3112_v49, %v1064_v46  ;;  %vm1071_vm5 = vmor %vm1069_vm4, %vm1070_vm3  ;;  %v1146_v26 = vmul.f32 %v3910_v15, %v1117_v4 }
 0x214   : > { %v1106_v32 = vmul.f32 %v952_v13, %v3858_v50  ;;  %v1148_v38 = vmul.f32 %v3910_v15, %v1119_v56 }
 0x215   : > { %v1087_v28 = vsub.f32 1.5, %v1086_v43  ;;  %v1066_v23 = vmul.f32 0.5, %v1065_v9  ;;  %v1175_v62 = vadd.f32 %v3925_v18, %v1146_v26 }
 0x216   : > { %v1135_v63 = vmul.f32 %v3910_v15, %v1106_v32  ;;  %v1177_v6 = vadd.f32 %v3925_v18, %v1148_v38 }
 0x217   : > { %v1088_v41 = vmul.f32 %v3110_v20, %v1087_v28  ;;  %v1067_v60 = vsub.f32 1.5, %v1066_v23 }
 0x218   : > { %v1164_v50 = vadd.f32 %v3925_v18, %v1135_v63 }
 0x219   : > { %v1092_v8 = vsel %vm1091_vm2, %v3110_v20, %v1088_v41  ;;  %v1068_v19 = vmul.f32 %v3112_v49, %v1067_v60 }
 0x21a   : > { %v1120_v5 = vmul.f32 %v1092_v8, %v3870_v27  ;;  %v2969_v24 = vpack.c.bf16 %v1164_v50, %v1163_v48 }
 0x21b   : > { %v1072_v10 = vsel %vm1071_vm5, %v3112_v49, %v1068_v19 }
 0x21c   : > { %v1149_v14 = vmul.f32 %v3910_v15, %v1120_v5  ;;  %3011 = vst [vmem:[#allocation2 + $0x8] sm:$0xff] %v2969_v24   ;;  %v1118_v3 = vmul.f32 %v1072_v10, %v3866_v55 }
 0x21e   : > { %v1178_v45 = vadd.f32 %v3925_v18, %v1149_v14  ;;  %v1147_v37 = vmul.f32 %v3910_v15, %v1118_v3 }
 0x220   : > { %v3004_v27 = vpack.c.bf16 %v1178_v45, %v1177_v6  ;;  %v1176_v39 = vadd.f32 %v3925_v18, %v1147_v37 }
 0x222   : > { %3018 = vst [vmem:[#allocation2 + $0x28] sm:$0xff] %v3004_v27   ;;  %v2999_v58 = vpack.c.bf16 %v1176_v39, %v1175_v62 }
 0x224   : > { %3017 = vst [vmem:[#allocation2 + $0x60] sm:$0xff] %v2999_v58  }
 0x225 PF: > { %v2795_v55 = vor.u32 %v3448_v25, %v3430_v21  ;;  %v2787_v15 = vor.u32 %v3407_v17, %v3387_v12  ;;  %v2779_v18 = vor.u32 %v3364_v7, %v3340_v1  ;;  %v4386_v53 = vld [vmem:[%s3417_s5] sm:$0xff]  ;;  %vm1345_vm6 = vcmask 392192   ;;  %v4391_v51 = vld [vmem:[%s3417_s5 + $0x8] sm:$0xff]  ;;  %v4396_v21 = vld [vmem:[%s3417_s5 + $0x10] sm:$0xff]  ;;  %s2593_s9 = sshll.u32 %s5101_s4, 4  ;;  %p3044_p5 = scmp.eq.s32.totalorder %s3327_s16, 1  ;;  %s2594_s9 = int_to_ptr.hbm [resolvable:$true] %s2593_s9 }
 0x226   : > { %v4401_v12 = vld [vmem:[%s3417_s5 + $0x18] sm:$0xff]  ;;  %v4406_v1 = vld [vmem:[%s3417_s5 + $0x20] sm:$0xff]  ;;  %v4411_v7 = vld [vmem:[%s3417_s5 + $0x28] sm:$0xff]  ;;  %v1278_v25 = vperm.slane %v3345_v2, 0 }
 0x227   : > { %1372 = vmatpush.bf16.msra.mxu0 %v2795_v55  ;;  %v4416_v17 = vld [vmem:[%s3417_s5 + $0x30] sm:$0xff]  ;;  %s3295_s5 = smov [#allocation4]  }
 0x228   : > { %s2591_s6 = sshll.u32 %s3295_s5, 4  ;;  %s2592_s6 = int_to_ptr.vmem [resolvable:$true] %s2591_s6 }
 0x22b   : > { %1373 = vmatpush.bf16.msra.mxu0 %v2787_v15 }
 0x22f   : > { %1374 = vmatpush.bf16.msra.mxu0 %v2779_v18 }
 0x232   : > { %2800 = vmatmul.msk.bf16.vlgmr.msra.gmra.mxu0 %vm1345_vm6, %v4386_v53 }
 0x242   : > { %2801 = vmatmul.msk.bf16.gmra.mxu0 %vm1345_vm6, %v4391_v51 }
 0x252   : > { %2802 = vmatmul.msk.bf16.gmra.mxu0 %vm1345_vm6, %v4396_v21 }
 0x262   : > { %2803 = vmatmul.msk.bf16.gmra.mxu0 %vm1345_vm6, %v4401_v12 }
 0x272   : > { %2804 = vmatmul.msk.bf16.gmra.mxu0 %vm1345_vm6, %v4406_v1 }
 0x282   : > { %2805 = vmatmul.msk.bf16.gmra.mxu0 %vm1345_vm6, %v4411_v7 }
 0x292   : > { %2806 = vmatmul.msk.bf16.gmra.mxu0 %vm1345_vm6, %v4416_v17 }
 0x2af   : > { %v1376_v47 = vpop.f32.mrf.mxu0 }
 0x2b0   : > { %v4421_v16 = vadd.f32 %v1376_v47, %v1278_v25 }
 0x2b7   : > { %v1378_v33 = vpop.f32.mrf.mxu0 }
 0x2b8   : > { %v4432_v28 = vadd.f32 %v1378_v33, %v1278_v25 }
 0x2bf   : > { %v1381_v40 = vpop.f32.mrf.mxu0 }
 0x2c0   : > { %v4429_v30 = vadd.f32 %v1381_v40, %v1278_v25 }
 0x2c7   : > { %v1383_v20 = vpop.f32.mrf.mxu0 }
 0x2c8   : > { %v1384_v59 = vadd.f32 %v1383_v20, %v1278_v25 }
 0x2cf   : > { %v1386_v57 = vpop.f32.mrf.mxu0 }
 0x2d0   : > { %v1387_v42 = vadd.f32 %v1386_v57, %v1278_v25 }
 0x2d7   : > { %v1388_v22 = vpop.f32.mrf.mxu0 }
 0x2d8   : > { %v4435_v56 = vadd.f32 %v1388_v22, %v1278_v25 }
 0x2df   : > { %v1391_v52 = vpop.f32.mrf.mxu0 }
 0x2e0   : > { %v1392_v31 = vadd.f32 %v1391_v52, %v1278_v25 }
 0x2e7   : > { %v1393_v61 = vpop.f32.mrf.mxu0 }
 0x2e8   : > { %v4426_v43 = vadd.f32 %v1393_v61, %v1278_v25 }
 0x2ef   : > { %v1396_v35 = vpop.f32.mrf.mxu0 }
 0x2f0   : > { %v4423_v0 = vadd.f32 %v1396_v35, %v1278_v25 }
 0x2f2   : > { %1471 = vadd.xlane.f32.xlu2 %v4423_v0 }
 0x2f7   : > { %v1398_v34 = vpop.f32.mrf.mxu0 }
 0x2f8   : > { %v1399_v49 = vadd.f32 %v1398_v34, %v1278_v25 }
 0x2fa   : > { %1473 = vadd.xlane.f32.xlu2 %v1399_v49 }
 0x2ff   : > { %v1401_v36 = vpop.f32.mrf.mxu0 }
 0x300   : > { %v1402_v54 = vadd.f32 %v1401_v36, %v1278_v25 }
 0x302   : > { %1475 = vadd.xlane.f32.xlu1 %v1402_v54  ;;  %1463 = vadd.xlane.f32.xlu2 %v1387_v42 }
 0x307   : > { %v1403_v11 = vpop.f32.mrf.mxu0 }
 0x308   : > { %v1404_v46 = vadd.f32 %v1403_v11, %v1278_v25 }
 0x30a   : > { %1477 = vadd.xlane.f32.xlu1 %v1404_v46  ;;  %1461 = vadd.xlane.f32.xlu2 %v1384_v59 }
 0x30f   : > { %v1406_v44 = vpop.f32.mrf.mxu0 }
 0x310   : > { %v1407_v13 = vadd.f32 %v1406_v44, %v1278_v25 }
 0x312   : > { %1479 = vadd.xlane.f32.xlu0 %v1407_v13  ;;  %1469 = vadd.xlane.f32.xlu1 %v4426_v43 }
 0x317   : > { %v1408_v9 = vpop.f32.mrf.mxu0 }
 0x318   : > { %v1409_v32 = vadd.f32 %v1408_v9, %v1278_v25 }
 0x31a   : > { %1481 = vadd.xlane.f32.xlu0 %v1409_v32  ;;  %1459 = vadd.xlane.f32.xlu1 %v4429_v30 }
 0x322   : > { %1467 = vadd.xlane.f32.xlu0 %v1392_v31  ;;  %1457 = vadd.xlane.f32.xlu1 %v4432_v28 }
 0x32a   : > { %1465 = vadd.xlane.f32.xlu0 %v4435_v56 }
 0x332   : > { %1455 = vadd.xlane.f32.xlu0 %v4421_v16 }
 0x365   : > { %v1472_v23 = vpop.xlane.xlu2 %1471 }
 0x366   : > { %v1491_v22 = vmul.f32 0.03125, %v1472_v23 }
 0x368   : > { %v4475_v36 = vsub.f32 %v4423_v0, %v1491_v22 }
 0x36d   : > { %v1474_v63 = vpop.xlane.xlu2 %1473 }
 0x36e   : > { %v1492_v4 = vmul.f32 0.03125, %v1474_v63 }
 0x370   : > { %v4443_v38 = vsub.f32 %v1399_v49, %v1492_v4 }
 0x372   : > { %v1520_v24 = vmul.f32 %v4443_v38, %v4443_v38 }
 0x374   : > { %v1534_v26 = vmul.f32 %v3460_v29, %v1520_v24 }
 0x375   : > { %v1476_v41 = vpop.xlane.xlu1 %1475  ;;  %v1464_v8 = vpop.xlane.xlu2 %1463 }
 0x376   : > { %v1493_v60 = vmul.f32 0.03125, %v1476_v41  ;;  %v1487_v19 = vmul.f32 0.03125, %v1464_v8 }
 0x378   : > { %v4439_v48 = vsub.f32 %v1402_v54, %v1493_v60  ;;  %v4448_v14 = vsub.f32 %v1387_v42, %v1487_v19 }
 0x37a   : > { %v1521_v50 = vmul.f32 %v4439_v48, %v4439_v48  ;;  %v1515_v39 = vmul.f32 %v4448_v14, %v4448_v14 }
 0x37c   : > { %v1535_v5 = vmul.f32 %v3460_v29, %v1521_v50  ;;  %v1529_v25 = vmul.f32 %v3460_v29, %v1515_v39 }
 0x37d   : > { %v1478_v10 = vpop.xlane.xlu1 %1477  ;;  %v1462_v3 = vpop.xlane.xlu2 %1461 }
 0x37e   : > { %1559 = vadd.xlane.f32.xlu1 %v1535_v5  ;;  %v1494_v37 = vmul.f32 0.03125, %v1478_v10  ;;  %v1486_v27 = vmul.f32 0.03125, %v1462_v3 }
 0x380   : > { %v4457_v55 = vsub.f32 %v1404_v46, %v1494_v37  ;;  %v4459_v15 = vsub.f32 %v1384_v59, %v1486_v27  ;;  %v1519_v46 = vmul.f32 %v4475_v36, %v4475_v36 }
 0x382   : > { %v1522_v20 = vmul.f32 %v4457_v55, %v4457_v55  ;;  %v1514_v57 = vmul.f32 %v4459_v15, %v4459_v15  ;;  %v1533_v23 = vmul.f32 %v3460_v29, %v1519_v46 }
 0x384   : > { %v1536_v35 = vmul.f32 %v3460_v29, %v1522_v20  ;;  %v1528_v34 = vmul.f32 %v3460_v29, %v1514_v57 }
 0x385   : > { %v1480_v6 = vpop.xlane.xlu0 %1479  ;;  %v1470_v52 = vpop.xlane.xlu1 %1469 }
 0x386   : > { %v1495_v45 = vmul.f32 0.03125, %v1480_v6  ;;  %1557 = vadd.xlane.f32.xlu1 %v1534_v26  ;;  %v1490_v59 = vmul.f32 0.03125, %v1470_v52 }
 0x388   : > { %v4451_v62 = vsub.f32 %v1407_v13, %v1495_v45  ;;  %v4485_v0 = vsub.f32 %v4426_v43, %v1490_v59 }
 0x38a   : > { %v1523_v58 = vmul.f32 %v4451_v62, %v4451_v62  ;;  %v1518_v60 = vmul.f32 %v4485_v0, %v4485_v0 }
 0x38c   : > { %v1537_v18 = vmul.f32 %v3460_v29, %v1523_v58  ;;  %v1532_v5 = vmul.f32 %v3460_v29, %v1518_v60 }
 0x38d   : > { %v1482_v47 = vpop.xlane.xlu0 %1481  ;;  %v1460_v13 = vpop.xlane.xlu1 %1459 }
 0x38e   : > { %v1496_v33 = vmul.f32 0.03125, %v1482_v47  ;;  %1563 = vadd.xlane.f32.xlu2 %v1537_v18  ;;  %1547 = vadd.xlane.f32.xlu1 %v1529_v25  ;;  %v1485_v41 = vmul.f32 0.03125, %v1460_v13 }
 0x390   : > { %v4463_v40 = vsub.f32 %v1409_v32, %v1496_v33  ;;  %v4497_v43 = vsub.f32 %v4429_v30, %v1485_v41 }
 0x392   : > { %v1524_v61 = vmul.f32 %v4463_v40, %v4463_v40  ;;  %v1513_v26 = vmul.f32 %v4497_v43, %v4497_v43 }
 0x394   : > { %v1538_v49 = vmul.f32 %v3460_v29, %v1524_v61  ;;  %v1527_v45 = vmul.f32 %v3460_v29, %v1513_v26 }
 0x395   : > { %v1468_v42 = vpop.xlane.xlu0 %1467  ;;  %v1458_v19 = vpop.xlane.xlu1 %1457 }
 0x396   : > { %v1489_v54 = vmul.f32 0.03125, %v1468_v42  ;;  %1561 = vadd.xlane.f32.xlu2 %v1536_v35  ;;  %1545 = vadd.xlane.f32.xlu1 %v1528_v34  ;;  %v1484_v10 = vmul.f32 0.03125, %v1458_v19 }
 0x397   : > { %1565 = vadd.xlane.f32.xlu0 %v1538_v49 }
 0x398   : > { %v4477_v11 = vsub.f32 %v1392_v31, %v1489_v54  ;;  %v4509_v6 = vsub.f32 %v4432_v28, %v1484_v10 }
 0x39a   : > { %v1517_v44 = vmul.f32 %v4477_v11, %v4477_v11 }
 0x39c   : > { %v1531_v9 = vmul.f32 %v3460_v29, %v1517_v44 }
 0x39d   : > { %v1466_v32 = vpop.xlane.xlu0 %1465 }
 0x39e   : > { %v1488_v63 = vmul.f32 0.03125, %v1466_v32  ;;  %1551 = vadd.xlane.f32.xlu2 %v1531_v9 }
 0x39f   : > { %1555 = vadd.xlane.f32.xlu0 %v1533_v23 }
 0x3a0   : > { %v4489_v31 = vsub.f32 %v4435_v56, %v1488_v63 }
 0x3a2   : > { %v1516_v4 = vmul.f32 %v4489_v31, %v4489_v31 }
 0x3a4   : > { %v1530_v50 = vmul.f32 %v3460_v29, %v1516_v4 }
 0x3a5   : > { %v1456_v8 = vpop.xlane.xlu0 %1455 }
 0x3a6   : > { %v1483_v24 = vmul.f32 0.03125, %v1456_v8  ;;  %1549 = vadd.xlane.f32.xlu2 %v1530_v50 }
 0x3a7   : > { %1553 = vadd.xlane.f32.xlu0 %v1532_v5 }
 0x3a8   : > { %v4501_v56 = vsub.f32 %v4421_v16, %v1483_v24  ;;  %v1512_v16 = vmul.f32 %v4509_v6, %v4509_v6 }
 0x3aa   : > { %v1511_v3 = vmul.f32 %v4501_v56, %v4501_v56  ;;  %v1526_v37 = vmul.f32 %v3460_v29, %v1512_v16 }
 0x3ac   : > { %v1525_v30 = vmul.f32 %v3460_v29, %v1511_v3 }
 0x3ae   : > { %1539 = vadd.xlane.f32.xlu2 %v1525_v30 }
 0x3af   : > { %1543 = vadd.xlane.f32.xlu0 %v1527_v45 }
 0x3b7   : > { %1541 = vadd.xlane.f32.xlu0 %v1526_v37 }
 0x3f1   : > { %v1560_v27 = vpop.xlane.xlu1 %1559 }
 0x3f2   : > { %v1577_v39 = vmul.f32 0.03125, %v1560_v27 }
 0x3f4   : > { %v1591_v58 = vadd.f32 1e-05, %v1577_v39 }
 0x3f6   : > { %3113 = vrsqrt.f32 %v1591_v58  ;;  %vm1701_vm8 = vweird.f32 %v1591_v58 }
 0x3f9   : > { %v1558_v18 = vpop.xlane.xlu1 %1557 }
 0x3fa   : > { %v1576_v33 = vmul.f32 0.03125, %v1558_v18 }
 0x3fc   : > { %v4515_v47 = vpop.eup %3113  ;;  %v4518_v22 = vadd.f32 1e-05, %v1576_v33 }
 0x3fd   : > { %v1696_v57 = vmul.f32 %v4515_v47, %v1591_v58  ;;  %vm1702_vm7 = vweird.f32 %v4515_v47 }
 0x3fe   : > { %vm4553_vm10 = vmor %vm1701_vm8, %vm1702_vm7  ;;  %vm1691_vm3 = vweird.f32 %v4518_v22 }
 0x3ff   : > { %v1697_v52 = vmul.f32 %v4515_v47, %v1696_v57 }
 0x401   : > { %v1564_v25 = vpop.xlane.xlu2 %1563  ;;  %v1698_v54 = vmul.f32 0.5, %v1697_v52  ;;  %v1548_v13 = vpop.xlane.xlu1 %1547 }
 0x402   : > { %v1579_v28 = vmul.f32 0.03125, %v1564_v25  ;;  %v1571_v41 = vmul.f32 0.03125, %v1548_v13 }
 0x403   : > { %v1699_v32 = vsub.f32 1.5, %v1698_v54 }
 0x404   : > { %v1593_v20 = vadd.f32 1e-05, %v1579_v28  ;;  %v4546_v45 = vadd.f32 1e-05, %v1571_v41 }
 0x405   : > { %v1700_v10 = vmul.f32 %v4515_v47, %v1699_v32 }
 0x406   : > { %3115 = vrsqrt.f32 %v1593_v20  ;;  %vm1721_vm11 = vweird.f32 %v1593_v20 }
 0x407   : > { %3117 = vrsqrt.f32 %v4518_v22  ;;  %v1704_v33 = vsel %vm4553_vm10, %v4515_v47, %v1700_v10 }
 0x408   : > { %v1745_v32 = vmul.f32 %v1704_v33, %v4439_v48 }
 0x409   : > { %v1562_v29 = vpop.xlane.xlu2 %1561  ;;  %v1546_v52 = vpop.xlane.xlu1 %1545 }
 0x40a   : > { %v1578_v61 = vmul.f32 0.03125, %v1562_v29  ;;  %v1566_v35 = vpop.xlane.xlu0 %1565 }
 0x40b   : > { %v1580_v34 = vmul.f32 0.03125, %v1566_v35  ;;  %v4568_v35 = vperm.slane %v3345_v2, 1  ;;  %v1570_v2 = vmul.f32 0.03125, %v1546_v52 }
 0x40c   : > { %v4522_v49 = vpop.eup %3115  ;;  %v4524_v42 = vadd.f32 1e-05, %v1578_v61 }
 0x40d   : > { %v1716_v59 = vmul.f32 %v4522_v49, %v1593_v20  ;;  %v4527_v46 = vadd.f32 1e-05, %v1580_v34  ;;  %v4532_v9 = vpop.eup %3117  ;;  %vm1722_vm9 = vweird.f32 %v4522_v49 }
 0x40e   : > { %3119 = vrsqrt.f32 %v4524_v42  ;;  %v1686_v19 = vmul.f32 %v4532_v9, %v4518_v22  ;;  %vm4562_vm12 = vmor %vm1721_vm11, %vm1722_vm9  ;;  %vm1711_vm15 = vweird.f32 %v4524_v42  ;;  %vm1692_vm4 = vweird.f32 %v4532_v9 }
 0x40f   : > { %v1717_v44 = vmul.f32 %v4522_v49, %v1716_v59  ;;  %3121 = vrsqrt.f32 %v4527_v46  ;;  %vm1731_vm1 = vweird.f32 %v4527_v46  ;;  %vm4633_vm7 = vmor %vm1691_vm3, %vm1692_vm4  ;;  %vm1641_vm4 = vweird.f32 %v4546_v45 }
 0x410   : > { %v1687_v18 = vmul.f32 %v4532_v9, %v1686_v19 }
 0x411   : > { %v1718_v23 = vmul.f32 0.5, %v1717_v44  ;;  %v1552_v63 = vpop.xlane.xlu2 %1551 }
 0x412   : > { %v1573_v60 = vmul.f32 0.03125, %v1552_v63  ;;  %v1556_v4 = vpop.xlane.xlu0 %1555  ;;  %v1688_v44 = vmul.f32 0.5, %v1687_v18 }
 0x413   : > { %v1719_v50 = vsub.f32 1.5, %v1718_v23  ;;  %v1575_v8 = vmul.f32 0.03125, %v1556_v4 }
 0x414   : > { %v4534_v5 = vpop.eup %3119  ;;  %v4538_v24 = vadd.f32 1e-05, %v1573_v60  ;;  %v1689_v19 = vsub.f32 1.5, %v1688_v44 }
 0x415   : > { %v1706_v26 = vmul.f32 %v4534_v5, %v4524_v42  ;;  %v4544_v3 = vadd.f32 1e-05, %v1575_v8  ;;  %v3122_v30 = vpop.eup %3121  ;;  %v1720_v16 = vmul.f32 %v4522_v49, %v1719_v50  ;;  %vm1712_vm13 = vweird.f32 %v4534_v5 }
 0x416   : > { %3123 = vrsqrt.f32 %v4538_v24  ;;  %v1726_v27 = vmul.f32 %v3122_v30, %v4527_v46  ;;  %vm1732_vm14 = vweird.f32 %v3122_v30  ;;  %vm4587_vm0 = vmor %vm1711_vm15, %vm1712_vm13 }
 0x417   : > { %v1707_v37 = vmul.f32 %v4534_v5, %v1706_v26  ;;  %3125 = vrsqrt.f32 %v4544_v3  ;;  %v1724_v59 = vsel %vm4562_vm12, %v4522_v49, %v1720_v16  ;;  %vm1733_vm2 = vmor %vm1731_vm1, %vm1732_vm14  ;;  %v4602_v26 = vadd.f32 1e-05, %v1570_v2 }
 0x418   : > { %v1727_v25 = vmul.f32 %v3122_v30, %v1726_v27  ;;  %3127 = vrsqrt.f32 %v4546_v45  ;;  %v1747_v60 = vmul.f32 %v1724_v59, %v4451_v62  ;;  %v5140_v62 = vld [vmem:[#allocation9_spill] sm:$0xff]  ;;  %vm1681_vm8 = vweird.f32 %v4544_v3 }
 0x419   : > { %v1708_v58 = vmul.f32 0.5, %v1707_v37  ;;  %v1550_v28 = vpop.xlane.xlu2 %1549  ;;  %v4600_v10 = vperm.slane %v5140_v62, 1  ;;  %vm1661_vm14 = vweird.f32 %v4538_v24 }
 0x41a   : > { %v1572_v29 = vmul.f32 0.03125, %v1550_v28  ;;  %v1554_v61 = vpop.xlane.xlu0 %1553  ;;  %v1728_v34 = vmul.f32 0.5, %v1727_v25  ;;  %v1762_v18 = vmul.f32 %v4568_v35, %v1747_v60 }
 0x41b   : > { %v1709_v20 = vsub.f32 1.5, %v1708_v58  ;;  %v1574_v54 = vmul.f32 0.03125, %v1554_v61 }
 0x41c   : > { %v4573_v47 = vpop.eup %3123  ;;  %v4576_v13 = vadd.f32 1e-05, %v1572_v29  ;;  %v1729_v63 = vsub.f32 1.5, %v1728_v34  ;;  %v1777_v44 = vadd.f32 %v4600_v10, %v1762_v18 }
 0x41d   : > { %v1710_v23 = vmul.f32 %v4534_v5, %v1709_v20  ;;  %v4580_v41 = vpop.eup %3125  ;;  %v4584_v49 = vadd.f32 1e-05, %v1574_v54  ;;  %v1656_v50 = vmul.f32 %v4573_v47, %v4538_v24  ;;  %vm1662_vm11 = vweird.f32 %v4573_v47 }
 0x41e   : > { %3129 = vrsqrt.f32 %v4576_v13  ;;  %v1730_v48 = vmul.f32 %v3122_v30, %v1729_v63  ;;  %v1676_v8 = vmul.f32 %v4580_v41, %v4544_v3  ;;  %v4596_v42 = vpop.eup %3127  ;;  %vm1682_vm5 = vweird.f32 %v4580_v41  ;;  %vm4686_vm15 = vmor %vm1661_vm14, %vm1662_vm11 }
 0x41f   : > { %3131 = vrsqrt.f32 %v4584_v49  ;;  %v1714_v37 = vsel %vm4587_vm0, %v4534_v5, %v1710_v23  ;;  %v1657_v58 = vmul.f32 %v4573_v47, %v1656_v50  ;;  %v1690_v5 = vmul.f32 %v4532_v9, %v1689_v19  ;;  %vm4641_vm9 = vmor %vm1681_vm8, %vm1682_vm5 }
 0x420   : > { %v1677_v16 = vmul.f32 %v4580_v41, %v1676_v8  ;;  %v1734_v46 = vsel %vm1733_vm2, %v3122_v30, %v1730_v48  ;;  %v1760_v30 = vmul.f32 %v4568_v35, %v1745_v32  ;;  %v1636_v52 = vmul.f32 %v4596_v42, %v4546_v45 }
 0x421   : > { %v1748_v39 = vmul.f32 %v1734_v46, %v4463_v40  ;;  %v1540_v28 = vpop.xlane.xlu2 %1539  ;;  %v1746_v40 = vmul.f32 %v1714_v37, %v4457_v55  ;;  %3133 = vrsqrt.f32 %v4602_v26  ;;  %v1658_v23 = vmul.f32 0.5, %v1657_v58 }
 0x422   : > { %v1544_v27 = vpop.xlane.xlu0 %1543  ;;  %v1678_v25 = vmul.f32 0.5, %v1677_v16  ;;  %v1567_v54 = vmul.f32 0.03125, %v1540_v28  ;;  %v1637_v60 = vmul.f32 %v4596_v42, %v1636_v52  ;;  %v1694_v19 = vsel %vm4633_vm7, %v4532_v9, %v1690_v5 }
 0x423   : > { %v1569_v33 = vmul.f32 0.03125, %v1544_v27  ;;  %v1763_v29 = vmul.f32 %v4568_v35, %v1748_v39  ;;  %v1761_v48 = vmul.f32 %v4568_v35, %v1746_v40  ;;  %v1659_v27 = vsub.f32 1.5, %v1658_v23 }
 0x424   : > { %v4614_v57 = vpop.eup %3129  ;;  %v1679_v61 = vsub.f32 1.5, %v1678_v25  ;;  %v4654_v16 = vadd.f32 1e-05, %v1567_v54  ;;  %v1775_v58 = vadd.f32 %v4600_v10, %v1760_v30  ;;  %v1744_v28 = vmul.f32 %v1694_v19, %v4443_v38 }
 0x425   : > { %v1646_v20 = vmul.f32 %v4614_v57, %v4576_v13  ;;  %v3132_v34 = vpop.eup %3131  ;;  %v4625_v59 = vadd.f32 1e-05, %v1569_v33  ;;  %v1778_v32 = vadd.f32 %v4600_v10, %v1763_v29  ;;  %v1776_v25 = vadd.f32 %v4600_v10, %v1761_v48 }
 0x426   : > { %v1680_v2 = vmul.f32 %v4580_v41, %v1679_v61  ;;  %v1666_v63 = vmul.f32 %v3132_v34, %v4584_v49  ;;  %v1638_v33 = vmul.f32 0.5, %v1637_v60  ;;  %vm1672_vm10 = vweird.f32 %v3132_v34 }
 0x427   : > { %3135 = vrsqrt.f32 %v4625_v59  ;;  %v1813_v22 = vpack.c.bf16 %v1778_v32, %v1777_v44  ;;  %v1647_v50 = vmul.f32 %v4614_v57, %v1646_v20  ;;  %v4656_v37 = vpop.eup %3133  ;;  %v1660_v40 = vmul.f32 %v4573_v47, %v1659_v27 }
 0x428   : > { %v1667_v8 = vmul.f32 %v3132_v34, %v1666_v63  ;;  %v1684_v3 = vsel %vm4641_vm9, %v4580_v41, %v1680_v2  ;;  %v1626_v29 = vmul.f32 %v4656_v37, %v4602_v26  ;;  %3137 = vrsqrt.f32 %v4654_v16 }
 0x429   : > { %1899 = vmatpush.bf16.xpose.msrb.mxu0 %v1813_v22  ;;  %3025 = vmatpush.bf16.xpose.msra.mxu2 %v1813_v22  ;;  %v1743_v41 = vmul.f32 %v1684_v3, %v4475_v36  ;;  %v1648_v9 = vmul.f32 0.5, %v1647_v50  ;;  %vm1671_vm12 = vweird.f32 %v4584_v49  ;;  %v1812_v20 = vpack.c.bf16 %v1776_v25, %v1775_v58 }
 0x42a   : > { %v1542_v46 = vpop.xlane.xlu0 %1541  ;;  %v1668_v39 = vmul.f32 0.5, %v1667_v8  ;;  %vm4674_vm13 = vmor %vm1671_vm12, %vm1672_vm10  ;;  %v1639_v55 = vsub.f32 1.5, %v1638_v33  ;;  %v1759_v2 = vmul.f32 %v4568_v35, %v1744_v28  ;;  %v1627_v63 = vmul.f32 %v4656_v37, %v1626_v29 }
 0x42b   : > { %v1568_v18 = vmul.f32 0.03125, %v1542_v46  ;;  %v1758_v54 = vmul.f32 %v4568_v35, %v1743_v41  ;;  %v1649_v44 = vsub.f32 1.5, %v1648_v9  ;;  %v1664_v24 = vsel %vm4686_vm15, %v4573_v47, %v1660_v40 }
 0x42c   : > { %v1669_v5 = vsub.f32 1.5, %v1668_v39  ;;  %vm1652_vm0 = vweird.f32 %v4614_v57  ;;  %v1640_v8 = vmul.f32 %v4596_v42, %v1639_v55  ;;  %vm1642_vm1 = vweird.f32 %v4596_v42 }
 0x42d   : > { %v4662_v52 = vpop.eup %3135  ;;  %v4668_v30 = vadd.f32 1e-05, %v1568_v18  ;;  %v1650_v22 = vmul.f32 %v4614_v57, %v1649_v44  ;;  %v1774_v3 = vadd.f32 %v4600_v10, %v1759_v2  ;;  %v1741_v47 = vmul.f32 %v1664_v24, %v4477_v11  ;;  %vm1643_vm5 = vmor %vm1641_vm4, %vm1642_vm1 }
 0x42e   : > { %v1670_v36 = vmul.f32 %v3132_v34, %v1669_v5  ;;  %v1616_v38 = vmul.f32 %v4662_v52, %v4625_v59  ;;  %v4695_v60 = vpop.eup %3137  ;;  %v1628_v19 = vmul.f32 0.5, %v1627_v63  ;;  %vm1651_vm2 = vweird.f32 %v4576_v13 }
 0x42f   : > { %3139 = vrsqrt.f32 %v4668_v30  ;;  %vm1653_vm3 = vmor %vm1651_vm2, %vm1652_vm0  ;;  %v1756_v13 = vmul.f32 %v4568_v35, %v1741_v47  ;;  %v1644_v28 = vsel %vm1643_vm5, %v4596_v42, %v1640_v8  ;;  %vm1622_vm7 = vweird.f32 %v4662_v52  ;;  %v2927_v8 = vld [vmem:[#allocation2 + $0x68] sm:$0xff]  ;;  %v2925_v47 = vld [vmem:[#allocation2 + $0x18] sm:$0xff] }
 0x430   : > { %v1617_v32 = vmul.f32 %v4662_v52, %v1616_v38  ;;  %v1674_v49 = vsel %vm4674_vm13, %v3132_v34, %v1670_v36  ;;  %v1773_v34 = vadd.f32 %v4600_v10, %v1758_v54  ;;  %v1654_v11 = vsel %vm1653_vm3, %v4614_v57, %v1650_v22 }
 0x431   : > { %1900 = vmatpush.bf16.xpose.msrb.mxu0 %v1812_v20  ;;  %3026 = vmatpush.bf16.xpose.msra.mxu2 %v1812_v20  ;;  %v1742_v4 = vmul.f32 %v1674_v49, %v4485_v0  ;;  %v1596_v0 = vmul.f32 %v4695_v60, %v4654_v16  ;;  %v1629_v25 = vsub.f32 1.5, %v1628_v19  ;;  %v1740_v9 = vmul.f32 %v1654_v11, %v4489_v31  ;;  %v2929_v19 = vld [vmem:[#allocation2 + $0x48] sm:$0xff] }
 0x432   : > { %v1618_v48 = vmul.f32 0.5, %v1617_v32  ;;  %v1811_v27 = vpack.c.bf16 %v1774_v3, %v1773_v34  ;;  %v1771_v57 = vadd.f32 %v4600_v10, %v1756_v13  ;;  %v1739_v29 = vmul.f32 %v1644_v28, %v4448_v14  ;;  %v2928_v3 = vld [vmem:[#allocation2 + $0x8] sm:$0xff]  ;;  %v5154_v28 = vld [vmem:[#allocation7_spill] sm:$0xff] }
 0x433   : > { %v1757_v39 = vmul.f32 %v4568_v35, %v1742_v4  ;;  %v1597_v41 = vmul.f32 %v4695_v60, %v1596_v0  ;;  %v1630_v40 = vmul.f32 %v4656_v37, %v1629_v25  ;;  %vm1632_vm8 = vweird.f32 %v4656_v37  ;;  %v5152_v11 = vld [vmem:[#allocation10_spill] sm:$0xff] }
 0x434   : > { %v1619_v18 = vsub.f32 1.5, %v1618_v48  ;;  %vm1621_vm9 = vweird.f32 %v4625_v59  ;;  %v1755_v31 = vmul.f32 %v4568_v35, %v1740_v9  ;;  %vm1631_vm11 = vweird.f32 %v4602_v26 }
 0x435   : > { %v4701_v50 = vpop.eup %3139  ;;  %v1772_v33 = vadd.f32 %v4600_v10, %v1757_v39  ;;  %v1598_v36 = vmul.f32 0.5, %v1597_v41  ;;  %vm1623_vm10 = vmor %vm1621_vm9, %vm1622_vm7  ;;  %v1754_v14 = vmul.f32 %v4568_v35, %v1739_v29  ;;  %vm1602_vm14 = vweird.f32 %v4695_v60  ;;  %v5153_v41 = vld [vmem:[#allocation8_spill] sm:$0xff] }
 0x436   : > { %v1606_v46 = vmul.f32 %v4701_v50, %v4668_v30  ;;  %v1620_v45 = vmul.f32 %v4662_v52, %v1619_v18  ;;  %vm1633_vm12 = vmor %vm1631_vm11, %vm1632_vm8  ;;  %v1770_v44 = vadd.f32 %v4600_v10, %v1755_v31  ;;  %vm1612_vm13 = vweird.f32 %v4701_v50  ;;  %v2930_v18 = vld [vmem:[#allocation2 + $0x40] sm:$0xff] }
 0x437   : > { %v1810_v42 = vpack.c.bf16 %v1772_v33, %v1771_v57  ;;  %v1599_v20 = vsub.f32 1.5, %v1598_v36  ;;  %v1634_v54 = vsel %vm1633_vm12, %v4656_v37, %v1630_v40  ;;  %v1769_v26 = vadd.f32 %v4600_v10, %v1754_v14  ;;  %v2932_v40 = vld [vmem:[#allocation2 + $0x10] sm:$0xff] }
 0x438   : > { %v1607_v58 = vmul.f32 %v4701_v50, %v1606_v46  ;;  %v1624_v61 = vsel %vm1623_vm10, %v4662_v52, %v1620_v45  ;;  %v1738_v52 = vmul.f32 %v1634_v54, %v4459_v15  ;;  %vm1611_vm15 = vweird.f32 %v4668_v30  ;;  %v5149_v46 = vld [vmem:[#allocation14_spill] sm:$0xff]  ;;  %v2931_v45 = vld [vmem:[#allocation2 + $0x20] sm:$0xff] }
 0x439   : > { %1901 = vmatpush.bf16.xpose.msrb.mxu0 %v1811_v27  ;;  %3027 = vmatpush.bf16.xpose.msra.mxu2 %v1811_v27  ;;  %v1737_v59 = vmul.f32 %v1624_v61, %v4497_v43  ;;  %v1600_v49 = vmul.f32 %v4695_v60, %v1599_v20  ;;  %vm1613_vm0 = vmor %vm1611_vm15, %vm1612_vm13  ;;  %v1809_v37 = vpack.c.bf16 %v1770_v44, %v1769_v26  ;;  %vm1601_vm1 = vweird.f32 %v4654_v16  ;;  %v5150_v27 = vld [vmem:[#allocation13_spill] sm:$0xff] }
 0x43a   : > { %v1608_v5 = vmul.f32 0.5, %v1607_v58  ;;  %vm1603_vm2 = vmor %vm1601_vm1, %vm1602_vm14  ;;  %v1753_v23 = vmul.f32 %v4568_v35, %v1738_v52  ;;  %v2799_v39 = vor.u32 %v5150_v27, %v5149_v46  ;;  %v5151_v58 = vld [vmem:[#allocation12_spill] sm:$0xff]  ;;  %v2783_v33 = vor.u32 %v5154_v28, %v5153_v41 }
 0x43b   : > { %v1752_v55 = vmul.f32 %v4568_v35, %v1737_v59  ;;  %v1604_v15 = vsel %vm1603_vm2, %v4695_v60, %v1600_v49  ;;  %v2791_v13 = vor.u32 %v5152_v11, %v5151_v58  ;;  %vm1977_vm3 = vcmask 916480   ;;  %v2934_v26 = vld [vmem:[#allocation2 + $0x60] sm:$0xff] }
 0x43c   : > { %v1609_v38 = vsub.f32 1.5, %v1608_v5  ;;  %v1768_v30 = vadd.f32 %v4600_v10, %v1753_v23  ;;  %v1735_v24 = vmul.f32 %v1604_v15, %v4501_v56  ;;  %v2924_v56 = vld [vmem:[#allocation2 + $0x58] sm:$0xff]  ;;  %1416 = vmatpush.bf16.msra.mxu1 %v2799_v39  ;;  %vm2566_vm4 = vcmask 1042434  }
 0x43d   : > { %v1767_v2 = vadd.f32 %v4600_v10, %v1752_v55  ;;  %v2935_v55 = vld [vmem:[#allocation2 + $0x28] sm:$0xff]  ;;  %vm2568_vm5 = vcmask 1043459   ;;  %vm2571_vm7 = vcmask 1043456  }
 0x43e   : > { %v1610_v32 = vmul.f32 %v4701_v50, %v1609_v38  ;;  %v1750_v4 = vmul.f32 %v4568_v35, %v1735_v24  ;;  %v2933_v38 = vld [vmem:[#allocation2 + $0x38] sm:$0xff] }
 0x43f   : > { %v1808_v34 = vpack.c.bf16 %v1768_v30, %v1767_v2 }
 0x440   : > { %v1614_v43 = vsel %vm1613_vm0, %v4701_v50, %v1610_v32  ;;  %v1765_v48 = vadd.f32 %v4600_v10, %v1750_v4  ;;  %v2922_v50 = vld [vmem:[#allocation2 + $0x30] sm:$0xff]  ;;  %1417 = vmatpush.bf16.msra.mxu1 %v2791_v13 }
 0x441   : > { %1902 = vmatpush.bf16.xpose.msrb.mxu0 %v1810_v42  ;;  %3028 = vmatpush.bf16.xpose.msra.mxu2 %v1810_v42  ;;  %v1736_v63 = vmul.f32 %v1614_v43, %v4509_v6  ;;  %v2923_v6 = vld [vmem:[#allocation2] sm:$0xff] }
 0x443   : > { %v1751_v16 = vmul.f32 %v4568_v35, %v1736_v63  ;;  %v2926_v35 = vld [vmem:[#allocation2 + $0x50] sm:$0xff] }
 0x444   : > { %1418 = vmatpush.bf16.msra.mxu1 %v2783_v33 }
 0x445   : > { %v1766_v22 = vadd.f32 %v4600_v10, %v1751_v16 }
 0x447   : > { %v1807_v60 = vpack.c.bf16 %v1766_v22, %v1765_v48  ;;  %2807 = vmatmul.msk.bf16.vlgmr.msra.gmra.mxu1 %vm1345_vm6, %v4386_v53 }
 0x449   : > { %1903 = vmatpush.bf16.xpose.msrb.mxu0 %v1809_v37  ;;  %3029 = vmatpush.bf16.xpose.msra.mxu2 %v1809_v37 }
 0x451   : > { %1904 = vmatpush.bf16.xpose.msrb.mxu0 %v1808_v34  ;;  %3030 = vmatpush.bf16.xpose.msra.mxu2 %v1808_v34 }
 0x457   : > { %2808 = vmatmul.msk.bf16.gmra.mxu1 %vm1345_vm6, %v4391_v51 }
 0x459   : > { %1905 = vmatpush.bf16.xpose.msrb.mxu0 %v1807_v60  ;;  %3031 = vmatpush.bf16.xpose.msra.mxu2 %v1807_v60 }
 0x460   : > { %1906 = vmatmul.bf16.vlgmr.msrb.gmra.mxu0 %v2922_v50  ;;  %1931 = vmatmul.bf16.vlgmr.msra.gmra.mxu2 %v2927_v8 }
 0x467   : > { %2809 = vmatmul.msk.bf16.gmra.mxu1 %vm1345_vm6, %v4396_v21 }
 0x470   : > { %1911 = vmatmul.bf16.gmra.mxu0 %v2923_v6  ;;  %1936 = vmatmul.bf16.gmra.mxu2 %v2928_v3 }
 0x477   : > { %2810 = vmatmul.msk.bf16.gmra.mxu1 %vm1345_vm6, %v4401_v12 }
 0x480   : > { %1916 = vmatmul.bf16.gmra.mxu0 %v2924_v56  ;;  %1941 = vmatmul.bf16.gmra.mxu2 %v2929_v19 }
 0x487   : > { %2811 = vmatmul.msk.bf16.gmra.mxu1 %vm1345_vm6, %v4406_v1 }
 0x490   : > { %1921 = vmatmul.bf16.gmra.mxu0 %v2925_v47  ;;  %1946 = vmatmul.bf16.gmra.mxu2 %v2930_v18 }
 0x497   : > { %2812 = vmatmul.msk.bf16.gmra.mxu1 %vm1345_vm6, %v4411_v7 }
 0x4a0   : > { %1926 = vmatmul.bf16.gmra.mxu0 %v2926_v35  ;;  %1951 = vmatmul.bf16.gmra.mxu2 %v2931_v45 }
 0x4a7   : > { %2813 = vmatmul.msk.bf16.gmra.mxu1 %vm1345_vm6, %v4416_v17  ;;  %vm2564_vm6 = vcmask 1041409  }
 0x4b0   : > { %1956 = vmatmul.bf16.gmra.mxu2 %v2932_v40 }
 0x4c0   : > { %1961 = vmatmul.bf16.gmra.mxu2 %v2933_v38 }
 0x4c4   : > { %v4813_v23 = vpop.f32.mrf.mxu1 }
 0x4cc   : > { %v4817_v2 = vpop.f32.mrf.mxu1 }
 0x4d0   : > { %1966 = vmatmul.bf16.gmra.mxu2 %v2934_v26 }
 0x4d4   : > { %v4821_v30 = vpop.f32.mrf.mxu1 }
 0x4dc   : > { %v4823_v7 = vpop.f32.mrf.mxu1 }
 0x4dd   : > { %v4755_v10 = vpop.f32.mrf.mxu0 }
 0x4e0   : > { %1971 = vmatmul.bf16.gmra.mxu2 %v2935_v55 }
 0x4e3   : > { %v4773_v57 = vpop.f32.mrf.mxu2 }
 0x4e4   : > { %v2008_v51 = vsel %vm1977_vm3, %v4773_v57, -inf  ;;  %v4831_v50 = vpop.f32.mrf.mxu1 }
 0x4e5   : > { %v4757_v0 = vpop.f32.mrf.mxu0 }
 0x4eb   : > { %v4779_v36 = vpop.f32.mrf.mxu2 }
 0x4ec   : > { %v2011_v21 = vsel %vm1977_vm3, %v4779_v36, -inf  ;;  %v4841_v27 = vpop.f32.mrf.mxu1 }
 0x4ed   : > { %v4763_v25 = vpop.f32.mrf.mxu0 }
 0x4f3   : > { %v4785_v14 = vpop.f32.mrf.mxu2 }
 0x4f4   : > { %v2014_v37 = vsel %vm1977_vm3, %v4785_v14, -inf }
 0x4f5   : > { %v4769_v9 = vpop.f32.mrf.mxu0 }
 0x4fb   : > { %v4790_v44 = vpop.f32.mrf.mxu2 }
 0x4fc   : > { %v2017_v32 = vsel %vm1977_vm3, %v4790_v44, -inf }
 0x4fd   : > { %v4771_v5 = vpop.f32.mrf.mxu0 }
 0x503   : > { %v4799_v49 = vpop.f32.mrf.mxu2 }
 0x504   : > { %v2020_v12 = vsel %vm1977_vm3, %v4799_v49, -inf }
 0x505   : > { %v4777_v29 = vpop.f32.mrf.mxu0 }
 0x50b   : > { %v4811_v43 = vpop.f32.mrf.mxu2 }
 0x50c   : > { %v2023_v19 = vsel %vm1977_vm3, %v4811_v43, -inf }
 0x50d   : > { %v1922_v42 = vpop.f32.mrf.mxu0 }
 0x50e   : > { %v1996_v53 = vsel %vm1977_vm3, %v1922_v42, -inf }
 0x50f   : > { %1997 = vmax.xlane.f32.xlu1 %v1996_v53 }
 0x513   : > { %v4815_v15 = vpop.f32.mrf.mxu2 }
 0x514   : > { %v2026_v13 = vsel %vm1977_vm3, %v4815_v15, -inf }
 0x515   : > { %v1924_v31 = vpop.f32.mrf.mxu0 }
 0x516   : > { %v1999_v61 = vsel %vm1977_vm3, %v1924_v31, -inf }
 0x517   : > { %2000 = vmax.xlane.f32.xlu2 %v1999_v61 }
 0x51b   : > { %v4819_v63 = vpop.f32.mrf.mxu2 }
 0x51d   : > { %v1927_v20 = vpop.f32.mrf.mxu0 }
 0x51e   : > { %v2002_v54 = vsel %vm1977_vm3, %v1927_v20, -inf }
 0x51f   : > { %2009 = vmax.xlane.f32.xlu2 %v2008_v51  ;;  %2003 = vmax.xlane.f32.xlu0 %v2002_v54 }
 0x523   : > { %v4825_v16 = vpop.f32.mrf.mxu2 }
 0x525   : > { %v1929_v59 = vpop.f32.mrf.mxu0 }
 0x526   : > { %v2005_v52 = vsel %vm1977_vm3, %v1929_v59, -inf }
 0x527   : > { %2012 = vmax.xlane.f32.xlu0 %v2011_v21  ;;  %2006 = vmax.xlane.f32.xlu1 %v2005_v52 }
 0x528   : > { %2018 = vmax.xlane.f32.xlu2 %v2017_v32 }
 0x52b   : > { %v4833_v56 = vpop.f32.mrf.mxu2 }
 0x52f   : > { %2015 = vmax.xlane.f32.xlu1 %v2014_v37 }
 0x530   : > { %2021 = vmax.xlane.f32.xlu2 %v2020_v12 }
 0x533   : > { %v4846_v33 = vpop.f32.mrf.mxu2 }
 0x582   : > { %v1998_v1 = vpop.xlane.xlu1 %1997 }
 0x583   : > { %v2068_v24 = vsub.f32 %v1922_v42, %v1998_v1 }
 0x585   : > { %v2102_v34 = vmul.f32 1.442695, %v2068_v24 }
 0x587   : > { %3141 = vpow2.f32 %v2102_v34 }
 0x58a   : > { %v2001_v17 = vpop.xlane.xlu2 %2000 }
 0x58b   : > { %v2069_v4 = vsub.f32 %v1924_v31, %v2001_v17 }
 0x58d   : > { %v4827_v22 = vpop.eup %3141  ;;  %v2104_v48 = vmul.f32 1.442695, %v2069_v4 }
 0x58e   : > { %v2164_v60 = vsel %vm1977_vm3, %v4827_v22, 0.0 }
 0x58f   : > { %3143 = vpow2.f32 %v2104_v48  ;;  %2165 = vadd.xlane.f32.xlu0 %v2164_v60 }
 0x592   : > { %v2004_v6 = vpop.xlane.xlu0 %2003  ;;  %v2010_v46 = vpop.xlane.xlu2 %2009 }
 0x593   : > { %v2070_v8 = vsub.f32 %v1927_v20, %v2004_v6  ;;  %v2072_v40 = vsub.f32 %v4773_v57, %v2010_v46 }
 0x595   : > { %v4835_v3 = vpop.eup %3143  ;;  %v2106_v47 = vmul.f32 1.442695, %v2070_v8  ;;  %v2110_v31 = vmul.f32 1.442695, %v2072_v40 }
 0x596   : > { %v2167_v35 = vsel %vm1977_vm3, %v4835_v3, 0.0 }
 0x597   : > { %2024 = vmax.xlane.f32.xlu0 %v2023_v19  ;;  %2168 = vadd.xlane.f32.xlu1 %v2167_v35  ;;  %3145 = vpow2.f32 %v2106_v47 }
 0x59a   : > { %v2013_v39 = vpop.xlane.xlu0 %2012  ;;  %v2007_v18 = vpop.xlane.xlu1 %2006 }
 0x59b   : > { %v2073_v58 = vsub.f32 %v4779_v36, %v2013_v39  ;;  %v2071_v11 = vsub.f32 %v1929_v59, %v2007_v18  ;;  %v4853_v36 = vpop.f32.mrf.mxu1  ;;  %v2019_v53 = vpop.xlane.xlu2 %2018  ;;  %v2029_v59 = vsel %vm1977_vm3, %v4819_v63, -inf  ;;  %v2038_v39 = vsel %vm1977_vm3, %v4846_v33, -inf }
 0x59c   : > { %v2075_v21 = vsub.f32 %v4790_v44, %v2019_v53  ;;  %v2032_v44 = vsel %vm1977_vm3, %v4825_v16, -inf }
 0x59d   : > { %v2112_v41 = vmul.f32 1.442695, %v2073_v58  ;;  %v2108_v28 = vmul.f32 1.442695, %v2071_v11  ;;  %v4848_v45 = vpop.eup %3145 }
 0x59e   : > { %v2170_v42 = vsel %vm1977_vm3, %v4848_v45, 0.0  ;;  %v2116_v52 = vmul.f32 1.442695, %v2075_v21 }
 0x59f   : > { %3147 = vpow2.f32 %v2112_v41  ;;  %2027 = vmax.xlane.f32.xlu0 %v2026_v13  ;;  %2171 = vadd.xlane.f32.xlu1 %v2170_v42  ;;  %v1981_v41 = vsel %vm1977_vm3, %v4757_v0, -inf }
 0x5a0   : > { %3149 = vpow2.f32 %v2108_v28 }
 0x5a1   : > { %3151 = vpow2.f32 %v2110_v31  ;;  %v1279_v31 = vperm.slane %v5140_v62, 0 }
 0x5a2   : > { %v2016_v38 = vpop.xlane.xlu1 %2015 }
 0x5a3   : > { %v2074_v61 = vsub.f32 %v4785_v14, %v2016_v38  ;;  %v4867_v14 = vpop.f32.mrf.mxu2  ;;  %v1437_v26 = vpop.f32.mrf.mxu1  ;;  %v1987_v38 = vsel %vm1977_vm3, %v4769_v9, -inf }
 0x5a4   : > { %v2022_v37 = vpop.xlane.xlu2 %2021  ;;  %v2041_v6 = vsel %vm1977_vm3, %v4867_v14, -inf }
 0x5a5   : > { %v4856_v51 = vpop.eup %3147  ;;  %v2114_v20 = vmul.f32 1.442695, %v2074_v61  ;;  %v2076_v24 = vsub.f32 %v4799_v49, %v2022_v37  ;;  %v2035_v49 = vsel %vm1977_vm3, %v4833_v56, -inf }
 0x5a6   : > { %v4858_v54 = vpop.eup %3149  ;;  %v2179_v57 = vsel %vm1977_vm3, %v4856_v51, 0.0 }
 0x5a7   : > { %3153 = vpow2.f32 %v2114_v20  ;;  %2180 = vadd.xlane.f32.xlu0 %v2179_v57  ;;  %v2173_v32 = vsel %vm1977_vm3, %v4858_v54, 0.0  ;;  %2030 = vmax.xlane.f32.xlu1 %v2029_v59  ;;  %v4869_v12 = vpop.eup %3151  ;;  %v2118_v48 = vmul.f32 1.442695, %v2076_v24  ;;  %v1436_v24 = vadd.f32 %v4853_v36, %v1279_v31 }
 0x5a8   : > { %2174 = vadd.xlane.f32.xlu2 %v2173_v32  ;;  %3155 = vpow2.f32 %v2116_v52  ;;  %v2176_v34 = vsel %vm1977_vm3, %v4869_v12, 0.0  ;;  %v1433_v36 = vadd.f32 %v4841_v27, %v1279_v31 }
 0x5a9   : > { %3157 = vpow2.f32 %v2118_v48 }
 0x5ab   : > { %v1440_v17 = vpop.f32.mrf.mxu1  ;;  %v4880_v4 = vpop.f32.mrf.mxu2 }
 0x5ac   : > { %v2044_v46 = vsel %vm1977_vm3, %v4880_v4, -inf }
 0x5ad   : > { %v4871_v55 = vpop.eup %3153 }
 0x5ae   : > { %v2182_v1 = vsel %vm1977_vm3, %v4871_v55, 0.0  ;;  %v4882_v60 = vpop.eup %3155 }
 0x5af   : > { %2183 = vadd.xlane.f32.xlu0 %v2182_v1  ;;  %2033 = vmax.xlane.f32.xlu1 %v2032_v44  ;;  %v2185_v8 = vsel %vm1977_vm3, %v4882_v60, 0.0  ;;  %v4892_v35 = vpop.eup %3157  ;;  %v1441_v1 = vadd.f32 %v1440_v17, %v1279_v31  ;;  %v1428_v17 = vadd.f32 %v4823_v7, %v1279_v31 }
 0x5b0   : > { %2177 = vadd.xlane.f32.xlu2 %v2176_v34  ;;  %v2188_v18 = vsel %vm1977_vm3, %v4892_v35, 0.0  ;;  %v1438_v34 = vadd.f32 %v1437_v26, %v1279_v31 }
 0x5b3   : > { %v1442_v47 = vpop.f32.mrf.mxu1  ;;  %v4890_v19 = vpop.f32.mrf.mxu2 }
 0x5b4   : > { %v2047_v11 = vsel %vm1977_vm3, %v4890_v19, -inf  ;;  %v1443_v62 = vadd.f32 %v1442_v47, %v1279_v31  ;;  %v1431_v47 = vadd.f32 %v4831_v50, %v1279_v31 }
 0x5b6   : > { %v2304_v48 = vpack.c.bf16 %v1443_v62, %v1441_v1  ;;  %v2302_v26 = vpack.c.bf16 %v1433_v36, %v1431_v47 }
 0x5b7   : > { %2042 = vmax.xlane.f32.xlu0 %v2041_v6  ;;  %2186 = vadd.xlane.f32.xlu1 %v2185_v8  ;;  %v2303_v6 = vpack.c.bf16 %v1438_v34, %v1436_v24  ;;  %v1993_v8 = vsel %vm1977_vm3, %v4777_v29, -inf }
 0x5b8   : > { %2036 = vmax.xlane.f32.xlu2 %v2035_v49  ;;  %v1426_v49 = vadd.f32 %v4821_v30, %v1279_v31 }
 0x5bb   : > { %v1445_v58 = vpop.f32.mrf.mxu1  ;;  %v4902_v13 = vpop.f32.mrf.mxu2 }
 0x5bc   : > { %v2050_v40 = vsel %vm1977_vm3, %v4902_v13, -inf  ;;  %v1446_v21 = vadd.f32 %v1445_v58, %v1279_v31 }
 0x5bf   : > { %2045 = vmax.xlane.f32.xlu0 %v2044_v46  ;;  %2189 = vadd.xlane.f32.xlu1 %v2188_v18  ;;  %v2301_v46 = vpack.c.bf16 %v1428_v17, %v1426_v49  ;;  %v1423_v18 = vadd.f32 %v4817_v2, %v1279_v31 }
 0x5c0   : > { %2039 = vmax.xlane.f32.xlu2 %v2038_v39  ;;  %v1421_v39 = vadd.f32 %v4813_v23, %v1279_v31 }
 0x5c2   : > { %v2300_v58 = vpack.c.bf16 %v1423_v18, %v1421_v39 }
 0x5c3   : > { %v1447_v28 = vpop.f32.mrf.mxu1  ;;  %v4908_v42 = vpop.f32.mrf.mxu2 }
 0x5c4   : > { %v1448_v59 = vadd.f32 %v1447_v28, %v1279_v31  ;;  %v2053_v47 = vsel %vm1977_vm3, %v4908_v42, -inf }
 0x5c6   : > { %v2305_v44 = vpack.c.bf16 %v1448_v59, %v1446_v21 }
 0x5c7   : > { %1982 = vmax.xlane.f32.xlu0 %v1981_v41  ;;  %2048 = vmax.xlane.f32.xlu1 %v2047_v11 }
 0x5cb   : > { %v1450_v53 = vpop.f32.mrf.mxu1  ;;  %v4913_v57 = vpop.f32.mrf.mxu2 }
 0x5cc   : > { %v1451_v61 = vadd.f32 %v1450_v53, %v1279_v31  ;;  %v2056_v37 = vsel %vm1977_vm3, %v4913_v57, -inf }
 0x5cf   : > { %2051 = vmax.xlane.f32.xlu0 %v2050_v40 }
 0x5d3   : > { %v1452_v20 = vpop.f32.mrf.mxu1 }
 0x5d4   : > { %v1453_v32 = vadd.f32 %v1452_v20, %v1279_v31 }
 0x5d6   : > { %v2306_v52 = vpack.c.bf16 %v1453_v32, %v1451_v61 }
 0x5d7   : > { %1988 = vmax.xlane.f32.xlu0 %v1987_v38 }
 0x5d8   : > { %3032 = vmatpush.bf16.msra.mxu3 %v2306_v52  ;;  %2350 = vmatpush.bf16.msrb.mxu1 %v2306_v52 }
 0x5dc   : > { %3033 = vmatpush.bf16.msra.mxu3 %v2305_v44  ;;  %2351 = vmatpush.bf16.msrb.mxu1 %v2305_v44 }
 0x5df   : > { %2057 = vmax.xlane.f32.xlu0 %v2056_v37  ;;  %v1978_v37 = vsel %vm1977_vm3, %v4755_v10, -inf }
 0x5e0   : > { %3034 = vmatpush.bf16.msra.mxu3 %v2304_v48  ;;  %2352 = vmatpush.bf16.msrb.mxu1 %v2304_v48 }
 0x5e4   : > { %3035 = vmatpush.bf16.msra.mxu3 %v2303_v6  ;;  %2353 = vmatpush.bf16.msrb.mxu1 %v2303_v6 }
 0x5e7   : > { %1994 = vmax.xlane.f32.xlu0 %v1993_v8 }
 0x5e8   : > { %3036 = vmatpush.bf16.msra.mxu3 %v2302_v26  ;;  %2354 = vmatpush.bf16.msrb.mxu1 %v2302_v26 }
 0x5ec   : > { %3037 = vmatpush.bf16.msra.mxu3 %v2301_v46  ;;  %2355 = vmatpush.bf16.msrb.mxu1 %v2301_v46 }
 0x5f0   : > { %3038 = vmatpush.bf16.msra.mxu3 %v2300_v58  ;;  %2356 = vmatpush.bf16.msrb.mxu1 %v2300_v58  ;;  %v1984_v58 = vsel %vm1977_vm3, %v4763_v25, -inf }
 0x602   : > { %v2166_v30 = vpop.xlane.xlu0 %2165 }
 0x603   : > { %3159 = vrcp.f32 %v2166_v30 }
 0x609   : > { %v3160_v41 = vpop.eup %3159 }
 0x60a   : > { %v2025_v7 = vpop.xlane.xlu0 %2024  ;;  %v2169_v11 = vpop.xlane.xlu1 %2168  ;;  %v2264_v23 = vmul.f32 %v3160_v41, %v4827_v22 }
 0x60b   : > { %v2077_v50 = vsub.f32 %v4811_v43, %v2025_v7  ;;  %3161 = vrcp.f32 %v2169_v11 }
 0x60d   : > { %v2120_v27 = vmul.f32 1.442695, %v2077_v50 }
 0x60f   : > { %3163 = vpow2.f32 %v2120_v27 }
 0x611   : > { %v3162_v28 = vpop.eup %3161 }
 0x612   : > { %v2028_v40 = vpop.xlane.xlu0 %2027  ;;  %v2265_v2 = vmul.f32 %v3162_v28, %v4835_v3  ;;  %v2172_v31 = vpop.xlane.xlu1 %2171 }
 0x613   : > { %v2078_v53 = vsub.f32 %v4815_v15, %v2028_v40 }
 0x614   : > { %v2289_v38 = vpack.c.bf16 %v2265_v2, %v2264_v23  ;;  %v4965_v23 = vpop.f32.mrf.mxu2 }
 0x615   : > { %v4930_v61 = vpop.eup %3163  ;;  %v2122_v20 = vmul.f32 1.442695, %v2078_v53 }
 0x616   : > { %2873 = vmatmul.msk.bf16.vlgmr.msra.gmra.mxu3 %vm1977_vm3, %v2289_v38  ;;  %v2191_v43 = vsel %vm1977_vm3, %v4930_v61, 0.0 }
 0x617   : > { %3165 = vpow2.f32 %v2122_v20  ;;  %2192 = vadd.xlane.f32.xlu2 %v2191_v43 }
 0x618   : > { %3167 = vrcp.f32 %v2172_v31 }
 0x61a   : > { %v2181_v21 = vpop.xlane.xlu0 %2180  ;;  %v2031_v22 = vpop.xlane.xlu1 %2030 }
 0x61b   : > { %v2175_v59 = vpop.xlane.xlu2 %2174  ;;  %v2079_v3 = vsub.f32 %v4819_v63, %v2031_v22 }
 0x61c   : > { %3169 = vrcp.f32 %v2175_v59 }
 0x61d   : > { %v4936_v15 = vpop.eup %3165  ;;  %v2124_v32 = vmul.f32 1.442695, %v2079_v3 }
 0x61e   : > { %v2194_v52 = vsel %vm1977_vm3, %v4936_v15, 0.0  ;;  %v3168_v44 = vpop.eup %3167 }
 0x61f   : > { %2195 = vadd.xlane.f32.xlu1 %v2194_v52  ;;  %1979 = vmax.xlane.f32.xlu2 %v1978_v37  ;;  %3171 = vpow2.f32 %v2124_v32  ;;  %v2266_v48 = vmul.f32 %v3168_v44, %v4848_v45  ;;  %v1990_v44 = vsel %vm1977_vm3, %v4771_v5, -inf }
 0x622   : > { %v3170_v1 = vpop.eup %3169  ;;  %v2184_v62 = vpop.xlane.xlu0 %2183 }
 0x623   : > { %v2178_v24 = vpop.xlane.xlu2 %2177  ;;  %v2034_v34 = vpop.xlane.xlu1 %2033  ;;  %v2267_v63 = vmul.f32 %v3170_v1, %v4858_v54 }
 0x624   : > { %v2080_v6 = vsub.f32 %v4825_v16, %v2034_v34  ;;  %3173 = vrcp.f32 %v2178_v24 }
 0x625   : > { %v2290_v8 = vpack.c.bf16 %v2267_v63, %v2266_v48  ;;  %v4945_v49 = vpop.eup %3171 }
 0x626   : > { %v2126_v17 = vmul.f32 1.442695, %v2080_v6  ;;  %v2197_v36 = vsel %vm1977_vm3, %v4945_v49, 0.0 }
 0x627   : > { %2874 = vmatmul.msk.bf16.gmra.mxu3 %vm1977_vm3, %v2290_v8  ;;  %2054 = vmax.xlane.f32.xlu1 %v2053_v47 }
 0x628   : > { %3175 = vpow2.f32 %v2126_v17  ;;  %2198 = vadd.xlane.f32.xlu2 %v2197_v36 }
 0x629   : > { %3177 = vrcp.f32 %v2181_v21 }
 0x62a   : > { %v2043_v45 = vpop.xlane.xlu0 %2042  ;;  %v3174_v46 = vpop.eup %3173 }
 0x62b   : > { %v2037_v54 = vpop.xlane.xlu2 %2036  ;;  %v2187_v16 = vpop.xlane.xlu1 %2186  ;;  %v2268_v11 = vmul.f32 %v3174_v46, %v4869_v12  ;;  %v2083_v38 = vsub.f32 %v4867_v14, %v2043_v45 }
 0x62c   : > { %v2081_v26 = vsub.f32 %v4833_v56, %v2037_v54 }
 0x62e   : > { %v4953_v39 = vpop.eup %3175  ;;  %v2128_v18 = vmul.f32 1.442695, %v2081_v26 }
 0x62f   : > { %v2200_v30 = vsel %vm1977_vm3, %v4953_v39, 0.0  ;;  %v3178_v7 = vpop.eup %3177 }
 0x630   : > { %3179 = vpow2.f32 %v2128_v18  ;;  %1985 = vmax.xlane.f32.xlu2 %v1984_v58  ;;  %2201 = vadd.xlane.f32.xlu1 %v2200_v30  ;;  %v2269_v28 = vmul.f32 %v3178_v7, %v4856_v51  ;;  %v2059_v51 = vsel %vm1977_vm3, %v4965_v23, -inf }
 0x631   : > { %3181 = vrcp.f32 %v2187_v16 }
 0x632   : > { %v2046_v50 = vpop.xlane.xlu0 %2045  ;;  %v2291_v53 = vpack.c.bf16 %v2269_v28, %v2268_v11 }
 0x633   : > { %v2040_v27 = vpop.xlane.xlu2 %2039  ;;  %v2084_v56 = vsub.f32 %v4880_v4, %v2046_v50  ;;  %v4961_v41 = vpop.xlane.xlu1 %2189 }
 0x634   : > { %v2082_v40 = vsub.f32 %v4846_v33, %v2040_v27  ;;  %v2132_v33 = vmul.f32 1.442695, %v2083_v38 }
 0x635   : > { %v2134_v2 = vmul.f32 1.442695, %v2084_v56 }
 0x636   : > { %v4967_v31 = vpop.eup %3179  ;;  %v2130_v12 = vmul.f32 1.442695, %v2082_v40 }
 0x637   : > { %3183 = vpow2.f32 %v2134_v2  ;;  %2875 = vmatmul.msk.bf16.gmra.mxu3 %vm1977_vm3, %v2291_v53  ;;  %v2203_v4 = vsel %vm1977_vm3, %v4967_v31, 0.0  ;;  %v3182_v21 = vpop.eup %3181 }
 0x638   : > { %3185 = vpow2.f32 %v2130_v12  ;;  %2204 = vadd.xlane.f32.xlu2 %v2203_v4  ;;  %2060 = vmax.xlane.f32.xlu1 %v2059_v51 }
 0x639   : > { %3187 = vrcp.f32 %v2184_v62 }
 0x63a   : > { %v1983_v20 = vpop.xlane.xlu0 %1982  ;;  %3189 = vpow2.f32 %v2132_v33 }
 0x63b   : > { %v2063_v43 = vsub.f32 %v4757_v0, %v1983_v20  ;;  %v2049_v14 = vpop.xlane.xlu1 %2048 }
 0x63c   : > { %v2085_v59 = vsub.f32 %v4890_v19, %v2049_v14  ;;  %v2271_v19 = vmul.f32 %v3182_v21, %v4882_v60 }
 0x63d   : > { %v4977_v22 = vpop.eup %3183  ;;  %v2092_v3 = vmul.f32 1.442695, %v2063_v43 }
 0x63e   : > { %v4979_v32 = vpop.eup %3185  ;;  %v2136_v52 = vmul.f32 1.442695, %v2085_v59  ;;  %v2212_v37 = vsel %vm1977_vm3, %v4977_v22, 0.0 }
 0x63f   : > { %3191 = vpow2.f32 %v2092_v3  ;;  %2213 = vadd.xlane.f32.xlu0 %v2212_v37  ;;  %v2206_v0 = vsel %vm1977_vm3, %v4979_v32, 0.0  ;;  %v3188_v1 = vpop.eup %3187 }
 0x640   : > { %3193 = vpow2.f32 %v2136_v52  ;;  %1991 = vmax.xlane.f32.xlu2 %v1990_v44  ;;  %2207 = vadd.xlane.f32.xlu1 %v2206_v0  ;;  %v2270_v34 = vmul.f32 %v3188_v1, %v4871_v55  ;;  %v4990_v48 = vpop.eup %3189  ;;  %v2435_v44 = vld [vmem:[#allocation3 + $0x78] sm:$0xff] }
 0x641   : > { %v2209_v60 = vsel %vm1977_vm3, %v4990_v48, 0.0 }
 0x642   : > { %v2052_v62 = vpop.xlane.xlu0 %2051  ;;  %v2292_v8 = vpack.c.bf16 %v2271_v19, %v2270_v34 }
 0x643   : > { %v2086_v24 = vsub.f32 %v4902_v13, %v2052_v62 }
 0x645   : > { %v4992_v63 = vpop.eup %3191  ;;  %v2138_v6 = vmul.f32 1.442695, %v2086_v24 }
 0x646   : > { %v4994_v17 = vpop.eup %3193  ;;  %v2149_v47 = vsel %vm1977_vm3, %v4992_v63, 0.0 }
 0x647   : > { %3195 = vpow2.f32 %v2138_v6  ;;  %2876 = vmatmul.msk.bf16.gmra.mxu3 %vm1977_vm3, %v2292_v8  ;;  %2150 = vadd.xlane.f32.xlu0 %v2149_v47  ;;  %v2215_v55 = vsel %vm1977_vm3, %v4994_v17, 0.0 }
 0x648   : > { %2210 = vadd.xlane.f32.xlu2 %v2209_v60  ;;  %2216 = vadd.xlane.f32.xlu1 %v2215_v55 }
 0x64a   : > { %v1989_v13 = vpop.xlane.xlu0 %1988 }
 0x64b   : > { %v2065_v36 = vsub.f32 %v4769_v9, %v1989_v13 }
 0x64d   : > { %v5004_v45 = vpop.eup %3195  ;;  %v2096_v54 = vmul.f32 1.442695, %v2065_v36 }
 0x64e   : > { %v2218_v16 = vsel %vm1977_vm3, %v5004_v45, 0.0 }
 0x64f   : > { %3197 = vpow2.f32 %v2096_v54 }
 0x650   : > { %2219 = vadd.xlane.f32.xlu1 %v2218_v16  ;;  %3199 = vrcp.f32 %v4961_v41 }
 0x652   : > { %v2058_v40 = vpop.xlane.xlu0 %2057 }
 0x655   : > { %v5008_v26 = vpop.eup %3197 }
 0x656   : > { %v2155_v46 = vsel %vm1977_vm3, %v5008_v26, 0.0  ;;  %v3200_v58 = vpop.eup %3199 }
 0x657   : > { %v2272_v11 = vmul.f32 %v3200_v58, %v4892_v35  ;;  %v2088_v35 = vsub.f32 %v4913_v57, %v2058_v40 }
 0x658   : > { %2156 = vadd.xlane.f32.xlu1 %v2155_v46  ;;  %v2437_v46 = vld [vmem:[#allocation3 + $0x50] sm:$0xff] }
 0x659   : > { %v2142_v51 = vmul.f32 1.442695, %v2088_v35 }
 0x65a   : > { %v1995_v43 = vpop.xlane.xlu0 %1994 }
 0x65b   : > { %v2067_v52 = vsub.f32 %v4777_v29, %v1995_v43  ;;  %v2439_v43 = vld [vmem:[#allocation3 + $0x88] sm:$0xff] }
 0x65d   : > { %v2100_v19 = vmul.f32 1.442695, %v2067_v52 }
 0x68a   : > { %v2193_v18 = vpop.xlane.xlu2 %2192 }
 0x68b   : > { %3201 = vrcp.f32 %v2193_v18 }
 0x691   : > { %v3202_v9 = vpop.eup %3201 }
 0x692   : > { %v1980_v30 = vpop.xlane.xlu2 %1979  ;;  %v2196_v7 = vpop.xlane.xlu1 %2195  ;;  %v2273_v50 = vmul.f32 %v3202_v9, %v4930_v61 }
 0x693   : > { %v2062_v27 = vsub.f32 %v4755_v10, %v1980_v30 }
 0x694   : > { %v2293_v56 = vpack.c.bf16 %v2273_v50, %v2272_v11 }
 0x695   : > { %v2090_v28 = vmul.f32 1.442695, %v2062_v27 }
 0x696   : > { %2877 = vmatmul.msk.bf16.gmra.mxu3 %vm1977_vm3, %v2293_v56 }
 0x697   : > { %3203 = vpow2.f32 %v2090_v28 }
 0x698   : > { %3205 = vrcp.f32 %v2196_v7 }
 0x699   : > { %v5017_v2 = vpop.f32.mrf.mxu3 }
 0x69a   : > { %v2055_v41 = vpop.xlane.xlu1 %2054 }
 0x69b   : > { %v2199_v53 = vpop.xlane.xlu2 %2198  ;;  %v2087_v38 = vsub.f32 %v4908_v42, %v2055_v41 }
 0x69c   : > { %3207 = vrcp.f32 %v2199_v53 }
 0x69d   : > { %v5020_v12 = vpop.eup %3203  ;;  %v2140_v61 = vmul.f32 1.442695, %v2087_v38 }
 0x69e   : > { %v2146_v10 = vsel %vm1977_vm3, %v5020_v12, 0.0  ;;  %v3206_v4 = vpop.eup %3205 }
 0x69f   : > { %3209 = vpow2.f32 %v2140_v61  ;;  %2147 = vadd.xlane.f32.xlu2 %v2146_v10  ;;  %v2274_v42 = vmul.f32 %v3206_v4, %v4936_v15  ;;  %v2436_v15 = vld [vmem:[#allocation3 + $0x40] sm:$0xff] }
 0x6a0   : > { %3211 = vpow2.f32 %v2142_v51 }
 0x6a1   : > { %v2375_v33 = vpop.f32.mrf.mxu3 }
 0x6a2   : > { %v3208_v20 = vpop.eup %3207 }
 0x6a3   : > { %v1986_v14 = vpop.xlane.xlu2 %1985  ;;  %v2202_v21 = vpop.xlane.xlu1 %2201  ;;  %v2275_v59 = vmul.f32 %v3208_v20, %v4945_v49  ;;  %v2463_v49 = vsub.f32 %v2435_v44, %v2375_v33 }
 0x6a4   : > { %v2064_v3 = vsub.f32 %v4763_v25, %v1986_v14 }
 0x6a5   : > { %v5028_v57 = vpop.eup %3209  ;;  %v2294_v37 = vpack.c.bf16 %v2275_v59, %v2274_v42  ;;  %v2491_v8 = vmul.f32 %v2463_v49, %v2463_v49 }
 0x6a6   : > { %v2094_v0 = vmul.f32 1.442695, %v2064_v3  ;;  %v2221_v1 = vsel %vm1977_vm3, %v5028_v57, 0.0  ;;  %v5034_v62 = vpop.eup %3211 }
 0x6a7   : > { %2878 = vmatmul.msk.bf16.gmra.mxu3 %vm1977_vm3, %v2294_v37  ;;  %2222 = vadd.xlane.f32.xlu2 %v2221_v1  ;;  %v2224_v13 = vsel %vm1977_vm3, %v5034_v62, 0.0 }
 0x6a8   : > { %3213 = vpow2.f32 %v2094_v0 }
 0x6a9   : > { %3215 = vrcp.f32 %v2202_v21 }
 0x6aa   : > { %v2378_v25 = vpop.f32.mrf.mxu3 }
 0x6ab   : > { %v2464_v24 = vsub.f32 %v2436_v15, %v2378_v25  ;;  %v2205_v34 = vpop.xlane.xlu2 %2204  ;;  %v2061_v29 = vpop.xlane.xlu1 %2060  ;;  %v2440_v15 = vld [vmem:[#allocation3 + $0xa0] sm:$0xff] }
 0x6ac   : > { %3217 = vrcp.f32 %v2205_v34  ;;  %v2089_v6 = vsub.f32 %v4965_v23, %v2061_v29 }
 0x6ad   : > { %3219 = vpow2.f32 %v2100_v19  ;;  %v2492_v47 = vmul.f32 %v2464_v24, %v2464_v24 }
 0x6ae   : > { %v5037_v60 = vpop.eup %3213  ;;  %v2144_v55 = vmul.f32 1.442695, %v2089_v6 }
 0x6af   : > { %v2524_v36 = vadd.f32 %v2492_v47, %v2491_v8  ;;  %v2152_v54 = vsel %vm1977_vm3, %v5037_v60, 0.0  ;;  %2225 = vadd.xlane.f32.xlu2 %v2224_v13  ;;  %v3216_v16 = vpop.eup %3215 }
 0x6b0   : > { %3221 = vpow2.f32 %v2144_v55  ;;  %2153 = vadd.xlane.f32.xlu0 %v2152_v54  ;;  %v2276_v7 = vmul.f32 %v3216_v16, %v4953_v39 }
 0x6b2   : > { %v3218_v18 = vpop.eup %3217  ;;  %v2380_v23 = vpop.f32.mrf.mxu3 }
 0x6b3   : > { %v5043_v58 = vpop.eup %3219  ;;  %v2465_v9 = vsub.f32 %v2437_v46, %v2380_v23  ;;  %v1992_v30 = vpop.xlane.xlu2 %1991  ;;  %v2277_v11 = vmul.f32 %v3218_v18, %v4967_v31  ;;  %v2438_v31 = vld [vmem:[#allocation3 + $0x38] sm:$0xff]  ;;  %v2442_v23 = vld [vmem:[#allocation3 + $0x20] sm:$0xff] }
 0x6b4   : > { %v2066_v50 = vsub.f32 %v4771_v5, %v1992_v30  ;;  %v2161_v41 = vsel %vm1977_vm3, %v5043_v58, 0.0  ;;  %v2208_v38 = vpop.xlane.xlu1 %2207  ;;  %v2214_v0 = vpop.xlane.xlu0 %2213 }
 0x6b5   : > { %v2493_v27 = vmul.f32 %v2465_v9, %v2465_v9  ;;  %v2295_v56 = vpack.c.bf16 %v2277_v11, %v2276_v7  ;;  %v2443_v7 = vld [vmem:[#allocation3 + $0x68] sm:$0xff] }
 0x6b6   : > { %v5048_v28 = vpop.eup %3221  ;;  %v2098_v40 = vmul.f32 1.442695, %v2066_v50 }
 0x6b7   : > { %v2525_v53 = vadd.f32 %v2524_v36, %v2493_v27  ;;  %2879 = vmatmul.msk.bf16.gmra.mxu3 %vm1977_vm3, %v2295_v56  ;;  %2162 = vadd.xlane.f32.xlu2 %v2161_v41  ;;  %v2227_v39 = vsel %vm1977_vm3, %v5048_v28, 0.0 }
 0x6b8   : > { %3223 = vpow2.f32 %v2098_v40  ;;  %2228 = vadd.xlane.f32.xlu0 %v2227_v39 }
 0x6b9   : > { %3225 = vrcp.f32 %v2208_v38 }
 0x6ba   : > { %v2383_v5 = vpop.f32.mrf.mxu3 }
 0x6bb   : > { %v2466_v35 = vsub.f32 %v2438_v31, %v2383_v5  ;;  %v2211_v61 = vpop.xlane.xlu2 %2210 }
 0x6bc   : > { %3227 = vrcp.f32 %v2211_v61  ;;  %v2217_v52 = vpop.xlane.xlu1 %2216  ;;  %v2151_v8 = vpop.xlane.xlu0 %2150 }
 0x6bd   : > { %v2494_v10 = vmul.f32 %v2466_v35, %v2466_v35  ;;  %3229 = vrcp.f32 %v2217_v52  ;;  %v2444_v35 = vld [vmem:[#allocation3 + $0x28] sm:$0xff] }
 0x6be   : > { %v5055_v4 = vpop.eup %3223  ;;  %3231 = vrcp.f32 %v2214_v0 }
 0x6bf   : > { %v2526_v51 = vadd.f32 %v2525_v53, %v2494_v10  ;;  %v2158_v33 = vsel %vm1977_vm3, %v5055_v4, 0.0  ;;  %v3226_v20 = vpop.eup %3225  ;;  %3233 = vrcp.f32 %v2151_v8 }
 0x6c0   : > { %2159 = vadd.xlane.f32.xlu1 %v2158_v33  ;;  %v2278_v59 = vmul.f32 %v3226_v20, %v4979_v32 }
 0x6c2   : > { %v3228_v14 = vpop.eup %3227  ;;  %v2385_v21 = vpop.f32.mrf.mxu3 }
 0x6c3   : > { %v2467_v42 = vsub.f32 %v2439_v43, %v2385_v21  ;;  %v2279_v3 = vmul.f32 %v3228_v14, %v4990_v48  ;;  %v3230_v24 = vpop.eup %3229 }
 0x6c4   : > { %v3232_v29 = vpop.eup %3231  ;;  %v2281_v32 = vmul.f32 %v3230_v24, %v4994_v17  ;;  %v2220_v13 = vpop.xlane.xlu1 %2219 }
 0x6c5   : > { %v2495_v37 = vmul.f32 %v2467_v42, %v2467_v42  ;;  %v2296_v44 = vpack.c.bf16 %v2279_v3, %v2278_v59  ;;  %v2280_v48 = vmul.f32 %v3232_v29, %v4977_v22  ;;  %v3234_v36 = vpop.eup %3233  ;;  %v2445_v59 = vld [vmem:[#allocation3 + $0x90] sm:$0xff] }
 0x6c6   : > { %v2259_v46 = vmul.f32 %v3234_v36, %v4992_v63 }
 0x6c7   : > { %v2527_v1 = vadd.f32 %v2526_v51, %v2495_v37  ;;  %2880 = vmatmul.msk.bf16.gmra.mxu3 %vm1977_vm3, %v2296_v44  ;;  %v2297_v6 = vpack.c.bf16 %v2281_v32, %v2280_v48 }
 0x6ca   : > { %v2388_v19 = vpop.f32.mrf.mxu3 }
 0x6cb   : > { %v2468_v49 = vsub.f32 %v2440_v15, %v2388_v19 }
 0x6cc   : > { %v2157_v30 = vpop.xlane.xlu1 %2156 }
 0x6cd   : > { %v2496_v25 = vmul.f32 %v2468_v49, %v2468_v49  ;;  %v2446_v49 = vld [vmem:[#allocation3 + $0x58] sm:$0xff] }
 0x6cf   : > { %v5062_v34 = vadd.f32 %v2527_v1, %v2496_v25 }
 0x6d2   : > { %v5067_v47 = vpop.f32.mrf.mxu3 }
 0x6d7   : > { %2881 = vmatmul.msk.bf16.gmra.mxu3 %vm1977_vm3, %v2297_v6 }
 0x712   : > { %v2148_v55 = vpop.xlane.xlu2 %2147 }
 0x713   : > { %3235 = vrcp.f32 %v2148_v55 }
 0x714   : > { %3237 = vrcp.f32 %v2220_v13 }
 0x719   : > { %v3236_v54 = vpop.eup %3235  ;;  %v2393_v16 = vpop.f32.mrf.mxu3 }
 0x71a   : > { %v2258_v17 = vmul.f32 %v3236_v54, %v5020_v12  ;;  %v2223_v18 = vpop.xlane.xlu2 %2222  ;;  %v3238_v9 = vpop.eup %3237  ;;  %v2470_v11 = vsub.f32 %v2442_v23, %v2393_v16 }
 0x71b   : > { %3239 = vrcp.f32 %v2223_v18  ;;  %v2282_v40 = vmul.f32 %v3238_v9, %v5004_v45  ;;  %v2441_v9 = vld [vmem:[#allocation3 + $0x48] sm:$0xff] }
 0x71c   : > { %v2286_v22 = vpack.c.bf16 %v2259_v46, %v2258_v17  ;;  %3241 = vrcp.f32 %v2157_v30  ;;  %v2498_v12 = vmul.f32 %v2470_v11, %v2470_v11  ;;  %v2449_v30 = vld [vmem:[#allocation3 + $0x8] sm:$0xff] }
 0x71e   : > { %2870 = vmatmul.msk.bf16.vlgmr.msrb.gmra.mxu1 %vm1977_vm3, %v2286_v22  ;;  %v2450_v22 = vld [vmem:[#allocation3 + $0x10] sm:$0xff] }
 0x721   : > { %v3240_v50 = vpop.eup %3239  ;;  %v2395_v27 = vpop.f32.mrf.mxu3 }
 0x722   : > { %v2471_v56 = vsub.f32 %v2443_v7, %v2395_v27  ;;  %v2283_v63 = vmul.f32 %v3240_v50, %v5028_v57  ;;  %v2226_v39 = vpop.xlane.xlu2 %2225  ;;  %v3242_v5 = vpop.eup %3241  ;;  %v2448_v50 = vld [vmem:[#allocation3 + $0xa8] sm:$0xff]  ;;  %v2469_v27 = vsub.f32 %v2441_v9, %v5067_v47 }
 0x723   : > { %v2154_v41 = vpop.xlane.xlu0 %2153  ;;  %v2261_v57 = vmul.f32 %v3242_v5, %v5008_v26  ;;  %v2453_v5 = vld [vmem:[#allocation3 + $0x60] sm:$0xff] }
 0x724   : > { %v2499_v53 = vmul.f32 %v2471_v56, %v2471_v56  ;;  %3243 = vrcp.f32 %v2154_v41  ;;  %v2298_v38 = vpack.c.bf16 %v2283_v63, %v2282_v40  ;;  %v2429_v41 = vld [vmem:[#allocation3 + $0xb0] sm:$0xff] }
 0x725   : > { %3245 = vrcp.f32 %v2226_v39  ;;  %v2428_v39 = vld [vmem:[#allocation3 + $0x98] sm:$0xff] }
 0x726   : > { %v2536_v31 = vadd.f32 %v2499_v53, %v2498_v12  ;;  %2882 = vmatmul.msk.bf16.gmra.mxu3 %vm1977_vm3, %v2298_v38  ;;  %v2452_v12 = vld [vmem:[#allocation3] sm:$0xff] }
 0x72a   : > { %v3244_v61 = vpop.eup %3243  ;;  %v2398_v10 = vpop.f32.mrf.mxu3 }
 0x72b   : > { %v2472_v51 = vsub.f32 %v2444_v35, %v2398_v10  ;;  %v2229_v33 = vpop.xlane.xlu0 %2228  ;;  %v2260_v45 = vmul.f32 %v3244_v61, %v5037_v60  ;;  %v2163_v21 = vpop.xlane.xlu2 %2162  ;;  %v2497_v10 = vmul.f32 %v2469_v27, %v2469_v27 }
 0x72c   : > { %3247 = vrcp.f32 %v2229_v33  ;;  %v3246_v42 = vpop.eup %3245 }
 0x72d   : > { %v2500_v20 = vmul.f32 %v2472_v51, %v2472_v51  ;;  %v2287_v43 = vpack.c.bf16 %v2261_v57, %v2260_v45  ;;  %3249 = vrcp.f32 %v2163_v21  ;;  %v2284_v0 = vmul.f32 %v3246_v42, %v5034_v62  ;;  %v2431_v57 = vld [vmem:[#allocation3 + $0x18] sm:$0xff] }
 0x72f   : > { %v2537_v14 = vadd.f32 %v2536_v31, %v2500_v20  ;;  %2871 = vmatmul.msk.bf16.gmra.mxu1 %vm1977_vm3, %v2287_v43  ;;  %v2430_v31 = vld [vmem:[#allocation3 + $0x70] sm:$0xff]  ;;  %v2454_v43 = vld [vmem:[#allocation3 + $0xc0] sm:$0xff] }
 0x732   : > { %v3248_v3 = vpop.eup %3247  ;;  %v2400_v52 = vpop.f32.mrf.mxu3 }
 0x733   : > { %v2473_v37 = vsub.f32 %v2445_v59, %v2400_v52  ;;  %v2160_v44 = vpop.xlane.xlu1 %2159  ;;  %v2285_v60 = vmul.f32 %v3248_v3, %v5048_v28  ;;  %v3250_v19 = vpop.eup %3249  ;;  %v2432_v52 = vld [vmem:[#allocation3 + $0xc8] sm:$0xff] }
 0x734   : > { %3251 = vrcp.f32 %v2160_v44  ;;  %v2263_v48 = vmul.f32 %v3250_v19, %v5043_v58  ;;  %v2451_v58 = vld [vmem:[#allocation3 + $0xd8] sm:$0xff] }
 0x735   : > { %v2501_v26 = vmul.f32 %v2473_v37, %v2473_v37  ;;  %v2299_v1 = vpack.c.bf16 %v2285_v60, %v2284_v0 }
 0x737   : > { %v2538_v15 = vadd.f32 %v2537_v14, %v2501_v26  ;;  %2883 = vmatmul.msk.bf16.gmra.mxu3 %vm1977_vm3, %v2299_v1  ;;  %v2529_v26 = vadd.f32 %v5062_v34, %v2497_v10 }
 0x73a   : > { %v3252_v25 = vpop.eup %3251  ;;  %v2403_v24 = vpop.f32.mrf.mxu3 }
 0x73b   : > { %v2474_v29 = vsub.f32 %v2446_v49, %v2403_v24  ;;  %v2262_v32 = vmul.f32 %v3252_v25, %v5055_v4  ;;  %v2447_v4 = vld [vmem:[#allocation3 + $0x80] sm:$0xff] }
 0x73d   : > { %v2502_v6 = vmul.f32 %v2474_v29, %v2474_v29  ;;  %v2288_v8 = vpack.c.bf16 %v2263_v48, %v2262_v32  ;;  %v2455_v32 = vld [vmem:[#allocation3 + $0x30] sm:$0xff]  ;;  %v2434_v48 = vld [vmem:[#allocation3 + $0xb8] sm:$0xff] }
 0x73f   : > { %v2539_v62 = vadd.f32 %v2538_v15, %v2502_v6  ;;  %2872 = vmatmul.msk.bf16.gmra.mxu1 %vm1977_vm3, %v2288_v8 }
 0x742   : > { %v2405_v28 = vpop.f32.mrf.mxu3 }
 0x743   : > { %v2475_v56 = vsub.f32 %v2447_v4, %v2405_v28 }
 0x745   : > { %v2503_v51 = vmul.f32 %v2475_v56, %v2475_v56 }
 0x747   : > { %v2540_v1 = vadd.f32 %v2539_v62, %v2503_v51  ;;  %v2462_v62 = vsub.f32 %v2434_v48, %v5017_v2 }
 0x749   : > { %v2490_v56 = vmul.f32 %v2462_v62, %v2462_v62 }
 0x74a   : > { %v2408_v55 = vpop.f32.mrf.mxu3 }
 0x74b   : > { %v2476_v53 = vsub.f32 %v2448_v50, %v2408_v55 }
 0x74d   : > { %v2504_v42 = vmul.f32 %v2476_v53, %v2476_v53 }
 0x74f   : > { %v2541_v29 = vadd.f32 %v2540_v1, %v2504_v42 }
 0x752   : > { %v2410_v13 = vpop.f32.mrf.mxu3 }
 0x753   : > { %v2477_v40 = vsub.f32 %v2449_v30, %v2410_v13  ;;  %v2530_v13 = vrot.slane %v2529_v26, 4 }
 0x755   : > { %v2505_v33 = vmul.f32 %v2477_v40, %v2477_v40 }
 0x75a   : > { %v2413_v36 = vpop.f32.mrf.mxu3 }
 0x75b   : > { %v2478_v7 = vsub.f32 %v2450_v22, %v2413_v36 }
 0x75d   : > { %v2506_v38 = vmul.f32 %v2478_v7, %v2478_v7 }
 0x75f   : > { %v2548_v59 = vadd.f32 %v2506_v38, %v2505_v33 }
 0x762   : > { %v2415_v16 = vpop.f32.mrf.mxu3 }
 0x763   : > { %v2479_v63 = vsub.f32 %v2451_v58, %v2415_v16  ;;  %v2531_v58 = vadd.f32 %v2530_v13, %v2529_v26  ;;  %v5156_v26 = vmov 0.0  }
 0x765   : > { %v2507_v45 = vmul.f32 %v2479_v63, %v2479_v63 }
 0x767   : > { %v2549_v15 = vadd.f32 %v2548_v59, %v2507_v45 }
 0x79b   : > { %v2358_v54 = vpop.f32.mrf.mxu1 }
 0x79c   : > { %v2456_v47 = vsub.f32 %v2428_v39, %v2358_v54  ;;  %v2433_v54 = vld [vmem:[#allocation3 + $0xd0] sm:$0xff] }
 0x79e   : > { %v2484_v19 = vmul.f32 %v2456_v47, %v2456_v47 }
 0x7a3   : > { %v2360_v46 = vpop.f32.mrf.mxu1 }
 0x7a4   : > { %v2457_v35 = vsub.f32 %v2429_v41, %v2360_v46  ;;  %v2532_v41 = vrot.slane %v2531_v58, 2 }
 0x7a6   : > { %v2485_v37 = vmul.f32 %v2457_v35, %v2457_v35 }
 0x7a8   : > { %v2512_v6 = vadd.f32 %v2485_v37, %v2484_v19  ;;  %v2575_v37 = vstv %s3327_s16  ;;  %v2579_v19 = vld [vmem:[#allocation4] sm:$0xf] }
 0x7a9   : > { %v2418_v17 = vpop.f32.mrf.mxu3 }
 0x7aa   : > { %v2480_v61 = vsub.f32 %v2452_v12, %v2418_v17 }
 0x7ac   : > { %v2363_v18 = vpop.f32.mrf.mxu1  ;;  %v2508_v44 = vmul.f32 %v2480_v61, %v2480_v61 }
 0x7ad   : > { %v2458_v14 = vsub.f32 %v2430_v31, %v2363_v18  ;;  %v2542_v18 = vrot.slane %v2541_v29, 4  ;;  %v2533_v31 = vadd.f32 %v2532_v41, %v2531_v58 }
 0x7ae   : > { %v2550_v8 = vadd.f32 %v2549_v15, %v2508_v44  ;;  %v5155_v44 = vld [vmem:[#allocation11_spill] sm:$0xff] }
 0x7af   : > { %v2486_v49 = vmul.f32 %v2458_v14, %v2458_v14  ;;  %v2543_v27 = vadd.f32 %v2542_v18, %v2541_v29  ;;  %v2534_v51 = vrot.slane %v2533_v31, 1  ;;  %vm2576_vm8 = vcmp.eq.s32.totalorder %v5155_v44, %v2575_v37 }
 0x7b0   : > { %v2884_v1 = vsel %vm2576_vm8, 1.0, %v5156_v26 }
 0x7b1   : > { %v2420_v23 = vpop.f32.mrf.mxu3  ;;  %v2513_v16 = vadd.f32 %v2512_v6, %v2486_v49  ;;  %v2544_v38 = vrot.slane %v2543_v27, 2 }
 0x7b2   : > { %v2481_v21 = vsub.f32 %v2453_v5, %v2420_v23 }
 0x7b3   : > { %v2545_v35 = vadd.f32 %v2544_v38, %v2543_v27 }
 0x7b4   : > { %v2365_v11 = vpop.f32.mrf.mxu1  ;;  %v2509_v25 = vmul.f32 %v2481_v21, %v2481_v21 }
 0x7b5   : > { %v2459_v0 = vsub.f32 %v2431_v57, %v2365_v11  ;;  %v2546_v45 = vrot.slane %v2545_v35, 1 }
 0x7b6   : > { %v2551_v46 = vadd.f32 %v2550_v8, %v2509_v25 }
 0x7b7   : > { %v2487_v28 = vmul.f32 %v2459_v0, %v2459_v0  ;;  %v2547_v14 = vadd.f32 %v2546_v45, %v2545_v35 }
 0x7b9   : > { %v2514_v23 = vadd.f32 %v2513_v16, %v2487_v28 }
 0x7ba   : > { %v2423_v20 = vpop.f32.mrf.mxu3 }
 0x7bb   : > { %v2482_v60 = vsub.f32 %v2454_v43, %v2423_v20  ;;  %v2535_v43 = vadd.f32 %v2534_v51, %v2533_v31 }
 0x7bc   : > { %v2368_v3 = vpop.f32.mrf.mxu1 }
 0x7bd   : > { %v2460_v24 = vsub.f32 %v2432_v52, %v2368_v3  ;;  %v2510_v55 = vmul.f32 %v2482_v60, %v2482_v60 }
 0x7bf   : > { %v2488_v17 = vmul.f32 %v2460_v24, %v2460_v24  ;;  %v2552_v9 = vadd.f32 %v2551_v46, %v2510_v55 }
 0x7c1   : > { %v2515_v7 = vadd.f32 %v2514_v23, %v2488_v17 }
 0x7c2   : > { %v2425_v36 = vpop.f32.mrf.mxu3 }
 0x7c3   : > { %v2483_v34 = vsub.f32 %v2455_v32, %v2425_v36 }
 0x7c4   : > { %v2370_v22 = vpop.f32.mrf.mxu1 }
 0x7c5   : > { %v2511_v4 = vmul.f32 %v2483_v34, %v2483_v34  ;;  %v2461_v30 = vsub.f32 %v2433_v54, %v2370_v22 }
 0x7c7   : > { %v2553_v11 = vadd.f32 %v2552_v9, %v2511_v4  ;;  %v2489_v50 = vmul.f32 %v2461_v30, %v2461_v30 }
 0x7c9   : > { %v2554_v40 = vrot.slane %v2553_v11, 4  ;;  %v2516_v63 = vadd.f32 %v2515_v7, %v2489_v50 }
 0x7cb   : > { %v2555_v12 = vadd.f32 %v2554_v40, %v2553_v11  ;;  %v2517_v53 = vadd.f32 %v2516_v63, %v2490_v56 }
 0x7cd   : > { %v2556_v39 = vrot.slane %v2555_v12, 2  ;;  %v2518_v2 = vrot.slane %v2517_v53, 4 }
 0x7cf   : > { %v2519_v5 = vadd.f32 %v2518_v2, %v2517_v53  ;;  %v2557_v61 = vadd.f32 %v2556_v39, %v2555_v12 }
 0x7d1   : > { %v2520_v10 = vrot.slane %v2519_v5, 2  ;;  %v2558_v20 = vrot.slane %v2557_v61, 1 }
 0x7d3   : > { %v2521_v33 = vadd.f32 %v2520_v10, %v2519_v5  ;;  %v2559_v21 = vadd.f32 %v2558_v20, %v2557_v61 }
 0x7d5   : > { %v2522_v57 = vrot.slane %v2521_v33, 1 }
 0x7d7   : > { %v2523_v47 = vadd.f32 %v2522_v57, %v2521_v33 }
 0x7d9   : > { %v2565_v42 = vsel %vm2564_vm6, %v2535_v43, %v2523_v47 }
 0x7da   : > { %v2567_v59 = vsel %vm2566_vm4, %v2547_v14, %v2565_v42 }
 0x7db   : > { %v2569_v3 = vsel %vm2568_vm5, %v2559_v21, %v2567_v59 }
 0x7dc   : > { %v2572_v52 = vsel %vm2571_vm7, %v2569_v3, 0.0 }
 0x7dd   : > { %2573 = vadd.xlane.f32.xlu0 %v2572_v52 }
 0x850   : > { %v2574_v0 = vpop.xlane.xlu0 %2573 }
 0x851   : > { %v2580_v60 = vmul.f32 0.017857144, %v2574_v0 }
 0x853   : > { %v2581_v15 = vsub.f32 0.0, %v2580_v60 }
 0x855   : > { %v2582_v49 = vmul.f32 %v2884_v1, %v2581_v15 }
 0x857   : > { %v2583_v25 = vadd.f32 %v2582_v49, %v2579_v19 }
 0x859   : > { %2584 = vst [vmem:[#allocation4] sm:$0xf] %v2583_v25 }
 0x85a   : > { %3041 = dma.vmem_to_hbm [thread:$0]  (%p3044_p5), %s2592_s6, 64, %s2594_s9, [#allocation5]  }
 0x85b   : > { %3286 = dma.done.wait (%p3044_p5), [#allocation5], 64  }
 0x85c   : > { %3288 = vsyncadd (%p3044_p5), [#allocation5], 4294967232 }
 0x85d PF: > { %s15_s15 = sadd.s32 1, %s3291_s15  }
 0x85e   : > { %p12_p6 = scmp.ge.s32.totalorder %s15_s15, 4  }
 0x860   :  { %14 = sbr.rel (!%p12_p6) target bundleno = 1 (0x1), region = 67 }
 0x865   :  { %2607 = vsyncpa [#allocation5], 1 }
 0x866   :  { %2609 = vsyncpa [#allocation5 + $0x1], 1 }

</bundles_post_ra>
